<compile_context>
chip_gen: v7x
topology: tpu7x:2x2x1
jax: 0.10.0
libtpu: 0.0.40
codegen_flags: <defaults>
</compile_context>

<pallas_src>
import math

import jax
import jax.numpy as jnp
from jax import lax
from jax.experimental import pallas as pl
from jax.experimental.pallas import tpu as pltpu


# ---------------------------------------------------------------------------
# small helpers
# ---------------------------------------------------------------------------
def _round_up(n, m):
    return ((n + m - 1) // m) * m


def _pick_tile_b(batch):
    """Largest MXU-filling batch tile that divides `batch`; prefer >=2 grid steps
    so the 'parallel' batch axis can shard across v7x's two TensorCores."""
    for t in (256, 128, 64, 32, 16, 8):
        if batch % t == 0 and batch // t >= 2:
            return t
    for t in (256, 128, 64, 32, 16, 8):
        if batch % t == 0:
            return t
    return batch  # tiny/odd batch: one full-batch block


def _layernorm(h, gamma, beta, eps=1e-5):
    # LayerNorm over the feature (lane) axis, biased variance, PyTorch eps=1e-5.
    mean = jnp.mean(h, axis=-1, keepdims=True)
    centered = h - mean
    var = jnp.mean(centered * centered, axis=-1, keepdims=True)
    return centered * lax.rsqrt(var + eps) * gamma + beta


def _gelu_exact(x):
    # PyTorch nn.GELU() default: 0.5 * x * (1 + erf(x / sqrt(2)))
    return 0.5 * x * (1.0 + lax.erf(x * (1.0 / math.sqrt(2.0))))


# ---------------------------------------------------------------------------
# fused MLP kernel: one grid step processes a (tile_b, embed_dim) row-block
# ---------------------------------------------------------------------------
def enhanced_actor_kernel(x_ref, w1_ref, v1_ref, w2_ref, v2_ref, w3_ref, b3_ref,
                          o_ref):
    # bf16 MXU operands + f32 accumulation; all elementwise math in f32.
    x = x_ref[...].astype(jnp.bfloat16)

    # Block 1: Linear(E -> H) + LayerNorm + GELU (+ Dropout = identity in eval)
    v1 = v1_ref[...]                                   # rows: [bias, gamma, beta]
    h = jnp.dot(x, w1_ref[...], preferred_element_type=jnp.float32) + v1[0:1, :]
    h = _gelu_exact(_layernorm(h, v1[1:2, :], v1[2:3, :]))
    # TODO(synk): nn.Dropout(0.1) is identity in eval mode; training-mode RNG
    # masking is not implemented.

    # Block 2: Linear(H -> H//2) + LayerNorm + GELU (+ Dropout = identity)
    v2 = v2_ref[...]
    h = jnp.dot(h.astype(jnp.bfloat16), w2_ref[...],
                preferred_element_type=jnp.float32) + v2[0:1, :]
    h = _gelu_exact(_layernorm(h, v2[1:2, :], v2[2:3, :]))

    # Output head: Linear(H//2 -> A_pad)
    out = jnp.dot(h.astype(jnp.bfloat16), w3_ref[...],
                  preferred_element_type=jnp.float32) + b3_ref[...]
    o_ref[...] = out.astype(o_ref.dtype)


# ---------------------------------------------------------------------------
# wrapper
# ---------------------------------------------------------------------------
def enhanced_actor_forward(x, params, *, tile_b=None):
    """x: (B, embed_dim) float32. params: dict from init_params (bf16 weights)."""
    B, E = x.shape
    H = params["w1"].shape[1]
    H2 = params["w2"].shape[1]
    A = params["w3"].shape[1]

    if tile_b is None:
        tile_b = _pick_tile_b(B)
    assert B % tile_b == 0, (B, tile_b)

    # Lane-dense output head: pad num_actions up to a multiple of 128 so output
    # stores are unmasked; slice the padding off after the kernel.
    A_pad = _round_up(A, 128)
    w3, b3 = params["w3"], params["b3"]
    if A_pad != A:
        w3 = jnp.pad(w3, ((0, 0), (0, A_pad - A)))
        b3 = jnp.pad(b3, ((0, 0), (0, A_pad - A)))

    args = (x, params["w1"], params["v1"], params["w2"], params["v2"], w3, b3)

    def run(weight_buffers):
        if weight_buffers == 1:
            # Constant block index -> no re-fetch ever happens; single buffer
            # halves resident weight VMEM (matters on v7x's 64 MiB).
            const = lambda shape: pl.BlockSpec(shape, lambda i: (0, 0),
                                               pipeline_mode=pl.Buffered(1))
        else:
            const = lambda shape: pl.BlockSpec(shape, lambda i: (0, 0))

        f = pl.pallas_call(
            enhanced_actor_kernel,
            out_shape=jax.ShapeDtypeStruct((B, A_pad), jnp.float32),
            grid_spec=pltpu.PrefetchScalarGridSpec(
                num_scalar_prefetch=0,
                grid=(B // tile_b,),
                in_specs=[
                    pl.BlockSpec((tile_b, E), lambda i: (i, 0)),  # x row-block
                    const((E, H)), const((3, H)),        # W1 (bf16) + [b1,g1,be1]
                    const((H, H2)), const((3, H2)),      # W2 (bf16) + [b2,g2,be2]
                    const((H2, A_pad)), const((1, A_pad)),        # W3 (bf16) + b3
                ],
                out_specs=pl.BlockSpec((tile_b, A_pad), lambda i: (i, 0)),
            ),
            compiler_params=pltpu.CompilerParams(
                dimension_semantics=("parallel",),
                vmem_limit_bytes=56 * 1024 * 1024,  # safe on v5e/v6e/v7x
            ),
        )
        return jax.block_until_ready(f(*args))

    try:
        out = run(1)
    except Exception:
        # TODO(synk): pl.Buffered(1) pipeline_mode unsupported on this JAX/Mosaic
        # build; fall back to default double-buffered weight blocks.
        out = run(2)

    return out[:, :A] if A_pad != A else out


# ---------------------------------------------------------------------------
# parameter init mirroring EnhancedActor._init_weights
# (Linear weight ~ N(0, 0.02) stored bf16, bias = 0, LN gamma = 1, beta = 0)
# ---------------------------------------------------------------------------
def init_params(key, embed_dim, hidden_dim, num_actions):
    k1, k2, k3 = jax.random.split(key, 3)
    h2 = hidden_dim // 2

    def lin_w(k, din, dout):
        # PyTorch stores (out, in); we keep the kernel-friendly (in, out) transpose.
        # bf16 storage halves HBM->VMEM weight traffic; matmul accumulates in f32.
        return (0.02 * jax.random.normal(k, (din, dout), jnp.float32)
                ).astype(jnp.bfloat16)

    def vec3(dim):
        # rows: [linear bias, LN gamma, LN beta]  (kept f32 for the VPU path)
        return jnp.stack([jnp.zeros((dim,), jnp.float32),
                          jnp.ones((dim,), jnp.float32),
                          jnp.zeros((dim,), jnp.float32)], axis=0)

    return {
        "w1": lin_w(k1, embed_dim, hidden_dim), "v1": vec3(hidden_dim),
        "w2": lin_w(k2, hidden_dim, h2),        "v2": vec3(h2),
        "w3": lin_w(k3, h2, num_actions),
        "b3": jnp.zeros((1, num_actions), jnp.float32),
    }


def reference_forward(x, p):
    """Pure-JAX f32 reference of the PyTorch eval-mode forward (weights
    dequantized from their bf16 storage)."""
    def ln(h, g, b):
        m = jnp.mean(h, axis=-1, keepdims=True)
        v = jnp.mean((h - m) ** 2, axis=-1, keepdims=True)
        return (h - m) * lax.rsqrt(v + 1e-5) * g + b

    gelu = lambda t: 0.5 * t * (1.0 + lax.erf(t / math.sqrt(2.0)))
    w1 = p["w1"].astype(jnp.float32)
    w2 = p["w2"].astype(jnp.float32)
    w3 = p["w3"].astype(jnp.float32)
    b1, g1, be1 = p["v1"][0], p["v1"][1], p["v1"][2]
    b2, g2, be2 = p["v2"][0], p["v2"][1], p["v2"][2]
    h = gelu(ln(x @ w1 + b1, g1, be1))
    h = gelu(ln(h @ w2 + b2, g2, be2))
    return h @ w3 + p["b3"]


if __name__ == "__main__":
    # Scaled-down dims consistent with the module (embed=512, hidden=1024,
    # actions=1000). ACTIONS is deliberately NOT a multiple of 128 to exercise the
    # lane-dense output padding path; BATCH=256 exercises multi-step tiling.
    BATCH, EMBED, HIDDEN, ACTIONS = 256, 128, 256, 200

    key = jax.random.PRNGKey(0)
    kx, kp = jax.random.split(key)
    x = jax.random.normal(kx, (BATCH, EMBED), jnp.float32)
    params = init_params(kp, EMBED, HIDDEN, ACTIONS)

    out = enhanced_actor_forward(x, params)
    out = jax.block_until_ready(out)

    ref = reference_forward(x, params)
    assert out.shape == (BATCH, ACTIONS)
    # bf16 matmul operands with f32 accumulation -> allow ~1e-2-level deviation.
    err = float(jnp.max(jnp.abs(out - ref)))
    assert jnp.allclose(out, ref, atol=2e-2, rtol=2e-2), err

    print("KERNEL_OK")
</pallas_src>

<mosaic_0001>
module attributes {stable_mosaic.version = 11 : i64} {
  func.func @enhanced_actor_kernel(%arg0: i32, %arg1: memref<128x128xf32, #tpu.memory_space<vmem>>, %arg2: memref<128x256xbf16, #tpu.memory_space<vmem>>, %arg3: memref<3x256xf32, #tpu.memory_space<vmem>>, %arg4: memref<256x128xbf16, #tpu.memory_space<vmem>>, %arg5: memref<3x128xf32, #tpu.memory_space<vmem>>, %arg6: memref<128x256xbf16, #tpu.memory_space<vmem>>, %arg7: memref<1x256xf32, #tpu.memory_space<vmem>>, %arg8: memref<128x256xf32, #tpu.memory_space<vmem>>) attributes {dimension_semantics = [#tpu.dimension_semantics<parallel>], iteration_bounds = array<i64: 2>, scalar_prefetch = 0 : i64, scratch_operands = 0 : i64, tpu.core_type = #tpu.core_type<tc>, window_params = [{transform_indices = @transform_0, window_bounds = array<i64: 128, 128>}, {pipeline_mode = #tpu.pipeline_mode<synchronous>, transform_indices = @transform_1, window_bounds = array<i64: 128, 256>}, {pipeline_mode = #tpu.pipeline_mode<synchronous>, transform_indices = @transform_2, window_bounds = array<i64: 3, 256>}, {pipeline_mode = #tpu.pipeline_mode<synchronous>, transform_indices = @transform_3, window_bounds = array<i64: 256, 128>}, {pipeline_mode = #tpu.pipeline_mode<synchronous>, transform_indices = @transform_4, window_bounds = array<i64: 3, 128>}, {pipeline_mode = #tpu.pipeline_mode<synchronous>, transform_indices = @transform_5, window_bounds = array<i64: 128, 256>}, {pipeline_mode = #tpu.pipeline_mode<synchronous>, transform_indices = @transform_6, window_bounds = array<i64: 1, 256>}, {transform_indices = @transform_7, window_bounds = array<i64: 128, 256>}]} {
    %c0 = arith.constant 0 : index
    %c0_0 = arith.constant 0 : index
    %0 = vector.load %arg1[%c0, %c0_0] : memref<128x128xf32, #tpu.memory_space<vmem>>, vector<128x128xf32>
    %1 = arith.truncf %0 : vector<128x128xf32> to vector<128x128xbf16>
    %c0_1 = arith.constant 0 : index
    %c0_2 = arith.constant 0 : index
    %2 = vector.load %arg3[%c0_1, %c0_2] : memref<3x256xf32, #tpu.memory_space<vmem>>, vector<3x256xf32>
    %c0_3 = arith.constant 0 : index
    %c0_4 = arith.constant 0 : index
    %3 = vector.load %arg2[%c0_3, %c0_4] : memref<128x256xbf16, #tpu.memory_space<vmem>>, vector<128x256xbf16>
    %cst = arith.constant dense<0.000000e+00> : vector<128x256xf32>
    %4 = tpu.matmul %1, %3, %cst {dimension_numbers = #tpu.dot_dimension_numbers<[1], [0], [0], [1], [0, 0, 1, 1], [], []>} : vector<128x128xbf16>, vector<128x256xbf16>, vector<128x256xf32> -> vector<128x256xf32>
    %5 = vector.extract_strided_slice %2 {offsets = [0, 0], sizes = [1, 256], strides = [1, 1]} : vector<3x256xf32> to vector<1x256xf32>
    %6 = vector.broadcast %5 : vector<1x256xf32> to vector<128x256xf32>
    %7 = arith.addf %4, %6 : vector<128x256xf32>
    %8 = vector.extract_strided_slice %2 {offsets = [1, 0], sizes = [1, 256], strides = [1, 1]} : vector<3x256xf32> to vector<1x256xf32>
    %9 = vector.extract_strided_slice %2 {offsets = [2, 0], sizes = [1, 256], strides = [1, 1]} : vector<3x256xf32> to vector<1x256xf32>
    %cst_5 = arith.constant dense<0.000000e+00> : vector<128xf32>
    %10 = vector.multi_reduction <add>, %7, %cst_5 [1] : vector<128x256xf32> to vector<128xf32>
    %11 = vector.shape_cast %10 : vector<128xf32> to vector<128x1xf32>
    %cst_6 = arith.constant 2.560000e+02 : f32
    %12 = vector.broadcast %cst_6 : f32 to vector<128x1xf32>
    %13 = arith.divf %11, %12 : vector<128x1xf32>
    %14 = vector.broadcast %13 : vector<128x1xf32> to vector<128x256xf32>
    %15 = arith.subf %7, %14 : vector<128x256xf32>
    %16 = arith.mulf %15, %15 : vector<128x256xf32>
    %cst_7 = arith.constant dense<0.000000e+00> : vector<128xf32>
    %17 = vector.multi_reduction <add>, %16, %cst_7 [1] : vector<128x256xf32> to vector<128xf32>
    %18 = vector.shape_cast %17 : vector<128xf32> to vector<128x1xf32>
    %cst_8 = arith.constant 2.560000e+02 : f32
    %19 = vector.broadcast %cst_8 : f32 to vector<128x1xf32>
    %20 = arith.divf %18, %19 : vector<128x1xf32>
    %cst_9 = arith.constant 9.99999974E-6 : f32
    %21 = vector.broadcast %cst_9 : f32 to vector<128x1xf32>
    %22 = arith.addf %20, %21 : vector<128x1xf32>
    %23 = math.rsqrt %22 : vector<128x1xf32>
    %24 = vector.broadcast %23 : vector<128x1xf32> to vector<128x256xf32>
    %25 = arith.mulf %15, %24 : vector<128x256xf32>
    %26 = vector.broadcast %8 : vector<1x256xf32> to vector<128x256xf32>
    %27 = arith.mulf %25, %26 : vector<128x256xf32>
    %28 = vector.broadcast %9 : vector<1x256xf32> to vector<128x256xf32>
    %29 = arith.addf %27, %28 : vector<128x256xf32>
    %cst_10 = arith.constant 5.000000e-01 : f32
    %30 = vector.broadcast %cst_10 : f32 to vector<128x256xf32>
    %31 = arith.mulf %30, %29 : vector<128x256xf32>
    %cst_11 = arith.constant 0.707106769 : f32
    %32 = vector.broadcast %cst_11 : f32 to vector<128x256xf32>
    %33 = arith.mulf %29, %32 : vector<128x256xf32>
    %34 = math.erf %33 : vector<128x256xf32>
    %cst_12 = arith.constant 1.000000e+00 : f32
    %35 = vector.broadcast %cst_12 : f32 to vector<128x256xf32>
    %36 = arith.addf %35, %34 : vector<128x256xf32>
    %37 = arith.mulf %31, %36 : vector<128x256xf32>
    %c0_13 = arith.constant 0 : index
    %c0_14 = arith.constant 0 : index
    %38 = vector.load %arg5[%c0_13, %c0_14] : memref<3x128xf32, #tpu.memory_space<vmem>>, vector<3x128xf32>
    %39 = arith.truncf %37 : vector<128x256xf32> to vector<128x256xbf16>
    %c0_15 = arith.constant 0 : index
    %c0_16 = arith.constant 0 : index
    %40 = vector.load %arg4[%c0_15, %c0_16] : memref<256x128xbf16, #tpu.memory_space<vmem>>, vector<256x128xbf16>
    %cst_17 = arith.constant dense<0.000000e+00> : vector<128x128xf32>
    %41 = tpu.matmul %39, %40, %cst_17 {dimension_numbers = #tpu.dot_dimension_numbers<[1], [0], [0], [1], [0, 0, 1, 1], [], []>} : vector<128x256xbf16>, vector<256x128xbf16>, vector<128x128xf32> -> vector<128x128xf32>
    %42 = vector.extract_strided_slice %38 {offsets = [0, 0], sizes = [1, 128], strides = [1, 1]} : vector<3x128xf32> to vector<1x128xf32>
    %43 = vector.broadcast %42 : vector<1x128xf32> to vector<128x128xf32>
    %44 = arith.addf %41, %43 : vector<128x128xf32>
    %45 = vector.extract_strided_slice %38 {offsets = [1, 0], sizes = [1, 128], strides = [1, 1]} : vector<3x128xf32> to vector<1x128xf32>
    %46 = vector.extract_strided_slice %38 {offsets = [2, 0], sizes = [1, 128], strides = [1, 1]} : vector<3x128xf32> to vector<1x128xf32>
    %cst_18 = arith.constant dense<0.000000e+00> : vector<128xf32>
    %47 = vector.multi_reduction <add>, %44, %cst_18 [1] : vector<128x128xf32> to vector<128xf32>
    %48 = vector.shape_cast %47 : vector<128xf32> to vector<128x1xf32>
    %cst_19 = arith.constant 1.280000e+02 : f32
    %49 = vector.broadcast %cst_19 : f32 to vector<128x1xf32>
    %50 = arith.divf %48, %49 : vector<128x1xf32>
    %51 = vector.broadcast %50 : vector<128x1xf32> to vector<128x128xf32>
    %52 = arith.subf %44, %51 : vector<128x128xf32>
    %53 = arith.mulf %52, %52 : vector<128x128xf32>
    %cst_20 = arith.constant dense<0.000000e+00> : vector<128xf32>
    %54 = vector.multi_reduction <add>, %53, %cst_20 [1] : vector<128x128xf32> to vector<128xf32>
    %55 = vector.shape_cast %54 : vector<128xf32> to vector<128x1xf32>
    %cst_21 = arith.constant 1.280000e+02 : f32
    %56 = vector.broadcast %cst_21 : f32 to vector<128x1xf32>
    %57 = arith.divf %55, %56 : vector<128x1xf32>
    %cst_22 = arith.constant 9.99999974E-6 : f32
    %58 = vector.broadcast %cst_22 : f32 to vector<128x1xf32>
    %59 = arith.addf %57, %58 : vector<128x1xf32>
    %60 = math.rsqrt %59 : vector<128x1xf32>
    %61 = vector.broadcast %60 : vector<128x1xf32> to vector<128x128xf32>
    %62 = arith.mulf %52, %61 : vector<128x128xf32>
    %63 = vector.broadcast %45 : vector<1x128xf32> to vector<128x128xf32>
    %64 = arith.mulf %62, %63 : vector<128x128xf32>
    %65 = vector.broadcast %46 : vector<1x128xf32> to vector<128x128xf32>
    %66 = arith.addf %64, %65 : vector<128x128xf32>
    %cst_23 = arith.constant 5.000000e-01 : f32
    %67 = vector.broadcast %cst_23 : f32 to vector<128x128xf32>
    %68 = arith.mulf %67, %66 : vector<128x128xf32>
    %cst_24 = arith.constant 0.707106769 : f32
    %69 = vector.broadcast %cst_24 : f32 to vector<128x128xf32>
    %70 = arith.mulf %66, %69 : vector<128x128xf32>
    %71 = math.erf %70 : vector<128x128xf32>
    %cst_25 = arith.constant 1.000000e+00 : f32
    %72 = vector.broadcast %cst_25 : f32 to vector<128x128xf32>
    %73 = arith.addf %72, %71 : vector<128x128xf32>
    %74 = arith.mulf %68, %73 : vector<128x128xf32>
    %75 = arith.truncf %74 : vector<128x128xf32> to vector<128x128xbf16>
    %c0_26 = arith.constant 0 : index
    %c0_27 = arith.constant 0 : index
    %76 = vector.load %arg6[%c0_26, %c0_27] : memref<128x256xbf16, #tpu.memory_space<vmem>>, vector<128x256xbf16>
    %cst_28 = arith.constant dense<0.000000e+00> : vector<128x256xf32>
    %77 = tpu.matmul %75, %76, %cst_28 {dimension_numbers = #tpu.dot_dimension_numbers<[1], [0], [0], [1], [0, 0, 1, 1], [], []>} : vector<128x128xbf16>, vector<128x256xbf16>, vector<128x256xf32> -> vector<128x256xf32>
    %c0_29 = arith.constant 0 : index
    %c0_30 = arith.constant 0 : index
    %78 = vector.load %arg7[%c0_29, %c0_30] : memref<1x256xf32, #tpu.memory_space<vmem>>, vector<1x256xf32>
    %79 = vector.broadcast %78 : vector<1x256xf32> to vector<128x256xf32>
    %80 = arith.addf %77, %79 : vector<128x256xf32>
    %c0_31 = arith.constant 0 : index
    %c0_32 = arith.constant 0 : index
    %81 = vector.load %arg8[%c0_31, %c0_32] : memref<128x256xf32, #tpu.memory_space<vmem>>, vector<128x256xf32>
    tpu.vector_store %arg8[%c0_31, %c0_32], %80 {strides = array<i32>} : memref<128x256xf32, #tpu.memory_space<vmem>>, vector<128x256xf32>,
    return
  }
  func.func @transform_0(%arg0: i32) -> (i32, i32) {
    %c0_i32 = arith.constant 0 : i32
    %c0_i32_0 = arith.constant 0 : i32
    return %arg0, %c0_i32 : i32, i32
  }
  func.func @transform_1(%arg0: i32) -> (i32, i32) {
    %c0_i32 = arith.constant 0 : i32
    %c0_i32_0 = arith.constant 0 : i32
    %c0_i32_1 = arith.constant 0 : i32
    return %c0_i32, %c0_i32_0 : i32, i32
  }
  func.func @transform_2(%arg0: i32) -> (i32, i32) {
    %c0_i32 = arith.constant 0 : i32
    %c0_i32_0 = arith.constant 0 : i32
    %c0_i32_1 = arith.constant 0 : i32
    return %c0_i32, %c0_i32_0 : i32, i32
  }
  func.func @transform_3(%arg0: i32) -> (i32, i32) {
    %c0_i32 = arith.constant 0 : i32
    %c0_i32_0 = arith.constant 0 : i32
    %c0_i32_1 = arith.constant 0 : i32
    return %c0_i32, %c0_i32_0 : i32, i32
  }
  func.func @transform_4(%arg0: i32) -> (i32, i32) {
    %c0_i32 = arith.constant 0 : i32
    %c0_i32_0 = arith.constant 0 : i32
    %c0_i32_1 = arith.constant 0 : i32
    return %c0_i32, %c0_i32_0 : i32, i32
  }
  func.func @transform_5(%arg0: i32) -> (i32, i32) {
    %c0_i32 = arith.constant 0 : i32
    %c0_i32_0 = arith.constant 0 : i32
    %c0_i32_1 = arith.constant 0 : i32
    return %c0_i32, %c0_i32_0 : i32, i32
  }
  func.func @transform_6(%arg0: i32) -> (i32, i32) {
    %c0_i32 = arith.constant 0 : i32
    %c0_i32_0 = arith.constant 0 : i32
    %c0_i32_1 = arith.constant 0 : i32
    return %c0_i32, %c0_i32_0 : i32, i32
  }
  func.func @transform_7(%arg0: i32) -> (i32, i32) {
    %c0_i32 = arith.constant 0 : i32
    %c0_i32_0 = arith.constant 0 : i32
    return %arg0, %c0_i32 : i32, i32
  }
}

module attributes {stable_mosaic.version = 11 : i64} {
  func.func @enhanced_actor_kernel(%arg0: i32, %arg1: memref<128x128xf32, #tpu.memory_space<vmem>>, %arg2: memref<128x256xbf16, #tpu.memory_space<vmem>>, %arg3: memref<3x256xf32, #tpu.memory_space<vmem>>, %arg4: memref<256x128xbf16, #tpu.memory_space<vmem>>, %arg5: memref<3x128xf32, #tpu.memory_space<vmem>>, %arg6: memref<128x256xbf16, #tpu.memory_space<vmem>>, %arg7: memref<1x256xf32, #tpu.memory_space<vmem>>, %arg8: memref<128x256xf32, #tpu.memory_space<vmem>>) attributes {dimension_semantics = [#tpu.dimension_semantics<parallel>], iteration_bounds = array<i64: 2>, scalar_prefetch = 0 : i64, scratch_operands = 0 : i64, tpu.core_type = #tpu.core_type<tc>, window_params = [{transform_indices = @transform_0, window_bounds = array<i64: 128, 128>}, {pipeline_mode = #tpu.pipeline_mode<synchronous>, transform_indices = @transform_1, window_bounds = array<i64: 128, 256>}, {pipeline_mode = #tpu.pipeline_mode<synchronous>, transform_indices = @transform_2, window_bounds = array<i64: 3, 256>}, {pipeline_mode = #tpu.pipeline_mode<synchronous>, transform_indices = @transform_3, window_bounds = array<i64: 256, 128>}, {pipeline_mode = #tpu.pipeline_mode<synchronous>, transform_indices = @transform_4, window_bounds = array<i64: 3, 128>}, {pipeline_mode = #tpu.pipeline_mode<synchronous>, transform_indices = @transform_5, window_bounds = array<i64: 128, 256>}, {pipeline_mode = #tpu.pipeline_mode<synchronous>, transform_indices = @transform_6, window_bounds = array<i64: 1, 256>}, {transform_indices = @transform_7, window_bounds = array<i64: 128, 256>}]} {
    %c0 = arith.constant 0 : index
    %c0_0 = arith.constant 0 : index
    %0 = vector.load %arg1[%c0, %c0_0] : memref<128x128xf32, #tpu.memory_space<vmem>>, vector<128x128xf32>
    %1 = arith.truncf %0 : vector<128x128xf32> to vector<128x128xbf16>
    %c0_1 = arith.constant 0 : index
    %c0_2 = arith.constant 0 : index
    %2 = vector.load %arg3[%c0_1, %c0_2] : memref<3x256xf32, #tpu.memory_space<vmem>>, vector<3x256xf32>
    %c0_3 = arith.constant 0 : index
    %c0_4 = arith.constant 0 : index
    %3 = vector.load %arg2[%c0_3, %c0_4] : memref<128x256xbf16, #tpu.memory_space<vmem>>, vector<128x256xbf16>
    %cst = arith.constant dense<0.000000e+00> : vector<128x256xf32>
    %4 = tpu.matmul %1, %3, %cst {dimension_numbers = #tpu.dot_dimension_numbers<[1], [0], [0], [1], [0, 0, 1, 1], [], []>} : vector<128x128xbf16>, vector<128x256xbf16>, vector<128x256xf32> -> vector<128x256xf32>
    %5 = vector.extract_strided_slice %2 {offsets = [0, 0], sizes = [1, 256], strides = [1, 1]} : vector<3x256xf32> to vector<1x256xf32>
    %6 = vector.broadcast %5 : vector<1x256xf32> to vector<128x256xf32>
    %7 = arith.addf %4, %6 : vector<128x256xf32>
    %8 = vector.extract_strided_slice %2 {offsets = [1, 0], sizes = [1, 256], strides = [1, 1]} : vector<3x256xf32> to vector<1x256xf32>
    %9 = vector.extract_strided_slice %2 {offsets = [2, 0], sizes = [1, 256], strides = [1, 1]} : vector<3x256xf32> to vector<1x256xf32>
    %cst_5 = arith.constant dense<0.000000e+00> : vector<128xf32>
    %10 = vector.multi_reduction <add>, %7, %cst_5 [1] : vector<128x256xf32> to vector<128xf32>
    %11 = vector.shape_cast %10 : vector<128xf32> to vector<128x1xf32>
    %cst_6 = arith.constant 2.560000e+02 : f32
    %12 = vector.broadcast %cst_6 : f32 to vector<128x1xf32>
    %13 = arith.divf %11, %12 : vector<128x1xf32>
    %14 = vector.broadcast %13 : vector<128x1xf32> to vector<128x256xf32>
    %15 = arith.subf %7, %14 : vector<128x256xf32>
    %16 = arith.mulf %15, %15 : vector<128x256xf32>
    %cst_7 = arith.constant dense<0.000000e+00> : vector<128xf32>
    %17 = vector.multi_reduction <add>, %16, %cst_7 [1] : vector<128x256xf32> to vector<128xf32>
    %18 = vector.shape_cast %17 : vector<128xf32> to vector<128x1xf32>
    %cst_8 = arith.constant 2.560000e+02 : f32
    %19 = vector.broadcast %cst_8 : f32 to vector<128x1xf32>
    %20 = arith.divf %18, %19 : vector<128x1xf32>
    %cst_9 = arith.constant 9.99999974E-6 : f32
    %21 = vector.broadcast %cst_9 : f32 to vector<128x1xf32>
    %22 = arith.addf %20, %21 : vector<128x1xf32>
    %23 = math.rsqrt %22 : vector<128x1xf32>
    %24 = vector.broadcast %23 : vector<128x1xf32> to vector<128x256xf32>
    %25 = arith.mulf %15, %24 : vector<128x256xf32>
    %26 = vector.broadcast %8 : vector<1x256xf32> to vector<128x256xf32>
    %27 = arith.mulf %25, %26 : vector<128x256xf32>
    %28 = vector.broadcast %9 : vector<1x256xf32> to vector<128x256xf32>
    %29 = arith.addf %27, %28 : vector<128x256xf32>
    %cst_10 = arith.constant 5.000000e-01 : f32
    %30 = vector.broadcast %cst_10 : f32 to vector<128x256xf32>
    %31 = arith.mulf %30, %29 : vector<128x256xf32>
    %cst_11 = arith.constant 0.707106769 : f32
    %32 = vector.broadcast %cst_11 : f32 to vector<128x256xf32>
    %33 = arith.mulf %29, %32 : vector<128x256xf32>
    %34 = math.erf %33 : vector<128x256xf32>
    %cst_12 = arith.constant 1.000000e+00 : f32
    %35 = vector.broadcast %cst_12 : f32 to vector<128x256xf32>
    %36 = arith.addf %35, %34 : vector<128x256xf32>
    %37 = arith.mulf %31, %36 : vector<128x256xf32>
    %c0_13 = arith.constant 0 : index
    %c0_14 = arith.constant 0 : index
    %38 = vector.load %arg5[%c0_13, %c0_14] : memref<3x128xf32, #tpu.memory_space<vmem>>, vector<3x128xf32>
    %39 = arith.truncf %37 : vector<128x256xf32> to vector<128x256xbf16>
    %c0_15 = arith.constant 0 : index
    %c0_16 = arith.constant 0 : index
    %40 = vector.load %arg4[%c0_15, %c0_16] : memref<256x128xbf16, #tpu.memory_space<vmem>>, vector<256x128xbf16>
    %cst_17 = arith.constant dense<0.000000e+00> : vector<128x128xf32>
    %41 = tpu.matmul %39, %40, %cst_17 {dimension_numbers = #tpu.dot_dimension_numbers<[1], [0], [0], [1], [0, 0, 1, 1], [], []>} : vector<128x256xbf16>, vector<256x128xbf16>, vector<128x128xf32> -> vector<128x128xf32>
    %42 = vector.extract_strided_slice %38 {offsets = [0, 0], sizes = [1, 128], strides = [1, 1]} : vector<3x128xf32> to vector<1x128xf32>
    %43 = vector.broadcast %42 : vector<1x128xf32> to vector<128x128xf32>
    %44 = arith.addf %41, %43 : vector<128x128xf32>
    %45 = vector.extract_strided_slice %38 {offsets = [1, 0], sizes = [1, 128], strides = [1, 1]} : vector<3x128xf32> to vector<1x128xf32>
    %46 = vector.extract_strided_slice %38 {offsets = [2, 0], sizes = [1, 128], strides = [1, 1]} : vector<3x128xf32> to vector<1x128xf32>
    %cst_18 = arith.constant dense<0.000000e+00> : vector<128xf32>
    %47 = vector.multi_reduction <add>, %44, %cst_18 [1] : vector<128x128xf32> to vector<128xf32>
    %48 = vector.shape_cast %47 : vector<128xf32> to vector<128x1xf32>
    %cst_19 = arith.constant 1.280000e+02 : f32
    %49 = vector.broadcast %cst_19 : f32 to vector<128x1xf32>
    %50 = arith.divf %48, %49 : vector<128x1xf32>
    %51 = vector.broadcast %50 : vector<128x1xf32> to vector<128x128xf32>
    %52 = arith.subf %44, %51 : vector<128x128xf32>
    %53 = arith.mulf %52, %52 : vector<128x128xf32>
    %cst_20 = arith.constant dense<0.000000e+00> : vector<128xf32>
    %54 = vector.multi_reduction <add>, %53, %cst_20 [1] : vector<128x128xf32> to vector<128xf32>
    %55 = vector.shape_cast %54 : vector<128xf32> to vector<128x1xf32>
    %cst_21 = arith.constant 1.280000e+02 : f32
    %56 = vector.broadcast %cst_21 : f32 to vector<128x1xf32>
    %57 = arith.divf %55, %56 : vector<128x1xf32>
    %cst_22 = arith.constant 9.99999974E-6 : f32
    %58 = vector.broadcast %cst_22 : f32 to vector<128x1xf32>
    %59 = arith.addf %57, %58 : vector<128x1xf32>
    %60 = math.rsqrt %59 : vector<128x1xf32>
    %61 = vector.broadcast %60 : vector<128x1xf32> to vector<128x128xf32>
    %62 = arith.mulf %52, %61 : vector<128x128xf32>
    %63 = vector.broadcast %45 : vector<1x128xf32> to vector<128x128xf32>
    %64 = arith.mulf %62, %63 : vector<128x128xf32>
    %65 = vector.broadcast %46 : vector<1x128xf32> to vector<128x128xf32>
    %66 = arith.addf %64, %65 : vector<128x128xf32>
    %cst_23 = arith.constant 5.000000e-01 : f32
    %67 = vector.broadcast %cst_23 : f32 to vector<128x128xf32>
    %68 = arith.mulf %67, %66 : vector<128x128xf32>
    %cst_24 = arith.constant 0.707106769 : f32
    %69 = vector.broadcast %cst_24 : f32 to vector<128x128xf32>
    %70 = arith.mulf %66, %69 : vector<128x128xf32>
    %71 = math.erf %70 : vector<128x128xf32>
    %cst_25 = arith.constant 1.000000e+00 : f32
    %72 = vector.broadcast %cst_25 : f32 to vector<128x128xf32>
    %73 = arith.addf %72, %71 : vector<128x128xf32>
    %74 = arith.mulf %68, %73 : vector<128x128xf32>
    %75 = arith.truncf %74 : vector<128x128xf32> to vector<128x128xbf16>
    %c0_26 = arith.constant 0 : index
    %c0_27 = arith.constant 0 : index
    %76 = vector.load %arg6[%c0_26, %c0_27] : memref<128x256xbf16, #tpu.memory_space<vmem>>, vector<128x256xbf16>
    %cst_28 = arith.constant dense<0.000000e+00> : vector<128x256xf32>
    %77 = tpu.matmul %75, %76, %cst_28 {dimension_numbers = #tpu.dot_dimension_numbers<[1], [0], [0], [1], [0, 0, 1, 1], [], []>} : vector<128x128xbf16>, vector<128x256xbf16>, vector<128x256xf32> -> vector<128x256xf32>
    %c0_29 = arith.constant 0 : index
    %c0_30 = arith.constant 0 : index
    %78 = vector.load %arg7[%c0_29, %c0_30] : memref<1x256xf32, #tpu.memory_space<vmem>>, vector<1x256xf32>
    %79 = vector.broadcast %78 : vector<1x256xf32> to vector<128x256xf32>
    %80 = arith.addf %77, %79 : vector<128x256xf32>
    %c0_31 = arith.constant 0 : index
    %c0_32 = arith.constant 0 : index
    %81 = vector.load %arg8[%c0_31, %c0_32] : memref<128x256xf32, #tpu.memory_space<vmem>>, vector<128x256xf32>
    tpu.vector_store %arg8[%c0_31, %c0_32], %80 {strides = array<i32>} : memref<128x256xf32, #tpu.memory_space<vmem>>, vector<128x256xf32>,
    return
  }
  func.func @transform_0(%arg0: i32) -> (i32, i32) {
    %c0_i32 = arith.constant 0 : i32
    %c0_i32_0 = arith.constant 0 : i32
    return %arg0, %c0_i32 : i32, i32
  }
  func.func @transform_1(%arg0: i32) -> (i32, i32) {
    %c0_i32 = arith.constant 0 : i32
    %c0_i32_0 = arith.constant 0 : i32
    %c0_i32_1 = arith.constant 0 : i32
    return %c0_i32, %c0_i32_0 : i32, i32
  }
  func.func @transform_2(%arg0: i32) -> (i32, i32) {
    %c0_i32 = arith.constant 0 : i32
    %c0_i32_0 = arith.constant 0 : i32
    %c0_i32_1 = arith.constant 0 : i32
    return %c0_i32, %c0_i32_0 : i32, i32
  }
  func.func @transform_3(%arg0: i32) -> (i32, i32) {
    %c0_i32 = arith.constant 0 : i32
    %c0_i32_0 = arith.constant 0 : i32
    %c0_i32_1 = arith.constant 0 : i32
    return %c0_i32, %c0_i32_0 : i32, i32
  }
  func.func @transform_4(%arg0: i32) -> (i32, i32) {
    %c0_i32 = arith.constant 0 : i32
    %c0_i32_0 = arith.constant 0 : i32
    %c0_i32_1 = arith.constant 0 : i32
    return %c0_i32, %c0_i32_0 : i32, i32
  }
  func.func @transform_5(%arg0: i32) -> (i32, i32) {
    %c0_i32 = arith.constant 0 : i32
    %c0_i32_0 = arith.constant 0 : i32
    %c0_i32_1 = arith.constant 0 : i32
    return %c0_i32, %c0_i32_0 : i32, i32
  }
  func.func @transform_6(%arg0: i32) -> (i32, i32) {
    %c0_i32 = arith.constant 0 : i32
    %c0_i32_0 = arith.constant 0 : i32
    %c0_i32_1 = arith.constant 0 : i32
    return %c0_i32, %c0_i32_0 : i32, i32
  }
  func.func @transform_7(%arg0: i32) -> (i32, i32) {
    %c0_i32 = arith.constant 0 : i32
    %c0_i32_0 = arith.constant 0 : i32
    return %arg0, %c0_i32 : i32, i32
  }
}

</mosaic_0001>

<bundles_post_ra>
// kernel: tpu_custom_call.1
= control target key start
LH: loop header
LB: loop body
LE: loop exit
PB: predicated region body
PF: predicated region fallthrough
CT: control target
= control target key end

     0   :  { %s3910_s0 = inlined_call_operand.hbm [shape: f32[256,128], index: 0, kind: input, shape index: {}]   ;;  %s3911_s1 = inlined_call_operand.hbm [shape: bf16[128,256], index: 1, kind: input, shape index: {}]   ;;  %s3912_s2 = inlined_call_operand.hbm [shape: f32[3,256], index: 2, kind: input, shape index: {}]   ;;  %s3913_s3 = inlined_call_operand.hbm [shape: bf16[256,128], index: 3, kind: input, shape index: {}]   ;;  %s3914_s4 = inlined_call_operand.vmem [shape: f32[3,128], index: 4, kind: input, shape index: {}]   ;;  %s3915_s5 = inlined_call_operand.hbm [shape: bf16[128,256], index: 5, kind: input, shape index: {}]   ;;  %s3916_s6 = inlined_call_operand.vmem [shape: f32[1,256], index: 6, kind: input, shape index: {}]   ;;  %s3917_s7 = inlined_call_operand.hbm [shape: f32[256,256], index: 7, kind: output, shape index: {}]  }
   0x1   :  { %3927 = sst [smem:[#allocation16_spill]] %s3911_s1 }
   0x2   :  { %12 = vsyncpa [#allocation3], 0 }
   0x3   :  { %14 = vsyncpa [#allocation3 + $0x1], 0 }
   0x4   :  { %15 = vsyncpa [#allocation6], 0 }
   0x5   :  { %16 = vsyncpa [#allocation9], 0 }
   0x6   :  { %17 = vsyncpa [#allocation4], 0 }
   0x7   :  { %19 = vsyncpa [#allocation4 + $0x1], 0  ;;  %s2799_s24 = smov 0   ;;  %s2801_s25 = smov 0  }
   0x8   :  { %s2803_s26 = smov 0   ;;  %s2805_s27 = smov 0  }
   0x9 LB: > { %s2820_s28 = sadd.s32 4294967295, %s2744_s27   ;;  %s2056_s29 = sadd.s32 4294967294, %s2744_s27   ;;  %s2744_s27 = sphi %s2805_s27, %s3951_s27   ;;  %s2740_s26 = sphi %s2803_s26, %s3950_s26   ;;  %s2736_s25 = sphi %s2801_s25, %s3949_s25   ;;  %s2732_s24 = sphi %s2799_s24, %s3948_s24  }
   0xa   : > { %p45_p0 = scmp.ne.s32.totalorder %s2736_s25, %s2732_s24  ;;  %p3918_p1 = scmp.eq.s32.totalorder %s2820_s28, 0 }
   0xb   : > { %p201_p3 = scmp.eq.s32.totalorder %s2056_s29, 1  ;;  %p2057_p5 = scmp.ge.s32.totalorder %s2744_s27, 1 }
   0xc   : > { %p2829_p4 = por %p3918_p1, %p45_p0  ;;  %p208_p7 = scmp.lt.s32.totalorder %s2744_s27, 3 }
   0xd   : > { %p2834_p6 = por %p201_p3, %p45_p0  ;;  %s2746_s10 = smov [#allocation5]  }
   0xe   : > { %s3928_s30 = scalar_select %p2829_p4, 1, 0 }
   0xf   : > { %s3929_s8 = scalar_select %p2834_p6, 1, 0 }
  0x10   : > { %p2839_p8 = pnand %p2057_p5, %p208_p7  ;;  %s220_s11 = sshll.u32 %s2746_s10, 4  ;;  %s2843_s11 = int_to_ptr.vmem [resolvable:$true] %s220_s11 }
  0x11   : > { %s2747_s13 = smov [#allocation8]   ;;  %s3932_s1 = sld [smem:[#allocation16_spill]] }
  0x12   : > { %s3930_s9 = scalar_select %p2839_p8, 1, 0 }
  0x13   : > { %p2230_p9 = pneg %p2839_p8  ;;  %s244_s14 = sshll.u32 %s2747_s13, 4  ;;  %s2854_s14 = int_to_ptr.vmem [resolvable:$true] %s244_s14 }
  0x15   : > { %p2850_p11 = pnand %p2230_p9, %p3918_p1 }
  0x17   : > { %s2528_s17 = scalar_lea.hbm %s3932_s1, 2048  ;;  %p2864_p13 = pneg %p2850_p11 }
  0x18   : > { %p2529_p12 = scmp.ne.s32.totalorder %s3932_s1, %s2528_s17  ;;  %p2535_p5 = scmp.lt.u32.totalorder %s2528_s17, %s3932_s1 }
  0x1a   : > { %p2531_p0 = pnand %p2864_p13, %p2529_p12 }
  0x1c   : > { %p2532_p3 = pneg %p2531_p0 }
  0x1e   : > { %p2537_p7 = pnand %p2535_p5, %p2532_p3 }
  0x20   : > { %2540 = shalt.err (!%p2537_p7)
}
  0x21   : > { %s2541_s23 = scalar_lea.vmem %s2843_s11, 2048  ;;  %p2549_p2 = scmp.lt.s32.totalorder %s2843_s11, %s2843_s11 }
  0x22   : > { %p2542_p9 = scmp.ne.s32.totalorder %s2843_s11, %s2541_s23  ;;  %p2550_p6 = scmp.lt.s32.totalorder %s2541_s23, %s2541_s23 }
  0x24   : > { %p2544_p10 = pnand %p2542_p9, %p2864_p13  ;;  %p2551_p12 = por %p2550_p6, %p2549_p2 }
  0x26   : > { %p2545_p1 = pneg %p2544_p10 }
  0x28   : > { %p2552_p0 = pnand %p2551_p12, %p2545_p1 }
  0x2a   : > { %2555 = shalt.err (!%p2552_p0)
}
  0x2b   : > { %s3919_s29 = smov 128   ;;  %s3921_s10 = smov 8  }
  0x2c   : > { %2233 = dma.hbm_to_vmem [thread:$0]  (!%p2850_p11), %s3932_s1, 2048, %s2843_s11, [#allocation6], %s3919_s29, %s3919_s29, %s3921_s10  }
  0x2d   : > { %s2556_s18 = scalar_lea.hbm %s3913_s3, 2048 }
  0x2e   : > { %p2557_p1 = scmp.ne.s32.totalorder %s3913_s3, %s2556_s18  ;;  %p2563_p10 = scmp.lt.u32.totalorder %s2556_s18, %s3913_s3 }
  0x30   : > { %p2559_p2 = pnand %p2557_p1, %p2864_p13 }
  0x32   : > { %p2560_p6 = pneg %p2559_p2 }
  0x34   : > { %p2565_p3 = pnand %p2563_p10, %p2560_p6 }
  0x36   : > { %2568 = shalt.err (!%p2565_p3)
}
  0x37   : > { %s2569_s11 = scalar_lea.vmem %s2854_s14, 2048  ;;  %p2577_p12 = scmp.lt.s32.totalorder %s2854_s14, %s2854_s14 }
  0x38   : > { %p2570_p5 = scmp.ne.s32.totalorder %s2854_s14, %s2569_s11  ;;  %p2578_p0 = scmp.lt.s32.totalorder %s2569_s11, %s2569_s11 }
  0x3a   : > { %p2572_p7 = pnand %p2570_p5, %p2864_p13  ;;  %p2579_p1 = por %p2578_p0, %p2577_p12 }
  0x3c   : > { %p2573_p9 = pneg %p2572_p7 }
  0x3e   : > { %p2580_p2 = pnand %p2579_p1, %p2573_p9 }
  0x40   : > { %2583 = shalt.err (!%p2580_p2)
}
  0x41   : > { %s2750_s13 = smov 64   ;;  %s2751_s15 = smov 4  }
  0x42   : > { %2239 = dma.hbm_to_vmem [thread:$0]  (!%p2850_p11), %s3913_s3, 2048, %s2854_s14, [#allocation9], %s2750_s13, %s2750_s13, %s2751_s15  }
  0x43   : > { %s2752_s18 = smov [#allocation7]   ;;  %s2753_s21 = smov [#allocation10]  }
  0x44   : > { %s234_s19 = sshll.u32 %s2752_s18, 4  ;;  %s260_s22 = sshll.u32 %s2753_s21, 4  ;;  %s235_s19 = int_to_ptr.vmem [resolvable:$true] %s234_s19  ;;  %s2911_s22 = int_to_ptr.vmem [resolvable:$true] %s260_s22 }
  0x45   : > { %s2584_s29 = scalar_lea.hbm %s3912_s2, 128 }
  0x46   : > { %p2585_p6 = scmp.ne.s32.totalorder %s3912_s2, %s2584_s29  ;;  %p2591_p5 = scmp.lt.u32.totalorder %s2584_s29, %s3912_s2 }
  0x48   : > { %p2587_p10 = pnand %p2585_p6, %p2864_p13 }
  0x4a   : > { %p2588_p3 = pneg %p2587_p10 }
  0x4c   : > { %p2593_p7 = pnand %p2591_p5, %p2588_p3 }
  0x4e   : > { %2596 = shalt.err (!%p2593_p7)
}
  0x4f   : > { %s2597_s13 = scalar_lea.vmem %s235_s19, 128  ;;  %p2605_p1 = scmp.lt.s32.totalorder %s235_s19, %s235_s19 }
  0x50   : > { %p2598_p9 = scmp.ne.s32.totalorder %s235_s19, %s2597_s13  ;;  %p2606_p2 = scmp.lt.s32.totalorder %s2597_s13, %s2597_s13 }
  0x52   : > { %p2600_p12 = pnand %p2598_p9, %p2864_p13  ;;  %p2607_p4 = por %p2606_p2, %p2605_p1 }
  0x54   : > { %p2601_p0 = pneg %p2600_p12 }
  0x56   : > { %p2608_p8 = pnand %p2607_p4, %p2601_p0 }
  0x58   : > { %2611 = shalt.err (!%p2608_p8)
}
  0x59   : > { %2236 = dma.hbm_to_vmem [thread:$0]  (!%p2850_p11), %s3912_s2, 128, %s235_s19, [#allocation6]  }
  0x5a   : > { %s2612_s17 = scalar_lea.hbm %s3915_s5, 2048 }
  0x5b   : > { %p2613_p6 = scmp.ne.s32.totalorder %s3915_s5, %s2612_s17  ;;  %p2619_p4 = scmp.lt.u32.totalorder %s2612_s17, %s3915_s5 }
  0x5d   : > { %p2615_p10 = pnand %p2613_p6, %p2864_p13 }
  0x5f   : > { %p2616_p3 = pneg %p2615_p10 }
  0x61   : > { %p2621_p8 = pnand %p2619_p4, %p2616_p3 }
  0x63   : > { %2624 = shalt.err (!%p2621_p8)
}
  0x64   : > { %s2625_s19 = scalar_lea.vmem %s2911_s22, 2048  ;;  %p2633_p12 = scmp.lt.s32.totalorder %s2911_s22, %s2911_s22 }
  0x65   : > { %p2626_p5 = scmp.ne.s32.totalorder %s2911_s22, %s2625_s19  ;;  %p2634_p0 = scmp.lt.s32.totalorder %s2625_s19, %s2625_s19 }
  0x67   : > { %p2628_p7 = pnand %p2626_p5, %p2864_p13  ;;  %p2635_p1 = por %p2634_p0, %p2633_p12 }
  0x69   : > { %p2629_p9 = pneg %p2628_p7 }
  0x6b   : > { %p2636_p2 = pnand %p2635_p1, %p2629_p9 }
  0x6d   : > { %2639 = shalt.err (!%p2636_p2)
}
  0x6e   : > { %s3934_s16 = smov 8   ;;  %s3935_s14 = smov 128  }
  0x6f   : > { %2242 = dma.hbm_to_vmem [thread:$0]  (!%p2850_p11), %s3915_s5, 2048, %s2911_s22, [#allocation9], %s3935_s14, %s3935_s14, %s3934_s16  }
  0x70   : > { %s2958_s12 = sadd.s32 1, %s2744_s27   ;;  %s32_s10 = sadd.s32 1, %s2740_s26 }
  0x71   : > { %s29_s20 = ssub.s32 %s2744_s27, %s2958_s12  ;;  %p39_p6 = scmp.ne.s32.totalorder %s2740_s26, %s2736_s25 }
  0x72   : > { %p30_p13 = scmp.eq.s32.totalorder %s29_s20, 0  ;;  %p40_p10 = scmp.eq.s32.totalorder %s2744_s27, 0 }
  0x73   : > { %p3936_p4 = scmp.eq.s32.totalorder %s2820_s28, 1  ;;  %p2255_p5 = scmp.lt.s32.totalorder %s2744_s27, 2 }
  0x74   : > { %s2967_s29 = scalar_select %p30_p13, %s2740_s26, %s32_s10  }
  0x75   : > { %p41_p3 = por %p40_p10, %p39_p6  ;;  %p2971_p8 = por %p3936_p4, %p39_p6 }
  0x76   : > { %s277_s17 = sand.u32 1, %s2740_s26   ;;  %s2127_s22 = sshll.u32 %s2744_s27, 11 }
  0x77   : > { %s2063_s18 = sshll.u32 %s277_s17, 7  ;;  %s2981_s11 = scalar_lea.hbm %s3910_s0, %s2127_s22 }
  0x78   : > { %s281_s19 = scalar_lea.vmem [#allocation2], %s2063_s18  ;;  %p2985_p11 = pnand %p2255_p5, %p41_p3 }
  0x79   : > { %s288_s13 = sshll.u32 %s281_s19, 4  ;;  %s2989_s20 = scalar_lea.sflag [#allocation3], %s277_s17  ;;  %s2983_s13 = int_to_ptr.vmem [resolvable:$true] %s288_s13 }
  0x7a   : > { %s2640_s10 = scalar_lea.hbm %s2981_s11, 2048  ;;  %p2642_p9 = pneg %p2985_p11 }
  0x7b   : > { %p2641_p7 = scmp.ne.s32.totalorder %s2981_s11, %s2640_s10  ;;  %s2645_s21 = scalar_lea.hbm %s3910_s0, 4096 }
  0x7c   : > { %p2646_p1 = scmp.lt.u32.totalorder %s2981_s11, %s3910_s0  ;;  %p2647_p2 = scmp.lt.u32.totalorder %s2645_s21, %s2640_s10 }
  0x7d   : > { %p2643_p12 = pnand %p2642_p9, %p2641_p7  ;;  %p2649_p6 = scmp.lt.u32.totalorder %s2640_s10, %s2981_s11 }
  0x7e   : > { %p2648_p13 = por %p2647_p2, %p2646_p1 }
  0x7f   : > { %p2644_p0 = pneg %p2643_p12 }
  0x80   : > { %p2650_p10 = por %p2649_p6, %p2648_p13 }
  0x82   : > { %p2651_p3 = pnand %p2650_p10, %p2644_p0 }
  0x84   : > { %2654 = shalt.err (!%p2651_p3)
}
  0x85   : > { %s2655_s17 = scalar_lea.vmem %s2983_s13, 2048  ;;  %s2754_s18 = smov [#allocation2]  }
  0x86   : > { %p2656_p4 = scmp.ne.s32.totalorder %s2983_s13, %s2655_s17  ;;  %s2660_s22 = sshll.u32 %s2754_s18, 4  ;;  %s2661_s22 = int_to_ptr.vmem [resolvable:$false] %s2660_s22 }
  0x87   : > { %s2662_s23 = scalar_lea.vmem %s2661_s22, 4096  ;;  %p2663_p12 = scmp.lt.s32.totalorder %s2983_s13, %s2661_s22 }
  0x88   : > { %p2658_p5 = pnand %p2656_p4, %p2642_p9  ;;  %p2664_p1 = scmp.lt.s32.totalorder %s2662_s23, %s2655_s17 }
  0x8a   : > { %p2659_p7 = pneg %p2658_p5  ;;  %p2665_p2 = por %p2664_p1, %p2663_p12 }
  0x8c   : > { %p2666_p13 = pnand %p2665_p2, %p2659_p7 }
  0x8e   : > { %2669 = shalt.err (!%p2666_p13)
}
  0x8f   : > { %2246 = dma.hbm_to_vmem [thread:$0]  (!%p2985_p11), %s2981_s11, 2048, %s2983_s13, %s2989_s20, %s3935_s14, %s3935_s14, %s3934_s16  }
  0x90   : > { %p3939_p9 = scmp.ne.s32.totalorder %s3930_s9, 0 }
  0x91   : > { %s3023_s10 = sand.u32 (!%p3939_p9), 1, %s2736_s25   ;;  %p3940_p0 = scmp.ne.s32.totalorder (!%p3939_p9), %s3928_s30, 0 }
  0x92   : > { %300 = sbr.rel (%p3939_p9) target bundleno = 1597 (0x63d), region = 48  ;;  %s2067_s21 = sshll.u32 (!%p3939_p9), %s3023_s10, 7 }
  0x93   : > { %s303_s19 = scalar_lea.sflag (!%p3939_p9), [#allocation3], %s3023_s10  ;;  %s3027_s17 = scalar_lea.vmem (!%p3939_p9), [#allocation2], %s2067_s21 }
  0x99   : > { %2715 = dma.done.wait (%p3940_p0), %s303_s19, 2048  }
  0x9a   : > { %2717 = vsyncadd (%p3940_p0), %s303_s19, 4294965248  ;;  %p3941_p11 = scmp.eq.s32.totalorder %s2820_s28, 0 }
  0x9c   : > { %2719 = dma.done.wait (%p3941_p11), [#allocation6], 2176   ;;  %p3942_p6 = pmov %p3941_p11 }
  0x9e   : > { %2721 = vsyncadd (%p3942_p6), [#allocation6], 4294965120  ;;  %p3943_p10 = pmov %p3942_p6 }
  0x9f   : > { %p3944_p3 = pmov %p3942_p6 }
  0xa0   : > { %2723 = dma.done.wait (%p3943_p10), [#allocation9], 4096  }
  0xa1   : > { %2725 = vsyncadd (%p3944_p3), [#allocation9], 4294963200  ;;  %v3925_v0 = vmov 0   ;;  %v2304_v1 = vld [vmem:[#allocation5 + $0x4] ss:$8 sps:$4 sm:$0xff]   ;;  %v358_v23 = vld [vmem:[%s3027_s17 + $0x10] sm:$0xff]  ;;  %v398_v41 = vlaneseq }
  0xa2   : > { %528 = vmatprep.mubr.bf16.mxu0 %v3925_v0  ;;  %568 = vmatprep.mubr.bf16.mxu1 %v3925_v0  ;;  %v2306_v2 = vld [vmem:[#allocation5] ss:$8 sps:$4 sm:$0xff]   ;;  %v2307_v3 = vld [vmem:[#allocation5 + $0x14] ss:$8 sps:$4 sm:$0xff]   ;;  %v2309_v4 = vld [vmem:[#allocation5 + $0x10] ss:$8 sps:$4 sm:$0xff]  }
  0xa3   : > { %496 = vmatprep.subr.bf16.mxu0 %v2304_v1  ;;  %2194 = vmatprep.subr.bf16.mxu1 %v2304_v1  ;;  %v2310_v5 = vld [vmem:[#allocation5 + $0x24] ss:$8 sps:$4 sm:$0xff]   ;;  %v2312_v6 = vld [vmem:[#allocation5 + $0x20] ss:$8 sps:$4 sm:$0xff]   ;;  %v2313_v7 = vld [vmem:[#allocation5 + $0x34] ss:$8 sps:$4 sm:$0xff]  }
  0xa4   : > { %497 = vmatpush1.bf16.msra.mxu0 %v2306_v2  ;;  %2202 = vmatpush1.bf16.msra.mxu1 %v2306_v2  ;;  %v2315_v8 = vld [vmem:[#allocation5 + $0x30] ss:$8 sps:$4 sm:$0xff]   ;;  %v2316_v9 = vld [vmem:[#allocation5 + $0x44] ss:$8 sps:$4 sm:$0xff]   ;;  %v2318_v10 = vld [vmem:[#allocation5 + $0x40] ss:$8 sps:$4 sm:$0xff]  }
  0xa5   : > { %498 = vmatprep.subr.bf16.mxu0 %v2307_v3  ;;  %2195 = vmatprep.subr.bf16.mxu1 %v2307_v3  ;;  %v2319_v11 = vld [vmem:[#allocation5 + $0x54] ss:$8 sps:$4 sm:$0xff]   ;;  %v2321_v12 = vld [vmem:[#allocation5 + $0x50] ss:$8 sps:$4 sm:$0xff]   ;;  %v2322_v13 = vld [vmem:[#allocation5 + $0x64] ss:$8 sps:$4 sm:$0xff]  }
  0xa6   : > { %v2324_v14 = vld [vmem:[#allocation5 + $0x60] ss:$8 sps:$4 sm:$0xff]   ;;  %v2325_v15 = vld [vmem:[#allocation5 + $0x74] ss:$8 sps:$4 sm:$0xff]   ;;  %v2327_v16 = vld [vmem:[#allocation5 + $0x70] ss:$8 sps:$4 sm:$0xff]  }
  0xa7   : > { %v356_v17 = vld [vmem:[%s3027_s17] sm:$0xff]  ;;  %v357_v18 = vld [vmem:[%s3027_s17 + $0x8] sm:$0xff]  ;;  %v359_v24 = vld [vmem:[%s3027_s17 + $0x18] sm:$0xff]  ;;  %v3066_v42 = vshrl.u32 %v398_v41, 7  ;;  %s2072_s11 = sshll.u32 %s3023_s10, 8  ;;  %s2129_s1 = sshll.u32 %s2820_s28, 12 }
  0xa8   : > { %499 = vmatpush1.bf16.msra.mxu0 %v2309_v4  ;;  %2203 = vmatpush1.bf16.msra.mxu1 %v2309_v4  ;;  %v364_v19 = vld [vmem:[%s3027_s17 + $0x40] sm:$0xff]  ;;  %v365_v20 = vld [vmem:[%s3027_s17 + $0x48] sm:$0xff]  ;;  %v372_v21 = vpack.c.bf16 %v357_v18, %v356_v17  ;;  %v366_v25 = vld [vmem:[%s3027_s17 + $0x50] sm:$0xff]  ;;  %v373_v27 = vpack.c.bf16 %v359_v24, %v358_v23  ;;  %s3795_s13 = scalar_lea.vmem [#allocation11], %s2072_s11  ;;  %s3860_s23 = scalar_lea.hbm %s3917_s7, %s2129_s1 }
  0xa9   : > { %500 = vmatprep.subr.bf16.mxu0 %v2310_v5  ;;  %2196 = vmatprep.subr.bf16.mxu1 %v2310_v5  ;;  %v376_v22 = vpack.c.bf16 %v365_v20, %v364_v19  ;;  %v367_v26 = vld [vmem:[%s3027_s17 + $0x58] sm:$0xff]  ;;  %v360_v29 = vld [vmem:[%s3027_s17 + $0x20] sm:$0xff]  ;;  %v361_v30 = vld [vmem:[%s3027_s17 + $0x28] sm:$0xff]  ;;  %v3069_v43 = vsub.s32 0, %v3066_v42  ;;  %v404_v45 = vsub.s32 4, %v3066_v42  ;;  %s1945_s20 = sshll.u32 %s3795_s13, 4  ;;  %s3862_s20 = int_to_ptr.vmem [resolvable:$true] %s1945_s20 }
  0xaa   : > { %v377_v28 = vpack.c.bf16 %v367_v26, %v366_v25  ;;  %v368_v31 = vld [vmem:[%s3027_s17 + $0x60] sm:$0xff]  ;;  %v369_v32 = vld [vmem:[%s3027_s17 + $0x68] sm:$0xff]  ;;  %v374_v33 = vpack.c.bf16 %v361_v30, %v360_v29  ;;  %v362_v35 = vld [vmem:[%s3027_s17 + $0x30] sm:$0xff]  ;;  %s1931_s28 = scalar_lea.sflag [#allocation4], %s3023_s10  ;;  %s2670_s21 = scalar_lea.vmem %s3862_s20, 4096 }
  0xab   : > { %v378_v34 = vpack.c.bf16 %v369_v32, %v368_v31  ;;  %v363_v36 = vld [vmem:[%s3027_s17 + $0x38] sm:$0xff]  ;;  %v370_v37 = vld [vmem:[%s3027_s17 + $0x70] sm:$0xff]  ;;  %v3071_v44 = vld [vmem:[#allocation7] sm:$0x77]  ;;  %p2671_p4 = scmp.ne.s32.totalorder %s3862_s20, %s2670_s21  ;;  %s2756_s19 = smov [#allocation11]  }
  0xac   : > { %501 = vmatpush1.bf16.msra.mxu0 %v2312_v6  ;;  %2204 = vmatpush1.bf16.msra.mxu1 %v2312_v6  ;;  %v371_v38 = vld [vmem:[%s3027_s17 + $0x78] sm:$0xff]  ;;  %v375_v39 = vpack.c.bf16 %v363_v36, %v362_v35  ;;  %v401_v46 = vrot.slane %v3071_v44, %v3069_v43  ;;  %v405_v47 = vrot.slane %v3071_v44, %v404_v45  ;;  %s2674_s17 = sshll.u32 %s2756_s19, 4  ;;  %s2675_s17 = int_to_ptr.vmem [resolvable:$false] %s2674_s17 }
  0xad   : > { %502 = vmatprep.subr.bf16.mxu0 %v2313_v7  ;;  %2197 = vmatprep.subr.bf16.mxu1 %v2313_v7  ;;  %v379_v40 = vpack.c.bf16 %v371_v38, %v370_v37  ;;  %p2672_p5 = pnand %p2671_p4, %p2971_p8  ;;  %s2676_s30 = scalar_lea.vmem %s2675_s17, 8192 }
  0xae   : > { %v3078_v48 = vrot.slane %v401_v46, %v3069_v43  ;;  %v3081_v49 = vrot.slane %v405_v47, %v3069_v43  ;;  %p2677_p12 = scmp.lt.s32.totalorder %s3862_s20, %s2675_s17  ;;  %p2678_p1 = scmp.lt.s32.totalorder %s2676_s30, %s2670_s21 }
  0xaf   : > { %p2673_p7 = pneg %p2672_p5 }
  0xb0   : > { %503 = vmatpush1.bf16.msra.mxu0 %v2315_v8  ;;  %2205 = vmatpush1.bf16.msra.mxu1 %v2315_v8  ;;  %p2679_p2 = por %p2678_p1, %p2677_p12 }
  0xb1   : > { %504 = vmatprep.subr.bf16.mxu0 %v2316_v9  ;;  %2198 = vmatprep.subr.bf16.mxu1 %v2316_v9 }
  0xb2   : > { %p2680_p13 = pnand %p2679_p2, %p2673_p7 }
  0xb4   : > { %505 = vmatpush1.bf16.msra.mxu0 %v2318_v10  ;;  %2206 = vmatpush1.bf16.msra.mxu1 %v2318_v10 }
  0xb5   : > { %506 = vmatprep.subr.bf16.mxu0 %v2319_v11  ;;  %2199 = vmatprep.subr.bf16.mxu1 %v2319_v11 }
  0xb8   : > { %507 = vmatpush1.bf16.msra.mxu0 %v2321_v12  ;;  %2207 = vmatpush1.bf16.msra.mxu1 %v2321_v12 }
  0xb9   : > { %508 = vmatprep.subr.bf16.mxu0 %v2322_v13  ;;  %2200 = vmatprep.subr.bf16.mxu1 %v2322_v13 }
  0xbc   : > { %509 = vmatpush1.bf16.msra.mxu0 %v2324_v14  ;;  %2208 = vmatpush1.bf16.msra.mxu1 %v2324_v14 }
  0xbd   : > { %510 = vmatprep.subr.bf16.mxu0 %v2325_v15  ;;  %2201 = vmatprep.subr.bf16.mxu1 %v2325_v15 }
  0xc0   : > { %511 = vmatpush1.bf16.msra.mxu0 %v2327_v16  ;;  %2209 = vmatpush1.bf16.msra.mxu1 %v2327_v16 }
  0xc3   : > { %529 = vmatmul.mubr.bf16.vlgmr.msra.gmra.mrb[0].mxu0 %v372_v21  ;;  %569 = vmatmul.mubr.bf16.vlgmr.msra.gmra.mrb[0].mxu1 %v376_v22 }
  0xc4   : > { %538 = vmatprep.mubr.bf16.mxu0 %v3925_v0  ;;  %578 = vmatprep.mubr.bf16.mxu1 %v3925_v0 }
  0xcb   : > { %539 = vmatmul.mubr.bf16.gmra.mrb[4].mxu0 %v373_v27  ;;  %579 = vmatmul.mubr.bf16.gmra.mrb[4].mxu1 %v377_v28 }
  0xcc   : > { %548 = vmatprep.mubr.bf16.mxu0 %v3925_v0  ;;  %588 = vmatprep.mubr.bf16.mxu1 %v3925_v0 }
  0xd3   : > { %549 = vmatmul.mubr.bf16.gmra.mrb[8].mxu0 %v374_v33  ;;  %589 = vmatmul.mubr.bf16.gmra.mrb[8].mxu1 %v378_v34 }
  0xd4   : > { %558 = vmatprep.mubr.bf16.mxu0 %v3925_v0  ;;  %598 = vmatprep.mubr.bf16.mxu1 %v3925_v0 }
  0xdb   : > { %559 = vmatmul.mubr.bf16.gmra.mrb[12].mxu0 %v375_v39  ;;  %599 = vmatmul.mubr.bf16.gmra.mrb[12].mxu1 %v379_v40 }
  0xdc   : > { %1817 = vmatprep.mubr.bf16.mxu0 %v3925_v0 }
 0x196   : > { %v530_v50 = vpop.f32.mrb[0].mxu0  ;;  %v570_v51 = vpop.f32.mrb[0].mxu1 }
 0x197   : > { %v3084_v52 = vadd.f32 %v530_v50, %v3078_v48  ;;  %v532_v53 = vpop.f32.mrb[1].mxu0  ;;  %v572_v54 = vpop.f32.mrb[1].mxu1  ;;  %v3138_v36 = vadd.f32 %v570_v51, %v3078_v48 }
 0x198   : > { %v3087_v55 = vadd.f32 %v532_v53, %v3081_v49  ;;  %v534_v56 = vpop.f32.mrb[2].mxu0  ;;  %v574_v57 = vpop.f32.mrb[2].mxu1  ;;  %v3141_v37 = vadd.f32 %v572_v54, %v3081_v49 }
 0x199   : > { %v536_v58 = vpop.f32.mrb[3].mxu0  ;;  %v576_v59 = vpop.f32.mrb[3].mxu1  ;;  %v3090_v60 = vadd.f32 %v534_v56, %v3078_v48  ;;  %v3150_v46 = vadd.f32 %v574_v57, %v3078_v48 }
 0x19a   : > { %v3093_v61 = vadd.f32 %v536_v58, %v3081_v49  ;;  %v609_v62 = vadd.f32 %v3087_v55, %v3084_v52  ;;  %v3155_v50 = vadd.f32 %v576_v59, %v3081_v49  ;;  %v633_v56 = vadd.f32 %v3141_v37, %v3138_v36 }
 0x19c   : > { %610 = vadd.xlane.f32.xlu0 %v609_v62  ;;  %v612_v1 = vadd.f32 %v3093_v61, %v3090_v60  ;;  %v636_v59 = vadd.f32 %v3155_v50, %v3150_v46 }
 0x19e   : > { %v540_v63 = vpop.f32.mrb[4].mxu0  ;;  %v580_v2 = vpop.f32.mrb[4].mxu1 }
 0x19f   : > { %v3100_v3 = vadd.f32 %v540_v63, %v3078_v48  ;;  %v542_v4 = vpop.f32.mrb[5].mxu0  ;;  %v582_v5 = vpop.f32.mrb[5].mxu1  ;;  %v3158_v51 = vadd.f32 %v580_v2, %v3078_v48 }
 0x1a0   : > { %v3103_v6 = vadd.f32 %v542_v4, %v3081_v49  ;;  %v544_v7 = vpop.f32.mrb[6].mxu0  ;;  %613 = vadd.xlane.f32.xlu0 %v612_v1  ;;  %v584_v8 = vpop.f32.mrb[6].mxu1  ;;  %v3163_v54 = vadd.f32 %v582_v5, %v3081_v49 }
 0x1a1   : > { %v546_v9 = vpop.f32.mrb[7].mxu0  ;;  %v586_v10 = vpop.f32.mrb[7].mxu1  ;;  %v3106_v11 = vadd.f32 %v544_v7, %v3078_v48  ;;  %v3168_v57 = vadd.f32 %v584_v8, %v3078_v48 }
 0x1a2   : > { %v3109_v12 = vadd.f32 %v546_v9, %v3081_v49  ;;  %v615_v13 = vadd.f32 %v3103_v6, %v3100_v3  ;;  %v3171_v58 = vadd.f32 %v586_v10, %v3081_v49  ;;  %v639_v1 = vadd.f32 %v3163_v54, %v3158_v51 }
 0x1a4   : > { %616 = vadd.xlane.f32.xlu1 %v615_v13  ;;  %v618_v15 = vadd.f32 %v3109_v12, %v3106_v11  ;;  %v642_v5 = vadd.f32 %v3171_v58, %v3168_v57 }
 0x1a6   : > { %v550_v14 = vpop.f32.mrb[8].mxu0  ;;  %v590_v16 = vpop.f32.mrb[8].mxu1 }
 0x1a7   : > { %v3116_v17 = vadd.f32 %v550_v14, %v3078_v48  ;;  %v552_v18 = vpop.f32.mrb[9].mxu0  ;;  %v592_v19 = vpop.f32.mrb[9].mxu1  ;;  %v3176_v62 = vadd.f32 %v590_v16, %v3078_v48 }
 0x1a8   : > { %v3119_v20 = vadd.f32 %v552_v18, %v3081_v49  ;;  %v554_v21 = vpop.f32.mrb[10].mxu0  ;;  %619 = vadd.xlane.f32.xlu1 %v618_v15  ;;  %v594_v22 = vpop.f32.mrb[10].mxu1  ;;  %v3179_v63 = vadd.f32 %v592_v19, %v3081_v49 }
 0x1a9   : > { %v3122_v23 = vadd.f32 %v554_v21, %v3078_v48  ;;  %v556_v24 = vpop.f32.mrb[11].mxu0  ;;  %v596_v25 = vpop.f32.mrb[11].mxu1  ;;  %v3184_v2 = vadd.f32 %v594_v22, %v3078_v48 }
 0x1aa   : > { %v3125_v26 = vadd.f32 %v556_v24, %v3081_v49  ;;  %v621_v27 = vadd.f32 %v3119_v20, %v3116_v17  ;;  %v3187_v4 = vadd.f32 %v596_v25, %v3081_v49  ;;  %v645_v9 = vadd.f32 %v3179_v63, %v3176_v62 }
 0x1ac   : > { %622 = vadd.xlane.f32.xlu0 %v621_v27  ;;  %v624_v28 = vadd.f32 %v3125_v26, %v3122_v23  ;;  %v648_v14 = vadd.f32 %v3187_v4, %v3184_v2 }
 0x1ae   : > { %v560_v29 = vpop.f32.mrb[12].mxu0  ;;  %625 = vadd.xlane.f32.xlu1 %v624_v28  ;;  %v600_v30 = vpop.f32.mrb[12].mxu1 }
 0x1af   : > { %v3132_v31 = vadd.f32 %v560_v29, %v3078_v48  ;;  %v562_v32 = vpop.f32.mrb[13].mxu0  ;;  %v602_v33 = vpop.f32.mrb[13].mxu1  ;;  %v3192_v7 = vadd.f32 %v600_v30, %v3078_v48 }
 0x1b0   : > { %v3135_v34 = vadd.f32 %v562_v32, %v3081_v49  ;;  %v564_v35 = vpop.f32.mrb[14].mxu0  ;;  %v604_v38 = vpop.f32.mrb[14].mxu1  ;;  %v3195_v8 = vadd.f32 %v602_v33, %v3081_v49 }
 0x1b1   : > { %v3144_v39 = vadd.f32 %v564_v35, %v3078_v48  ;;  %v566_v40 = vpop.f32.mrb[15].mxu0  ;;  %v606_v41 = vpop.f32.mrb[15].mxu1  ;;  %v3200_v10 = vadd.f32 %v604_v38, %v3078_v48 }
 0x1b2   : > { %v3147_v45 = vadd.f32 %v566_v40, %v3081_v49  ;;  %v627_v47 = vadd.f32 %v3135_v34, %v3132_v31  ;;  %v3203_v13 = vadd.f32 %v606_v41, %v3081_v49  ;;  %v651_v15 = vadd.f32 %v3195_v8, %v3192_v7 }
 0x1b4   : > { %628 = vadd.xlane.f32.xlu0 %v627_v47  ;;  %v630_v53 = vadd.f32 %v3147_v45, %v3144_v39  ;;  %v654_v16 = vadd.f32 %v3203_v13, %v3200_v10 }
 0x1b6   : > { %631 = vadd.xlane.f32.xlu1 %v630_v53 }
 0x1b8   : > { %634 = vadd.xlane.f32.xlu0 %v633_v56 }
 0x1ba   : > { %637 = vadd.xlane.f32.xlu1 %v636_v59 }
 0x1bc   : > { %640 = vadd.xlane.f32.xlu0 %v639_v1 }
 0x1be   : > { %643 = vadd.xlane.f32.xlu1 %v642_v5 }
 0x1c0   : > { %646 = vadd.xlane.f32.xlu0 %v645_v9 }
 0x1c2   : > { %649 = vadd.xlane.f32.xlu1 %v648_v14 }
 0x1c4   : > { %652 = vadd.xlane.f32.xlu0 %v651_v15 }
 0x1c6   : > { %655 = vadd.xlane.f32.xlu1 %v654_v16 }
 0x229   : > { %v611_v18 = vpop.xlane.xlu0 %610 }
 0x22a   : > { %v658_v19 = vmul.f32 0.00390625, %v611_v18 }
 0x22c   : > { %v3212_v48 = vsub.f32 %v3084_v52, %v658_v19  ;;  %v3215_v49 = vsub.f32 %v3087_v55, %v658_v19 }
 0x22d   : > { %v614_v21 = vpop.xlane.xlu0 %613 }
 0x22e   : > { %v659_v22 = vmul.f32 0.00390625, %v614_v21  ;;  %v706_v24 = vmul.f32 %v3212_v48, %v3212_v48  ;;  %v707_v25 = vmul.f32 %v3215_v49, %v3215_v49 }
 0x230   : > { %v3222_v27 = vsub.f32 %v3090_v60, %v659_v22  ;;  %v3225_v28 = vsub.f32 %v3093_v61, %v659_v22  ;;  %v738_v29 = vadd.f32 %v707_v25, %v706_v24 }
 0x231   : > { %v617_v52 = vpop.xlane.xlu1 %616 }
 0x232   : > { %v660_v30 = vmul.f32 0.00390625, %v617_v52  ;;  %739 = vadd.xlane.f32.xlu0 %v738_v29  ;;  %v708_v55 = vmul.f32 %v3222_v27, %v3222_v27  ;;  %v709_v32 = vmul.f32 %v3225_v28, %v3225_v28 }
 0x234   : > { %v3232_v33 = vsub.f32 %v3100_v3, %v660_v30  ;;  %v3235_v35 = vsub.f32 %v3103_v6, %v660_v30  ;;  %v741_v60 = vadd.f32 %v709_v32, %v708_v55 }
 0x235   : > { %v620_v38 = vpop.xlane.xlu1 %619 }
 0x236   : > { %v661_v61 = vmul.f32 0.00390625, %v620_v38  ;;  %742 = vadd.xlane.f32.xlu1 %v741_v60  ;;  %v710_v40 = vmul.f32 %v3232_v33, %v3232_v33  ;;  %v711_v41 = vmul.f32 %v3235_v35, %v3235_v35 }
 0x238   : > { %v3242_v47 = vsub.f32 %v3106_v11, %v661_v61  ;;  %v3245_v53 = vsub.f32 %v3109_v12, %v661_v61  ;;  %v744_v3 = vadd.f32 %v711_v41, %v710_v40 }
 0x239   : > { %v623_v56 = vpop.xlane.xlu0 %622 }
 0x23a   : > { %v662_v6 = vmul.f32 0.00390625, %v623_v56  ;;  %745 = vadd.xlane.f32.xlu0 %v744_v3  ;;  %v712_v59 = vmul.f32 %v3242_v47, %v3242_v47  ;;  %v713_v1 = vmul.f32 %v3245_v53, %v3245_v53 }
 0x23b   : > { %v626_v5 = vpop.xlane.xlu1 %625 }
 0x23c   : > { %v3252_v9 = vsub.f32 %v3116_v17, %v662_v6  ;;  %v3255_v11 = vsub.f32 %v3119_v20, %v662_v6  ;;  %v663_v14 = vmul.f32 0.00390625, %v626_v5  ;;  %v747_v12 = vadd.f32 %v713_v1, %v712_v59 }
 0x23e   : > { %v3258_v15 = vsub.f32 %v3122_v23, %v663_v14  ;;  %v3261_v16 = vsub.f32 %v3125_v26, %v663_v14  ;;  %748 = vadd.xlane.f32.xlu1 %v747_v12  ;;  %v714_v18 = vmul.f32 %v3252_v9, %v3252_v9  ;;  %v715_v19 = vmul.f32 %v3255_v11, %v3255_v11 }
 0x240   : > { %v750_v17 = vadd.f32 %v715_v19, %v714_v18  ;;  %v716_v20 = vmul.f32 %v3258_v15, %v3258_v15  ;;  %v717_v21 = vmul.f32 %v3261_v16, %v3261_v16  ;;  %v2328_v19 = vld [vmem:[#allocation8 + $0x40] sm:$0xff]  }
 0x241   : > { %v629_v22 = vpop.xlane.xlu0 %628  ;;  %2130 = vmatprep.subr.bf16.mxu1 %v2328_v19 }
 0x242   : > { %v664_v23 = vmul.f32 0.00390625, %v629_v22  ;;  %751 = vadd.xlane.f32.xlu0 %v750_v17  ;;  %v753_v24 = vadd.f32 %v717_v21, %v716_v20  ;;  %v2329_v22 = vld [vmem:[#allocation8] sm:$0xff]  }
 0x243   : > { %v632_v26 = vpop.xlane.xlu1 %631  ;;  %2131 = vmatpush3.bf16.msra.mxu1 %v2329_v22 }
 0x244   : > { %v3272_v25 = vsub.f32 %v3132_v31, %v664_v23  ;;  %v3275_v29 = vsub.f32 %v3135_v34, %v664_v23  ;;  %v665_v52 = vmul.f32 0.00390625, %v632_v26  ;;  %754 = vadd.xlane.f32.xlu1 %v753_v24 }
 0x245   : > { %v635_v30 = vpop.xlane.xlu0 %634 }
 0x246   : > { %v3278_v55 = vsub.f32 %v3144_v39, %v665_v52  ;;  %v3281_v32 = vsub.f32 %v3147_v45, %v665_v52  ;;  %v666_v60 = vmul.f32 0.00390625, %v635_v30  ;;  %v718_v38 = vmul.f32 %v3272_v25, %v3272_v25 }
 0x247   : > { %v638_v61 = vpop.xlane.xlu1 %637  ;;  %v719_v31 = vmul.f32 %v3275_v29, %v3275_v29 }
 0x248   : > { %v3288_v34 = vsub.f32 %v3138_v36, %v666_v60  ;;  %v3291_v40 = vsub.f32 %v3141_v37, %v666_v60  ;;  %v667_v41 = vmul.f32 0.00390625, %v638_v61  ;;  %v720_v39 = vmul.f32 %v3278_v55, %v3278_v55  ;;  %v2330_v61 = vld [vmem:[#allocation8 + $0x48] sm:$0xff]  }
 0x249   : > { %v641_v45 = vpop.xlane.xlu0 %640  ;;  %v756_v3 = vadd.f32 %v719_v31, %v718_v38  ;;  %v721_v56 = vmul.f32 %v3281_v32, %v3281_v32  ;;  %2132 = vmatprep.subr.bf16.mxu1 %v2330_v61  ;;  %v2339_v61 = vld [vmem:[#allocation8 + $0x28] sm:$0xff]  }
 0x24a   : > { %v3298_v6 = vsub.f32 %v3150_v46, %v667_v41  ;;  %v3301_v59 = vsub.f32 %v3155_v50, %v667_v41  ;;  %v668_v36 = vmul.f32 0.00390625, %v641_v45  ;;  %v722_v37 = vmul.f32 %v3288_v34, %v3288_v34  ;;  %v2331_v45 = vld [vmem:[#allocation8 + $0x8] sm:$0xff]  }
 0x24b   : > { %757 = vadd.xlane.f32.xlu0 %v756_v3  ;;  %v644_v1 = vpop.xlane.xlu1 %643  ;;  %v759_v5 = vadd.f32 %v721_v56, %v720_v39  ;;  %v723_v14 = vmul.f32 %v3291_v40, %v3291_v40  ;;  %2133 = vmatpush3.bf16.msra.mxu1 %v2331_v45  ;;  %v2343_v45 = vld [vmem:[#allocation8 + $0x38] sm:$0xff]  }
 0x24c   : > { %v3308_v12 = vsub.f32 %v3158_v51, %v668_v36  ;;  %v3311_v18 = vsub.f32 %v3163_v54, %v668_v36  ;;  %v669_v46 = vmul.f32 0.00390625, %v644_v1  ;;  %v724_v50 = vmul.f32 %v3298_v6, %v3298_v6 }
 0x24d   : > { %760 = vadd.xlane.f32.xlu1 %v759_v5  ;;  %v647_v17 = vpop.xlane.xlu0 %646  ;;  %v762_v20 = vadd.f32 %v723_v14, %v722_v37  ;;  %v725_v21 = vmul.f32 %v3301_v59, %v3301_v59 }
 0x24e   : > { %v3318_v23 = vsub.f32 %v3168_v57, %v669_v46  ;;  %v3321_v51 = vsub.f32 %v3171_v58, %v669_v46  ;;  %v670_v54 = vmul.f32 0.00390625, %v647_v17  ;;  %v726_v24 = vmul.f32 %v3308_v12, %v3308_v12  ;;  %v2332_v46 = vld [vmem:[#allocation8 + $0x50] sm:$0xff]  }
 0x24f   : > { %763 = vadd.xlane.f32.xlu0 %v762_v20  ;;  %v650_v26 = vpop.xlane.xlu1 %649  ;;  %v765_v52 = vadd.f32 %v725_v21, %v724_v50  ;;  %v727_v30 = vmul.f32 %v3311_v18, %v3311_v18  ;;  %v2333_v17 = vld [vmem:[#allocation8 + $0x10] sm:$0xff]   ;;  %2134 = vmatprep.subr.bf16.mxu1 %v2332_v46 }
 0x250   : > { %v3328_v60 = vsub.f32 %v3176_v62, %v670_v54  ;;  %v3331_v57 = vsub.f32 %v3179_v63, %v670_v54  ;;  %v671_v58 = vmul.f32 0.00390625, %v650_v26  ;;  %v728_v38 = vmul.f32 %v3318_v23, %v3318_v23  ;;  %2135 = vmatpush3.bf16.msra.mxu1 %v2333_v17  ;;  %v2334_v26 = vld [vmem:[#allocation8 + $0x58] sm:$0xff]  }
 0x251   : > { %766 = vadd.xlane.f32.xlu1 %v765_v52  ;;  %v653_v31 = vpop.xlane.xlu0 %652  ;;  %v768_v41 = vadd.f32 %v727_v30, %v726_v24  ;;  %v729_v39 = vmul.f32 %v3321_v51, %v3321_v51  ;;  %2136 = vmatprep.subr.bf16.mxu1 %v2334_v26  ;;  %v2336_v30 = vld [vmem:[#allocation8 + $0x60] sm:$0xff]   ;;  %v922_v17 = vsub.s32 6, %v3066_v42 }
 0x252   : > { %v3338_v3 = vsub.f32 %v3184_v2, %v671_v58  ;;  %v3341_v62 = vsub.f32 %v3187_v4, %v671_v58  ;;  %v672_v63 = vmul.f32 0.00390625, %v653_v31  ;;  %v730_v56 = vmul.f32 %v3328_v60, %v3328_v60  ;;  %v2337_v58 = vld [vmem:[#allocation8 + $0x20] sm:$0xff]   ;;  %v2340_v31 = vld [vmem:[#allocation8 + $0x70] sm:$0xff]  }
 0x253   : > { %769 = vadd.xlane.f32.xlu0 %v768_v41  ;;  %v656_v36 = vpop.xlane.xlu1 %655  ;;  %v771_v37 = vadd.f32 %v729_v39, %v728_v38  ;;  %v731_v1 = vmul.f32 %v3331_v57, %v3331_v57  ;;  %v2338_v38 = vld [vmem:[#allocation8 + $0x68] sm:$0xff]   ;;  %v2341_v41 = vld [vmem:[#allocation8 + $0x30] sm:$0xff]   ;;  %v2342_v39 = vld [vmem:[#allocation8 + $0x78] sm:$0xff]   ;;  %v923_v26 = vrot.slane %v3071_v44, %v922_v17 }
 0x254   : > { %v3348_v5 = vsub.f32 %v3192_v7, %v672_v63  ;;  %v3351_v2 = vsub.f32 %v3195_v8, %v672_v63  ;;  %v673_v4 = vmul.f32 0.00390625, %v656_v36  ;;  %v732_v14 = vmul.f32 %v3338_v3, %v3338_v3 }
 0x255   : > { %772 = vadd.xlane.f32.xlu1 %v771_v37  ;;  %v774_v50 = vadd.f32 %v731_v1, %v730_v56  ;;  %v733_v19 = vmul.f32 %v3341_v62, %v3341_v62 }
 0x256   : > { %v3358_v20 = vsub.f32 %v3200_v10, %v673_v4  ;;  %v3361_v7 = vsub.f32 %v3203_v13, %v673_v4  ;;  %v734_v8 = vmul.f32 %v3348_v5, %v3348_v5  ;;  %v735_v21 = vmul.f32 %v3351_v2, %v3351_v2  ;;  %v2335_v13 = vld [vmem:[#allocation8 + $0x18] sm:$0xff]  }
 0x257   : > { %775 = vadd.xlane.f32.xlu0 %v774_v50  ;;  %v777_v22 = vadd.f32 %v733_v19, %v732_v14  ;;  %2137 = vmatpush3.bf16.msra.mxu1 %v2335_v13  ;;  %v3372_v4 = vsub.s32 1, %v3066_v42  ;;  %v872_v14 = vsub.s32 5, %v3066_v42  ;;  %v3376_v50 = vsub.s32 2, %v3066_v42 }
 0x258   : > { %v780_v54 = vadd.f32 %v735_v21, %v734_v8  ;;  %v736_v24 = vmul.f32 %v3358_v20, %v3358_v20  ;;  %v737_v10 = vmul.f32 %v3361_v7, %v3361_v7  ;;  %2138 = vmatprep.subr.bf16.mxu1 %v2336_v30 }
 0x259   : > { %778 = vadd.xlane.f32.xlu1 %v777_v22  ;;  %v869_v21 = vrot.slane %v3071_v44, %v3372_v4  ;;  %v873_v22 = vrot.slane %v3071_v44, %v872_v14 }
 0x25a   : > { %v783_v52 = vadd.f32 %v737_v10, %v736_v24  ;;  %v919_v24 = vrot.slane %v3071_v44, %v3376_v50  ;;  %v3397_v44 = vrot.slane %v923_v26, %v3376_v50 }
 0x25b   : > { %781 = vadd.xlane.f32.xlu0 %v780_v54  ;;  %2139 = vmatpush3.bf16.msra.mxu1 %v2337_v58  ;;  %v3389_v42 = vrot.slane %v873_v22, %v3372_v4 }
 0x25c   : > { %2140 = vmatprep.subr.bf16.mxu1 %v2338_v38  ;;  %v3392_v38 = vrot.slane %v919_v24, %v3376_v50 }
 0x25d   : > { %784 = vadd.xlane.f32.xlu1 %v783_v52  ;;  %v3386_v52 = vrot.slane %v869_v21, %v3372_v4 }
 0x25f   : > { %2141 = vmatpush3.bf16.msra.mxu1 %v2339_v61 }
 0x260   : > { %2142 = vmatprep.subr.bf16.mxu1 %v2340_v31 }
 0x263   : > { %2143 = vmatpush3.bf16.msra.mxu1 %v2341_v41 }
 0x264   : > { %2144 = vmatprep.subr.bf16.mxu1 %v2342_v39 }
 0x267   : > { %2145 = vmatpush3.bf16.msra.mxu1 %v2343_v45 }
 0x2bf   : > { %v740_v63 = vpop.xlane.xlu0 %739 }
 0x2c0   : > { %v786_v56 = vmul.f32 0.00390625, %v740_v63 }
 0x2c2   : > { %v802_v36 = vadd.f32 1e-05, %v786_v56 }
 0x2c3   : > { %v743_v37 = vpop.xlane.xlu1 %742 }
 0x2c4   : > { %2368 = vrsqrt.f32 %v802_v36  ;;  %v787_v1 = vmul.f32 0.00390625, %v743_v37 }
 0x2c6   : > { %v803_v46 = vadd.f32 1e-05, %v787_v1 }
 0x2c7   : > { %v746_v19 = vpop.xlane.xlu0 %745 }
 0x2c8   : > { %2370 = vrsqrt.f32 %v803_v46  ;;  %v788_v8 = vmul.f32 0.00390625, %v746_v19 }
 0x2ca   : > { %v804_v54 = vadd.f32 1e-05, %v788_v8 }
 0x2cb   : > { %v749_v10 = vpop.xlane.xlu1 %748 }
 0x2cc   : > { %2372 = vrsqrt.f32 %v804_v54  ;;  %v789_v13 = vmul.f32 0.00390625, %v749_v10 }
 0x2ce   : > { %v2369_v30 = vpop.eup %2368  ;;  %v805_v58 = vadd.f32 1e-05, %v789_v13 }
 0x2cf   : > { %v834_v61 = vmul.f32 %v2369_v30, %v3212_v48  ;;  %v835_v31 = vmul.f32 %v2369_v30, %v3215_v49  ;;  %v752_v41 = vpop.xlane.xlu0 %751 }
 0x2d0   : > { %2374 = vrsqrt.f32 %v805_v58  ;;  %v790_v39 = vmul.f32 0.00390625, %v752_v41 }
 0x2d1   : > { %v884_v45 = vmul.f32 %v3386_v52, %v834_v61  ;;  %v755_v63 = vpop.xlane.xlu1 %754  ;;  %v885_v56 = vmul.f32 %v3389_v42, %v835_v31 }
 0x2d2   : > { %v2371_v36 = vpop.eup %2370  ;;  %v806_v37 = vadd.f32 1e-05, %v790_v39  ;;  %v791_v1 = vmul.f32 0.00390625, %v755_v63 }
 0x2d3   : > { %v934_v14 = vadd.f32 %v3392_v38, %v884_v45  ;;  %v836_v48 = vmul.f32 %v2371_v36, %v3222_v27  ;;  %v837_v49 = vmul.f32 %v2371_v36, %v3225_v28  ;;  %v935_v46 = vadd.f32 %v3397_v44, %v885_v56 }
 0x2d4   : > { %2376 = vrsqrt.f32 %v806_v37  ;;  %v807_v19 = vadd.f32 1e-05, %v791_v1 }
 0x2d5   : > { %v886_v17 = vmul.f32 %v3386_v52, %v836_v48  ;;  %v887_v8 = vmul.f32 %v3389_v42, %v837_v49  ;;  %v998_v22 = vmul.f32 0.70710677, %v934_v14  ;;  %v999_v54 = vmul.f32 0.70710677, %v935_v46 }
 0x2d6   : > { %v2373_v21 = vpop.eup %2372  ;;  %2378 = vrsqrt.f32 %v807_v19 }
 0x2d7   : > { %v936_v24 = vadd.f32 %v3392_v38, %v886_v17  ;;  %v839_v10 = vmul.f32 %v2373_v21, %v3235_v35  ;;  %v937_v27 = vadd.f32 %v3397_v44, %v887_v8  ;;  %v838_v28 = vmul.f32 %v2373_v21, %v3232_v33 }
 0x2d8   : > { %v758_v26 = vpop.xlane.xlu0 %757  ;;  %2380 = verf.f32 %v999_v54  ;;  %v967_v8 = vmul.f32 0.5, %v935_v46 }
 0x2d9   : > { %v792_v13 = vmul.f32 0.00390625, %v758_v26  ;;  %v1001_v30 = vmul.f32 0.70710677, %v937_v27  ;;  %v1000_v61 = vmul.f32 0.70710677, %v936_v24  ;;  %2382 = verf.f32 %v998_v22 }
 0x2da   : > { %v2375_v58 = vpop.eup %2374  ;;  %v761_v31 = vpop.xlane.xlu1 %760  ;;  %v889_v41 = vmul.f32 %v3389_v42, %v839_v10  ;;  %v888_v36 = vmul.f32 %v3386_v52, %v838_v28 }
 0x2db   : > { %v840_v39 = vmul.f32 %v2375_v58, %v3242_v47  ;;  %v841_v45 = vmul.f32 %v2375_v58, %v3245_v53  ;;  %v808_v35 = vadd.f32 1e-05, %v792_v13  ;;  %v793_v63 = vmul.f32 0.00390625, %v761_v31 }
 0x2dc   : > { %v764_v56 = vpop.xlane.xlu0 %763  ;;  %2384 = verf.f32 %v1001_v30  ;;  %v939_v33 = vadd.f32 %v3397_v44, %v889_v41  ;;  %v938_v10 = vadd.f32 %v3392_v38, %v888_v36  ;;  %v966_v30 = vmul.f32 0.5, %v934_v14 }
 0x2dd   : > { %v809_v37 = vadd.f32 1e-05, %v793_v63  ;;  %v794_v1 = vmul.f32 0.00390625, %v764_v56  ;;  %v891_v48 = vmul.f32 %v3389_v42, %v841_v45  ;;  %2386 = verf.f32 %v1000_v61 }
 0x2de   : > { %v2377_v49 = vpop.eup %2376  ;;  %v767_v19 = vpop.xlane.xlu1 %766  ;;  %v1003_v17 = vmul.f32 0.70710677, %v939_v33  ;;  %v890_v47 = vmul.f32 %v3386_v52, %v840_v39  ;;  %2388 = vrsqrt.f32 %v808_v35  ;;  %v969_v35 = vmul.f32 0.5, %v937_v27 }
 0x2df   : > { %v810_v53 = vadd.f32 1e-05, %v794_v1  ;;  %2390 = vrsqrt.f32 %v809_v37  ;;  %v795_v21 = vmul.f32 0.00390625, %v767_v19  ;;  %v941_v54 = vadd.f32 %v3397_v44, %v891_v48 }
 0x2e0   : > { %v770_v22 = vpop.xlane.xlu0 %769  ;;  %v2379_v28 = vpop.eup %2378  ;;  %v843_v26 = vmul.f32 %v2377_v49, %v3255_v11  ;;  %2392 = verf.f32 %v1003_v17  ;;  %v940_v46 = vadd.f32 %v3392_v38, %v890_v47  ;;  %v968_v1 = vmul.f32 0.5, %v936_v24 }
 0x2e1   : > { %v796_v13 = vmul.f32 0.00390625, %v770_v22  ;;  %2394 = vrsqrt.f32 %v810_v53  ;;  %v811_v61 = vadd.f32 1e-05, %v795_v21  ;;  %v1005_v41 = vmul.f32 0.70710677, %v941_v54 }
 0x2e2   : > { %v2381_v58 = vpop.eup %2380  ;;  %v773_v31 = vpop.xlane.xlu1 %772  ;;  %v845_v36 = vmul.f32 %v2379_v28, %v3261_v16  ;;  %v3423_v11 = vmul.f32 0.5, %v939_v33  ;;  %v1002_v14 = vmul.f32 0.70710677, %v938_v10  ;;  %v842_v48 = vmul.f32 %v2377_v49, %v3252_v9 }
 0x2e3   : > { %v812_v39 = vadd.f32 1e-05, %v796_v13  ;;  %v797_v45 = vmul.f32 0.00390625, %v773_v31  ;;  %v1063_v63 = vadd.f32 1.0, %v2381_v58  ;;  %v2383_v56 = vpop.eup %2382  ;;  %2396 = vrsqrt.f32 %v811_v61 }
 0x2e4   : > { %v776_v37 = vpop.xlane.xlu0 %775  ;;  %v844_v47 = vmul.f32 %v2379_v28, %v3258_v15  ;;  %2398 = verf.f32 %v1005_v41  ;;  %v1004_v27 = vmul.f32 0.70710677, %v940_v46  ;;  %v893_v22 = vmul.f32 %v3389_v42, %v843_v26 }
 0x2e5   : > { %v813_v19 = vadd.f32 1e-05, %v797_v45  ;;  %v798_v17 = vmul.f32 0.00390625, %v776_v37  ;;  %2400 = vrsqrt.f32 %v812_v39  ;;  %v1095_v24 = vmul.f32 %v1063_v63, %v967_v8 }
 0x2e6   : > { %v2385_v53 = vpop.eup %2384  ;;  %v779_v21 = vpop.xlane.xlu1 %778  ;;  %v1062_v0 = vadd.f32 1.0, %v2383_v56  ;;  %2402 = verf.f32 %v1002_v14  ;;  %v895_v9 = vmul.f32 %v3389_v42, %v845_v36  ;;  %v973_v26 = vmul.f32 0.5, %v941_v54 }
 0x2e7   : > { %v799_v16 = vmul.f32 0.00390625, %v779_v21  ;;  %v1065_v13 = vadd.f32 1.0, %v2385_v53  ;;  %v2387_v33 = vpop.eup %2386  ;;  %v814_v58 = vadd.f32 1e-05, %v798_v17  ;;  %2404 = vrsqrt.f32 %v813_v19 }
 0x2e8   : > { %v782_v31 = vpop.xlane.xlu0 %781  ;;  %v2389_v49 = vpop.eup %2388  ;;  %v1064_v37 = vadd.f32 1.0, %v2387_v33  ;;  %2406 = verf.f32 %v1004_v27  ;;  %v943_v39 = vadd.f32 %v3397_v44, %v893_v22  ;;  %v970_v53 = vmul.f32 0.5, %v938_v10 }
 0x2e9   : > { %v815_v61 = vadd.f32 1e-05, %v799_v16  ;;  %v800_v15 = vmul.f32 0.00390625, %v782_v31  ;;  %v1097_v28 = vmul.f32 %v1065_v13, %v969_v35  ;;  %v2391_v41 = vpop.eup %2390  ;;  %v972_v56 = vmul.f32 0.5, %v940_v46 }
 0x2ea   : > { %v785_v45 = vpop.xlane.xlu1 %784  ;;  %v2393_v8 = vpop.eup %2392  ;;  %2408 = vrsqrt.f32 %v814_v58  ;;  %v1094_v21 = vmul.f32 %v1062_v0, %v966_v30  ;;  %v1096_v19 = vmul.f32 %v1064_v37, %v968_v1  ;;  %v846_v16 = vmul.f32 %v2389_v49, %v3272_v25 }
 0x2eb   : > { %v816_v63 = vadd.f32 1e-05, %v800_v15  ;;  %v1128_v17 = vpack.c.bf16 %v1097_v28, %v1095_v24  ;;  %v2395_v14 = vpop.eup %2394  ;;  %v801_v36 = vmul.f32 0.00390625, %v785_v45  ;;  %v847_v35 = vmul.f32 %v2389_v49, %v3275_v29 }
 0x2ec   : > { %2410 = vrsqrt.f32 %v815_v61  ;;  %v945_v54 = vadd.f32 %v3397_v44, %v895_v9  ;;  %v1127_v27 = vpack.c.bf16 %v1096_v19, %v1094_v21  ;;  %v1067_v22 = vadd.f32 1.0, %v2393_v8 }
 0x2ed   : > { %1307 = vmatprep.mubr.bf16.mxu1 %v1128_v17  ;;  %v1007_v13 = vmul.f32 0.70710677, %v943_v39  ;;  %v892_v24 = vmul.f32 %v3386_v52, %v842_v48  ;;  %v2397_v10 = vpop.eup %2396  ;;  %v848_v46 = vmul.f32 %v2391_v41, %v3278_v55  ;;  %v849_v33 = vmul.f32 %v2391_v41, %v3281_v32 }
 0x2ee   : > { %v3437_v0 = vmul.f32 %v2395_v14, %v3288_v34  ;;  %2412 = vrsqrt.f32 %v816_v63  ;;  %v2399_v25 = vpop.eup %2398  ;;  %v851_v29 = vmul.f32 %v2395_v14, %v3291_v40  ;;  %v817_v30 = vadd.f32 1e-05, %v801_v36  ;;  %1308 = vmatmul.mubr.bf16.vlgmr.msra.gmra.mrb[16].mxu1 %v1127_v27 }
 0x2ef   : > { %v1009_v1 = vmul.f32 0.70710677, %v945_v54  ;;  %2414 = verf.f32 %v1007_v13  ;;  %v2401_v58 = vpop.eup %2400  ;;  %v1069_v31 = vadd.f32 1.0, %v2399_v25  ;;  %v894_v48 = vmul.f32 %v3386_v52, %v844_v47 }
 0x2f0   : > { %v942_v9 = vadd.f32 %v3392_v38, %v892_v24  ;;  %v897_v55 = vmul.f32 %v3389_v42, %v847_v35  ;;  %v2403_v32 = vpop.eup %2402  ;;  %v852_v34 = vmul.f32 %v2397_v10, %v3298_v6  ;;  %v1099_v49 = vmul.f32 %v1067_v22, %v3423_v11 }
 0x2f1   : > { %v975_v61 = vmul.f32 0.5, %v943_v39  ;;  %2416 = verf.f32 %v1009_v1  ;;  %v2405_v40 = vpop.eup %2404  ;;  %v1101_v15 = vmul.f32 %v1069_v31, %v973_v26  ;;  %v1066_v28 = vadd.f32 1.0, %v2403_v32 }
 0x2f2   : > { %v944_v41 = vadd.f32 %v3392_v38, %v894_v48  ;;  %v899_v45 = vmul.f32 %v3389_v42, %v849_v33  ;;  %v2407_v37 = vpop.eup %2406  ;;  %v853_v47 = vmul.f32 %v2397_v10, %v3301_v59  ;;  %2418 = vrsqrt.f32 %v817_v30 }
 0x2f3   : > { %v1006_v8 = vmul.f32 0.70710677, %v942_v9  ;;  %v947_v63 = vadd.f32 %v3397_v44, %v897_v55  ;;  %v3450_v6 = vmul.f32 %v2401_v58, %v3308_v12  ;;  %v1130_v11 = vpack.c.bf16 %v1101_v15, %v1099_v49 }
 0x2f4   : > { %v1068_v39 = vadd.f32 1.0, %v2407_v37  ;;  %v977_v17 = vmul.f32 0.5, %v945_v54  ;;  %v2409_v14 = vpop.eup %2408  ;;  %v855_v26 = vmul.f32 %v2401_v58, %v3311_v18  ;;  %v3454_v36 = vmul.f32 %v2405_v40, %v3318_v23 }
 0x2f5   : > { %v1008_v21 = vmul.f32 0.70710677, %v944_v41  ;;  %2420 = verf.f32 %v1006_v8  ;;  %1315 = vmatprep.mubr.bf16.mxu1 %v1130_v11  ;;  %v1098_v59 = vmul.f32 %v1066_v28, %v970_v53  ;;  %v949_v27 = vadd.f32 %v3397_v44, %v899_v45 }
 0x2f6   : > { %v2411_v19 = vpop.eup %2410  ;;  %v1100_v35 = vmul.f32 %v1068_v39, %v972_v56  ;;  %v1011_v22 = vmul.f32 0.70710677, %v947_v63  ;;  %v857_v12 = vmul.f32 %v2405_v40, %v3321_v51  ;;  %v974_v13 = vmul.f32 0.5, %v942_v9 }
 0x2f7   : > { %2422 = verf.f32 %v1008_v21  ;;  %v896_v54 = vmul.f32 %v3386_v52, %v846_v16  ;;  %v3460_v18 = vmul.f32 %v2409_v14, %v3328_v60  ;;  %v1013_v10 = vmul.f32 0.70710677, %v949_v27 }
 0x2f8   : > { %v2413_v24 = vpop.eup %2412  ;;  %v1129_v23 = vpack.c.bf16 %v1100_v35, %v1098_v59  ;;  %2424 = verf.f32 %v1011_v22  ;;  %v3463_v53 = vmul.f32 %v2409_v14, %v3331_v57  ;;  %v976_v56 = vmul.f32 0.5, %v944_v41 }
 0x2f9   : > { %v2415_v33 = vpop.eup %2414  ;;  %v898_v25 = vmul.f32 %v3386_v52, %v848_v46  ;;  %v946_v51 = vadd.f32 %v3392_v38, %v896_v54  ;;  %2426 = verf.f32 %v1013_v10  ;;  %v901_v16 = vmul.f32 %v3389_v42, %v851_v29 }
 0x2fa   : > { %1316 = vmatmul.mubr.bf16.gmra.mrb[20].mxu1 %v1129_v23  ;;  %v1071_v30 = vadd.f32 1.0, %v2415_v33  ;;  %v903_v60 = vmul.f32 %v3389_v42, %v853_v47  ;;  %v3470_v58 = vmul.f32 %v2411_v19, %v3338_v3  ;;  %v900_v48 = vmul.f32 %v3386_v52, %v3437_v0 }
 0x2fb   : > { %v2417_v1 = vpop.eup %2416  ;;  %v948_v31 = vadd.f32 %v3392_v38, %v898_v25  ;;  %v1010_v57 = vmul.f32 0.70710677, %v946_v51  ;;  %v3476_v46 = vmul.f32 %v2411_v19, %v3341_v62  ;;  %v951_v55 = vadd.f32 %v3397_v44, %v901_v16 }
 0x2fc   : > { %v1073_v9 = vadd.f32 1.0, %v2417_v1  ;;  %v3480_v29 = vadd.f32 %v3397_v44, %v903_v60  ;;  %v3482_v32 = vpop.eup %2418  ;;  %v979_v49 = vmul.f32 0.5, %v947_v63  ;;  %v902_v40 = vmul.f32 %v3386_v52, %v852_v34 }
 0x2fd   : > { %v1012_v3 = vmul.f32 0.70710677, %v948_v31  ;;  %2428 = verf.f32 %v1010_v57  ;;  %v3486_v15 = vmul.f32 %v2413_v24, %v3348_v5  ;;  %v1103_v0 = vmul.f32 %v1071_v30, %v975_v61 }
 0x2fe   : > { %v1105_v28 = vmul.f32 %v1073_v9, %v977_v17  ;;  %v1015_v62 = vmul.f32 0.70710677, %v951_v55  ;;  %v1017_v45 = vmul.f32 0.70710677, %v3480_v29  ;;  %v3490_v37 = vadd.f32 %v3392_v38, %v900_v48 }
 0x2ff   : > { %v2421_v41 = vpop.eup %2420  ;;  %2430 = verf.f32 %v1012_v3  ;;  %v3493_v47 = vadd.f32 %v3392_v38, %v902_v40  ;;  %v905_v34 = vmul.f32 %v3389_v42, %v855_v26  ;;  %v3497_v61 = vmul.f32 %v2413_v24, %v3351_v2 }
 0x300   : > { %v1132_v8 = vpack.c.bf16 %v1105_v28, %v1103_v0  ;;  %v1070_v63 = vadd.f32 1.0, %v2421_v41  ;;  %2432 = verf.f32 %v1015_v62  ;;  %v981_v11 = vmul.f32 0.5, %v949_v27 }
 0x301   : > { %v2423_v5 = vpop.eup %2422  ;;  %2434 = verf.f32 %v1017_v45  ;;  %v1014_v39 = vmul.f32 0.70710677, %v3490_v37  ;;  %v1016_v19 = vmul.f32 0.70710677, %v3493_v47  ;;  %v907_v59 = vmul.f32 %v3389_v42, %v857_v12 }
 0x302   : > { %v2425_v17 = vpop.eup %2424  ;;  %1323 = vmatprep.mubr.bf16.mxu1 %v1132_v8  ;;  %v1072_v14 = vadd.f32 1.0, %v2423_v5  ;;  %v1102_v21 = vmul.f32 %v1070_v63, %v974_v13  ;;  %v3503_v26 = vadd.f32 %v3397_v44, %v905_v34  ;;  %v904_v2 = vmul.f32 %v3386_v52, %v3450_v6 }
 0x303   : > { %v1075_v35 = vadd.f32 1.0, %v2425_v17  ;;  %2436 = verf.f32 %v1014_v39  ;;  %v2427_v27 = vpop.eup %2426  ;;  %v3508_v54 = vadd.f32 %v3397_v44, %v907_v59  ;;  %v906_v13 = vmul.f32 %v3386_v52, %v3454_v36 }
 0x304   : > { %v1104_v22 = vmul.f32 %v1072_v14, %v976_v56  ;;  %2438 = verf.f32 %v1016_v19  ;;  %v865_v12 = vmul.f32 %v3482_v32, %v3361_v7  ;;  %v1077_v24 = vadd.f32 1.0, %v2427_v27 }
 0x305   : > { %v978_v23 = vmul.f32 0.5, %v946_v51  ;;  %v1019_v10 = vmul.f32 0.70710677, %v3503_v26  ;;  %v1107_v25 = vmul.f32 %v1075_v35, %v979_v49  ;;  %v1021_v6 = vmul.f32 0.70710677, %v3508_v54 }
 0x306   : > { %v1131_v33 = vpack.c.bf16 %v1104_v22, %v1102_v21  ;;  %v3517_v56 = vadd.f32 %v3392_v38, %v904_v2  ;;  %v1109_v16 = vmul.f32 %v1077_v24, %v981_v11  ;;  %v3520_v60 = vadd.f32 %v3392_v38, %v906_v13 }
 0x307   : > { %v2429_v30 = vpop.eup %2428  ;;  %2440 = verf.f32 %v1019_v10  ;;  %v909_v7 = vmul.f32 %v3389_v42, %v3463_v53  ;;  %v980_v36 = vmul.f32 0.5, %v948_v31  ;;  %v983_v9 = vmul.f32 0.5, %v951_v55 }
 0x308   : > { %1324 = vmatmul.mubr.bf16.gmra.mrb[24].mxu1 %v1131_v33  ;;  %v1074_v51 = vadd.f32 1.0, %v2429_v30  ;;  %2442 = verf.f32 %v1021_v6  ;;  %v1018_v1 = vmul.f32 0.70710677, %v3517_v56  ;;  %v1134_v48 = vpack.c.bf16 %v1109_v16, %v1107_v25 }
 0x309   : > { %v2431_v57 = vpop.eup %2430  ;;  %v1020_v49 = vmul.f32 0.70710677, %v3520_v60  ;;  %v911_v3 = vmul.f32 %v3389_v42, %v3476_v46  ;;  %v985_v28 = vmul.f32 0.5, %v3480_v29  ;;  %v3530_v53 = vadd.f32 %v3397_v44, %v909_v7 }
 0x30a   : > { %v2433_v40 = vpop.eup %2432  ;;  %v1076_v0 = vadd.f32 1.0, %v2431_v57  ;;  %2444 = verf.f32 %v1018_v1  ;;  %1331 = vmatprep.mubr.bf16.mxu1 %v1134_v48  ;;  %v908_v55 = vmul.f32 %v3386_v52, %v3460_v18  ;;  %v1106_v45 = vmul.f32 %v1074_v51, %v978_v23 }
 0x30b   : > { %v2435_v31 = vpop.eup %2434  ;;  %v1079_v62 = vadd.f32 1.0, %v2433_v40  ;;  %2446 = verf.f32 %v1020_v49  ;;  %v3533_v41 = vadd.f32 %v3397_v44, %v911_v3  ;;  %v1023_v63 = vmul.f32 0.70710677, %v3530_v53 }
 0x30c   : > { %v1108_v46 = vmul.f32 %v1076_v0, %v980_v36  ;;  %v1081_v8 = vadd.f32 1.0, %v2435_v31  ;;  %v864_v34 = vmul.f32 %v3482_v32, %v3358_v20  ;;  %v984_v5 = vmul.f32 0.5, %v3493_v47 }
 0x30d   : > { %v2437_v29 = vpop.eup %2436  ;;  %v1025_v11 = vmul.f32 0.70710677, %v3533_v41  ;;  %v910_v39 = vmul.f32 %v3386_v52, %v3470_v58  ;;  %v1111_v21 = vmul.f32 %v1079_v62, %v983_v9  ;;  %2448 = verf.f32 %v1023_v63 }
 0x30e   : > { %v2439_v17 = vpop.eup %2438  ;;  %v1133_v14 = vpack.c.bf16 %v1108_v46, %v1106_v45  ;;  %v1113_v18 = vmul.f32 %v1081_v8, %v985_v28  ;;  %v3545_v59 = vadd.f32 %v3392_v38, %v908_v55  ;;  %v1078_v32 = vadd.f32 1.0, %v2437_v29 }
 0x30f   : > { %v1080_v19 = vadd.f32 1.0, %v2439_v17  ;;  %2450 = verf.f32 %v1025_v11  ;;  %v960_v35 = vadd.f32 %v3392_v38, %v910_v39  ;;  %v913_v47 = vmul.f32 %v3389_v42, %v3497_v61 }
 0x310   : > { %1332 = vmatmul.mubr.bf16.gmra.mrb[28].mxu1 %v1133_v14  ;;  %v1136_v20 = vpack.c.bf16 %v1113_v18, %v1111_v21  ;;  %v915_v58 = vmul.f32 %v3389_v42, %v865_v12  ;;  %v982_v27 = vmul.f32 0.5, %v3490_v37  ;;  %v987_v13 = vmul.f32 0.5, %v3503_v26 }
 0x311   : > { %v2441_v2 = vpop.eup %2440  ;;  %v1112_v22 = vmul.f32 %v1080_v19, %v984_v5  ;;  %v1022_v24 = vmul.f32 0.70710677, %v3545_v59  ;;  %v1024_v33 = vmul.f32 0.70710677, %v960_v35  ;;  %v963_v25 = vadd.f32 %v3397_v44, %v913_v47 }
 0x312   : > { %v2443_v23 = vpop.eup %2442  ;;  %1339 = vmatprep.mubr.bf16.mxu1 %v1136_v20  ;;  %v1083_v10 = vadd.f32 1.0, %v2441_v2  ;;  %v965_v6 = vadd.f32 %v3397_v44, %v915_v58  ;;  %v989_v61 = vmul.f32 0.5, %v3508_v54  ;;  %v912_v42 = vmul.f32 %v3386_v52, %v3486_v15 }
 0x313   : > { %v1085_v30 = vadd.f32 1.0, %v2443_v23  ;;  %2452 = verf.f32 %v1022_v24  ;;  %v1110_v12 = vmul.f32 %v1078_v32, %v982_v27  ;;  %v1027_v36 = vmul.f32 0.70710677, %v963_v25 }
 0x314   : > { %v2445_v37 = vpop.eup %2444  ;;  %2454 = verf.f32 %v1024_v33  ;;  %v1115_v16 = vmul.f32 %v1083_v10, %v987_v13  ;;  %v1029_v51 = vmul.f32 0.70710677, %v965_v6  ;;  %v914_v48 = vmul.f32 %v3386_v52, %v864_v34 }
 0x315   : > { %v2447_v26 = vpop.eup %2446  ;;  %v1117_v7 = vmul.f32 %v1085_v30, %v989_v61  ;;  %v1135_v1 = vpack.c.bf16 %v1112_v22, %v1110_v12  ;;  %v962_v44 = vadd.f32 %v3392_v38, %v912_v42  ;;  %2456 = verf.f32 %v1027_v36 }
 0x316   : > { %v1084_v57 = vadd.f32 1.0, %v2447_v26  ;;  %v988_v15 = vmul.f32 0.5, %v3520_v60  ;;  %v1082_v49 = vadd.f32 1.0, %v2445_v37  ;;  %2458 = verf.f32 %v1029_v51 }
 0x317   : > { %v1138_v54 = vpack.c.bf16 %v1117_v7, %v1115_v16  ;;  %v2449_v9 = vpop.eup %2448  ;;  %v964_v3 = vadd.f32 %v3392_v38, %v914_v48  ;;  %v986_v0 = vmul.f32 0.5, %v3517_v56  ;;  %v1026_v31 = vmul.f32 0.70710677, %v962_v44 }
 0x318   : > { %1340 = vmatmul.mubr.bf16.gmra.mrb[32].mxu1 %v1135_v1  ;;  %v1087_v28 = vadd.f32 1.0, %v2449_v9  ;;  %v1116_v62 = vmul.f32 %v1084_v57, %v988_v15  ;;  %v993_v52 = vmul.f32 0.5, %v3533_v41  ;;  %v991_v46 = vmul.f32 0.5, %v3530_v53 }
 0x319   : > { %v2451_v40 = vpop.eup %2450  ;;  %1347 = vmatprep.mubr.bf16.mxu1 %v1138_v54  ;;  %v1028_v45 = vmul.f32 0.70710677, %v964_v3  ;;  %2460 = verf.f32 %v1026_v31  ;;  %v1114_v8 = vmul.f32 %v1082_v49, %v986_v0  ;;  %v992_v56 = vmul.f32 0.5, %v960_v35 }
 0x31a   : > { %v1089_v55 = vadd.f32 1.0, %v2451_v40  ;;  %v1119_v29 = vmul.f32 %v1087_v28, %v991_v46  ;;  %v990_v14 = vmul.f32 0.5, %v3545_v59  ;;  %v995_v18 = vmul.f32 0.5, %v963_v25  ;;  %v3570_v25 = vld [vmem:[%s3914_s4] sm:$0x7] }
 0x31b   : > { %2462 = verf.f32 %v1028_v45  ;;  %v1137_v34 = vpack.c.bf16 %v1116_v62, %v1114_v8  ;;  %v997_v19 = vmul.f32 0.5, %v965_v6  ;;  %v996_v35 = vmul.f32 0.5, %v964_v3 }
 0x31c   : > { %v1121_v60 = vmul.f32 %v1089_v55, %v993_v52  ;;  %v994_v10 = vmul.f32 0.5, %v962_v44  ;;  %v3574_v30 = vrot.slane %v3570_v25, %v3069_v43 }
 0x31d   : > { %v2453_v63 = vpop.eup %2452 }
 0x31e   : > { %v2455_v38 = vpop.eup %2454  ;;  %v1140_v5 = vpack.c.bf16 %v1121_v60, %v1119_v29  ;;  %v1086_v39 = vadd.f32 1.0, %v2453_v63 }
 0x31f   : > { %v1088_v11 = vadd.f32 1.0, %v2455_v38  ;;  %v2457_v17 = vpop.eup %2456 }
 0x320   : > { %1348 = vmatmul.mubr.bf16.gmra.mrb[36].mxu1 %v1137_v34  ;;  %v2459_v41 = vpop.eup %2458  ;;  %v1091_v53 = vadd.f32 1.0, %v2457_v17  ;;  %v1118_v32 = vmul.f32 %v1086_v39, %v990_v14 }
 0x321   : > { %1355 = vmatprep.mubr.bf16.mxu1 %v1140_v5  ;;  %v1120_v21 = vmul.f32 %v1088_v11, %v992_v56  ;;  %v1093_v20 = vadd.f32 1.0, %v2459_v41 }
 0x322   : > { %v1123_v58 = vmul.f32 %v1091_v53, %v995_v18 }
 0x323   : > { %v2461_v47 = vpop.eup %2460  ;;  %v1125_v2 = vmul.f32 %v1093_v20, %v997_v19  ;;  %v1139_v22 = vpack.c.bf16 %v1120_v21, %v1118_v32 }
 0x324   : > { %v1090_v23 = vadd.f32 1.0, %v2461_v47 }
 0x325   : > { %v2463_v27 = vpop.eup %2462  ;;  %v1142_v13 = vpack.c.bf16 %v1125_v2, %v1123_v58 }
 0x326   : > { %v1092_v24 = vadd.f32 1.0, %v2463_v27  ;;  %v1122_v59 = vmul.f32 %v1090_v23, %v994_v10 }
 0x328   : > { %1356 = vmatmul.mubr.bf16.gmra.mrb[40].mxu1 %v1139_v22  ;;  %v1124_v33 = vmul.f32 %v1092_v24, %v996_v35 }
 0x329   : > { %1363 = vmatprep.mubr.bf16.mxu1 %v1142_v13 }
 0x32a   : > { %v1141_v61 = vpack.c.bf16 %v1124_v33, %v1122_v59 }
 0x330   : > { %1364 = vmatmul.mubr.bf16.gmra.mrb[44].mxu1 %v1141_v61 }
 0x3c1   : > { %v2146_v6 = vpop.f32.mrb[16].mxu1 }
 0x3c2   : > { %v2147_v42 = vpop.f32.mrb[17].mxu1 }
 0x3c3   : > { %v2148_v37 = vadd.f32 %v2147_v42, %v2146_v6  ;;  %v2149_v12 = vpop.f32.mrb[18].mxu1 }
 0x3c4   : > { %v2150_v26 = vpop.f32.mrb[19].mxu1 }
 0x3c5   : > { %v2151_v16 = vadd.f32 %v2150_v26, %v2149_v12  ;;  %v3577_v7 = vadd.f32 %v2148_v37, %v3574_v30 }
 0x3c7   : > { %1372 = vadd.xlane.f32.xlu0 %v3577_v7  ;;  %v3581_v36 = vadd.f32 %v2151_v16, %v3574_v30 }
 0x3c9   : > { %1374 = vadd.xlane.f32.xlu1 %v3581_v36 }
 0x3cd   : > { %v2152_v51 = vpop.f32.mrb[20].mxu1 }
 0x3ce   : > { %v2153_v1 = vpop.f32.mrb[21].mxu1 }
 0x3cf   : > { %v2154_v57 = vadd.f32 %v2153_v1, %v2152_v51  ;;  %v2155_v48 = vpop.f32.mrb[22].mxu1 }
 0x3d0   : > { %v2156_v44 = vpop.f32.mrb[23].mxu1 }
 0x3d1   : > { %v2157_v54 = vadd.f32 %v2156_v44, %v2155_v48  ;;  %v3585_v9 = vadd.f32 %v2154_v57, %v3574_v30 }
 0x3d3   : > { %1376 = vadd.xlane.f32.xlu0 %v3585_v9  ;;  %v3589_v15 = vadd.f32 %v2157_v54, %v3574_v30 }
 0x3d5   : > { %1378 = vadd.xlane.f32.xlu1 %v3589_v15 }
 0x3db   : > { %v2158_v49 = vpop.f32.mrb[24].mxu1 }
 0x3dc   : > { %v2159_v3 = vpop.f32.mrb[25].mxu1 }
 0x3dd   : > { %v2160_v40 = vadd.f32 %v2159_v3, %v2158_v49  ;;  %v2161_v0 = vpop.f32.mrb[26].mxu1 }
 0x3de   : > { %v2162_v28 = vpop.f32.mrb[27].mxu1 }
 0x3df   : > { %v2163_v31 = vadd.f32 %v2162_v28, %v2161_v0  ;;  %v3593_v62 = vadd.f32 %v2160_v40, %v3574_v30 }
 0x3e1   : > { %1380 = vadd.xlane.f32.xlu0 %v3593_v62  ;;  %v3597_v52 = vadd.f32 %v2163_v31, %v3574_v30 }
 0x3e3   : > { %1382 = vadd.xlane.f32.xlu1 %v3597_v52  ;;  %v2164_v55 = vpop.f32.mrb[28].mxu1 }
 0x3e4   : > { %v2165_v45 = vpop.f32.mrb[29].mxu1 }
 0x3e5   : > { %v2166_v46 = vadd.f32 %v2165_v45, %v2164_v55  ;;  %v2167_v8 = vpop.f32.mrb[30].mxu1 }
 0x3e6   : > { %v2168_v60 = vpop.f32.mrb[31].mxu1 }
 0x3e7   : > { %v2169_v63 = vadd.f32 %v2168_v60, %v2167_v8  ;;  %v3601_v29 = vadd.f32 %v2166_v46, %v3574_v30 }
 0x3e9   : > { %1384 = vadd.xlane.f32.xlu0 %v3601_v29  ;;  %v3605_v38 = vadd.f32 %v2169_v63, %v3574_v30 }
 0x3eb   : > { %1386 = vadd.xlane.f32.xlu1 %v3605_v38  ;;  %v2170_v34 = vpop.f32.mrb[32].mxu1 }
 0x3ec   : > { %v2171_v5 = vpop.f32.mrb[33].mxu1 }
 0x3ed   : > { %v2172_v11 = vadd.f32 %v2171_v5, %v2170_v34  ;;  %v2173_v56 = vpop.f32.mrb[34].mxu1 }
 0x3ee   : > { %v2174_v39 = vpop.f32.mrb[35].mxu1 }
 0x3ef   : > { %v2175_v17 = vadd.f32 %v2174_v39, %v2173_v56  ;;  %v3609_v41 = vadd.f32 %v2172_v11, %v3574_v30 }
 0x3f1   : > { %1388 = vadd.xlane.f32.xlu0 %v3609_v41  ;;  %v3613_v14 = vadd.f32 %v2175_v17, %v3574_v30 }
 0x3f3   : > { %1390 = vadd.xlane.f32.xlu1 %v3613_v14  ;;  %v2176_v21 = vpop.f32.mrb[36].mxu1 }
 0x3f4   : > { %v2177_v53 = vpop.f32.mrb[37].mxu1 }
 0x3f5   : > { %v2178_v18 = vadd.f32 %v2177_v53, %v2176_v21  ;;  %v2179_v19 = vpop.f32.mrb[38].mxu1 }
 0x3f6   : > { %v2180_v20 = vpop.f32.mrb[39].mxu1 }
 0x3f7   : > { %v2181_v32 = vadd.f32 %v2180_v20, %v2179_v19  ;;  %v3617_v47 = vadd.f32 %v2178_v18, %v3574_v30 }
 0x3f9   : > { %1392 = vadd.xlane.f32.xlu0 %v3617_v47  ;;  %v3621_v58 = vadd.f32 %v2181_v32, %v3574_v30  ;;  %v2344_v32 = vld [vmem:[#allocation10] ss:$8 sps:$4 sm:$0xff]  }
 0x3fb   : > { %1394 = vadd.xlane.f32.xlu1 %v3621_v58  ;;  %v2182_v2 = vpop.f32.mrb[40].mxu1 }
 0x3fc   : > { %v2183_v27 = vpop.f32.mrb[41].mxu1 }
 0x3fd   : > { %v2184_v22 = vadd.f32 %v2183_v27, %v2182_v2  ;;  %v2185_v13 = vpop.f32.mrb[42].mxu1  ;;  %v2346_v2 = vld [vmem:[#allocation10 + $0x4] ss:$8 sps:$4 sm:$0xff]  }
 0x3fe   : > { %v2186_v24 = vpop.f32.mrb[43].mxu1  ;;  %1785 = vmatprep.subr.bf16.mxu0 %v2346_v2 }
 0x3ff   : > { %v2187_v35 = vadd.f32 %v2186_v24, %v2185_v13  ;;  %v3625_v23 = vadd.f32 %v2184_v22, %v3574_v30  ;;  %v2349_v13 = vld [vmem:[#allocation10 + $0x14] ss:$8 sps:$4 sm:$0xff]   ;;  %1786 = vmatpush1.bf16.msra.mxu0 %v2344_v32  ;;  %v3722_v32 = vrot.slane %v3570_v25, %v3372_v4 }
 0x400   : > { %1787 = vmatprep.subr.bf16.mxu0 %v2349_v13  ;;  %v3726_v13 = vrot.slane %v3570_v25, %v3376_v50 }
 0x401   : > { %1396 = vadd.xlane.f32.xlu0 %v3625_v23  ;;  %v3629_v10 = vadd.f32 %v2187_v35, %v3574_v30 }
 0x403   : > { %1398 = vadd.xlane.f32.xlu1 %v3629_v10  ;;  %v2188_v33 = vpop.f32.mrb[44].mxu1 }
 0x404   : > { %v2189_v59 = vpop.f32.mrb[45].mxu1 }
 0x405   : > { %v2190_v61 = vadd.f32 %v2189_v59, %v2188_v33  ;;  %v2191_v6 = vpop.f32.mrb[46].mxu1 }
 0x406   : > { %v2192_v42 = vpop.f32.mrb[47].mxu1 }
 0x407   : > { %v2193_v37 = vadd.f32 %v2192_v42, %v2191_v6  ;;  %v3633_v12 = vadd.f32 %v2190_v61, %v3574_v30 }
 0x409   : > { %1400 = vadd.xlane.f32.xlu0 %v3633_v12  ;;  %v3637_v26 = vadd.f32 %v2193_v37, %v3574_v30 }
 0x40b   : > { %1402 = vadd.xlane.f32.xlu1 %v3637_v26 }
 0x454   : > { %v1373_v16 = vpop.xlane.xlu0 %1372 }
 0x455   : > { %v1405_v51 = vmul.f32 0.0078125, %v1373_v16 }
 0x456   : > { %v1375_v1 = vpop.xlane.xlu1 %1374 }
 0x457   : > { %v3641_v57 = vsub.f32 %v3577_v7, %v1405_v51  ;;  %v1406_v48 = vmul.f32 0.0078125, %v1375_v1  ;;  %v2350_v1 = vld [vmem:[#allocation10 + $0x20] ss:$8 sps:$4 sm:$0xff]  }
 0x459   : > { %v3644_v44 = vsub.f32 %v3581_v36, %v1406_v48  ;;  %v1437_v54 = vmul.f32 %v3641_v57, %v3641_v57  ;;  %v2352_v48 = vld [vmem:[#allocation10 + $0x24] ss:$8 sps:$4 sm:$0xff]  }
 0x45b   : > { %1453 = vadd.xlane.f32.xlu0 %v1437_v54  ;;  %v1438_v30 = vmul.f32 %v3644_v44, %v3644_v44 }
 0x45d   : > { %1455 = vadd.xlane.f32.xlu1 %v1438_v30  ;;  %v2355_v30 = vld [vmem:[#allocation10 + $0x34] ss:$8 sps:$4 sm:$0xff]  }
 0x460   : > { %v1377_v49 = vpop.xlane.xlu0 %1376 }
 0x461   : > { %v1407_v3 = vmul.f32 0.0078125, %v1377_v49 }
 0x462   : > { %v1379_v40 = vpop.xlane.xlu1 %1378 }
 0x463   : > { %v3651_v0 = vsub.f32 %v3585_v9, %v1407_v3  ;;  %v1408_v7 = vmul.f32 0.0078125, %v1379_v40  ;;  %v2353_v3 = vld [vmem:[#allocation10 + $0x30] ss:$8 sps:$4 sm:$0xff]  }
 0x465   : > { %v3654_v28 = vsub.f32 %v3589_v15, %v1408_v7  ;;  %v1439_v36 = vmul.f32 %v3651_v0, %v3651_v0 }
 0x467   : > { %1457 = vadd.xlane.f32.xlu0 %v1439_v36  ;;  %v1440_v31 = vmul.f32 %v3654_v28, %v3654_v28 }
 0x469   : > { %1459 = vadd.xlane.f32.xlu1 %v1440_v31  ;;  %v2356_v31 = vld [vmem:[#allocation10 + $0x40] ss:$8 sps:$4 sm:$0xff]  }
 0x46e   : > { %v1381_v55 = vpop.xlane.xlu0 %1380 }
 0x46f   : > { %v1409_v45 = vmul.f32 0.0078125, %v1381_v55  ;;  %v2358_v55 = vld [vmem:[#allocation10 + $0x44] ss:$8 sps:$4 sm:$0xff]  }
 0x470   : > { %v1383_v46 = vpop.xlane.xlu1 %1382 }
 0x471   : > { %v3661_v8 = vsub.f32 %v3593_v62, %v1409_v45  ;;  %v1410_v9 = vmul.f32 0.0078125, %v1383_v46 }
 0x473   : > { %v3664_v60 = vsub.f32 %v3597_v52, %v1410_v9  ;;  %v1441_v15 = vmul.f32 %v3661_v8, %v3661_v8  ;;  %v2361_v9 = vld [vmem:[#allocation10 + $0x54] ss:$8 sps:$4 sm:$0xff]  }
 0x475   : > { %1461 = vadd.xlane.f32.xlu0 %v1441_v15  ;;  %v1442_v63 = vmul.f32 %v3664_v60, %v3664_v60 }
 0x476   : > { %v1385_v34 = vpop.xlane.xlu0 %1384 }
 0x477   : > { %v1411_v5 = vmul.f32 0.0078125, %v1385_v34  ;;  %1463 = vadd.xlane.f32.xlu1 %v1442_v63  ;;  %v2359_v63 = vld [vmem:[#allocation10 + $0x50] ss:$8 sps:$4 sm:$0xff]   ;;  %v2364_v34 = vld [vmem:[#allocation10 + $0x64] ss:$8 sps:$4 sm:$0xff]  }
 0x478   : > { %v1387_v11 = vpop.xlane.xlu1 %1386 }
 0x479   : > { %v3671_v56 = vsub.f32 %v3601_v29, %v1411_v5  ;;  %v1412_v62 = vmul.f32 0.0078125, %v1387_v11  ;;  %v2367_v5 = vld [vmem:[#allocation10 + $0x74] ss:$8 sps:$4 sm:$0xff]  }
 0x47b   : > { %v3674_v39 = vsub.f32 %v3605_v38, %v1412_v62  ;;  %v1443_v52 = vmul.f32 %v3671_v56, %v3671_v56 }
 0x47d   : > { %1465 = vadd.xlane.f32.xlu0 %v1443_v52  ;;  %v1444_v17 = vmul.f32 %v3674_v39, %v3674_v39 }
 0x47e   : > { %v1389_v21 = vpop.xlane.xlu0 %1388 }
 0x47f   : > { %v1413_v53 = vmul.f32 0.0078125, %v1389_v21  ;;  %1467 = vadd.xlane.f32.xlu1 %v1444_v17 }
 0x480   : > { %v1391_v18 = vpop.xlane.xlu1 %1390 }
 0x481   : > { %v3681_v19 = vsub.f32 %v3609_v41, %v1413_v53  ;;  %v1414_v29 = vmul.f32 0.0078125, %v1391_v18  ;;  %v2347_v41 = vld [vmem:[#allocation10 + $0x10] ss:$8 sps:$4 sm:$0xff]  }
 0x482   : > { %1788 = vmatpush1.bf16.msra.mxu0 %v2347_v41 }
 0x483   : > { %v3684_v20 = vsub.f32 %v3613_v14, %v1414_v29  ;;  %v1445_v38 = vmul.f32 %v3681_v19, %v3681_v19  ;;  %1789 = vmatprep.subr.bf16.mxu0 %v2352_v48 }
 0x485   : > { %1469 = vadd.xlane.f32.xlu0 %v1445_v38  ;;  %v1446_v27 = vmul.f32 %v3684_v20, %v3684_v20 }
 0x486   : > { %v1393_v22 = vpop.xlane.xlu0 %1392  ;;  %1790 = vmatpush1.bf16.msra.mxu0 %v2350_v1 }
 0x487   : > { %v1415_v24 = vmul.f32 0.0078125, %v1393_v22  ;;  %1471 = vadd.xlane.f32.xlu1 %v1446_v27  ;;  %1791 = vmatprep.subr.bf16.mxu0 %v2355_v30 }
 0x488   : > { %v1395_v35 = vpop.xlane.xlu1 %1394 }
 0x489   : > { %v3691_v14 = vsub.f32 %v3617_v47, %v1415_v24  ;;  %v1416_v33 = vmul.f32 0.0078125, %v1395_v35 }
 0x48a   : > { %1792 = vmatpush1.bf16.msra.mxu0 %v2353_v3 }
 0x48b   : > { %v3694_v59 = vsub.f32 %v3621_v58, %v1416_v33  ;;  %v1447_v61 = vmul.f32 %v3691_v14, %v3691_v14  ;;  %1793 = vmatprep.subr.bf16.mxu0 %v2358_v55 }
 0x48d   : > { %1473 = vadd.xlane.f32.xlu0 %v1447_v61  ;;  %v1448_v6 = vmul.f32 %v3694_v59, %v3694_v59 }
 0x48e   : > { %v1397_v42 = vpop.xlane.xlu0 %1396  ;;  %1794 = vmatpush1.bf16.msra.mxu0 %v2356_v31 }
 0x48f   : > { %v1417_v37 = vmul.f32 0.0078125, %v1397_v42  ;;  %1475 = vadd.xlane.f32.xlu1 %v1448_v6  ;;  %1795 = vmatprep.subr.bf16.mxu0 %v2361_v9 }
 0x490   : > { %v1399_v16 = vpop.xlane.xlu1 %1398 }
 0x491   : > { %v3701_v51 = vsub.f32 %v3625_v23, %v1417_v37  ;;  %v1418_v47 = vmul.f32 0.0078125, %v1399_v16 }
 0x492   : > { %1796 = vmatpush1.bf16.msra.mxu0 %v2359_v63 }
 0x493   : > { %v3704_v58 = vsub.f32 %v3629_v10, %v1418_v47  ;;  %v1449_v54 = vmul.f32 %v3701_v51, %v3701_v51  ;;  %1797 = vmatprep.subr.bf16.mxu0 %v2364_v34 }
 0x495   : > { %1477 = vadd.xlane.f32.xlu0 %v1449_v54  ;;  %v1450_v49 = vmul.f32 %v3704_v58, %v3704_v58 }
 0x496   : > { %v1401_v40 = vpop.xlane.xlu0 %1400 }
 0x497   : > { %v1419_v23 = vmul.f32 0.0078125, %v1401_v40  ;;  %1479 = vadd.xlane.f32.xlu1 %v1450_v49 }
 0x498   : > { %v1403_v7 = vpop.xlane.xlu1 %1402 }
 0x499   : > { %v3711_v36 = vsub.f32 %v3633_v12, %v1419_v23  ;;  %v1420_v10 = vmul.f32 0.0078125, %v1403_v7  ;;  %v2362_v12 = vld [vmem:[#allocation10 + $0x60] ss:$8 sps:$4 sm:$0xff]  }
 0x49a   : > { %1798 = vmatpush1.bf16.msra.mxu0 %v2362_v12 }
 0x49b   : > { %v3714_v45 = vsub.f32 %v3637_v26, %v1420_v10  ;;  %v1451_v46 = vmul.f32 %v3711_v36, %v3711_v36  ;;  %v2365_v26 = vld [vmem:[#allocation10 + $0x70] ss:$8 sps:$4 sm:$0xff]   ;;  %1799 = vmatprep.subr.bf16.mxu0 %v2367_v5 }
 0x49d   : > { %1481 = vadd.xlane.f32.xlu0 %v1451_v46  ;;  %v1452_v15 = vmul.f32 %v3714_v45, %v3714_v45 }
 0x49e   : > { %1800 = vmatpush1.bf16.msra.mxu0 %v2365_v26 }
 0x49f   : > { %1483 = vadd.xlane.f32.xlu1 %v1452_v15 }
 0x4e8   : > { %v1454_v11 = vpop.xlane.xlu0 %1453 }
 0x4e9   : > { %v1485_v62 = vmul.f32 0.0078125, %v1454_v11 }
 0x4ea   : > { %v1456_v52 = vpop.xlane.xlu1 %1455 }
 0x4eb   : > { %v1501_v17 = vadd.f32 1e-05, %v1485_v62  ;;  %v1486_v21 = vmul.f32 0.0078125, %v1456_v52 }
 0x4ed   : > { %2464 = vrsqrt.f32 %v1501_v17  ;;  %v1502_v53 = vadd.f32 1e-05, %v1486_v21 }
 0x4ef   : > { %2466 = vrsqrt.f32 %v1502_v53 }
 0x4f4   : > { %v1458_v18 = vpop.xlane.xlu0 %1457 }
 0x4f5   : > { %v1487_v29 = vmul.f32 0.0078125, %v1458_v18 }
 0x4f6   : > { %v1460_v38 = vpop.xlane.xlu1 %1459 }
 0x4f7   : > { %v1503_v2 = vadd.f32 1e-05, %v1487_v29  ;;  %v1488_v27 = vmul.f32 0.0078125, %v1460_v38  ;;  %v2465_v22 = vpop.eup %2464 }
 0x4f8   : > { %v1533_v24 = vmul.f32 %v2465_v22, %v3641_v57 }
 0x4f9   : > { %2468 = vrsqrt.f32 %v1503_v2  ;;  %v1504_v41 = vadd.f32 1e-05, %v1488_v27  ;;  %v2467_v35 = vpop.eup %2466 }
 0x4fa   : > { %v1553_v33 = vmul.f32 %v3722_v32, %v1533_v24  ;;  %v1534_v61 = vmul.f32 %v2467_v35, %v3644_v44 }
 0x4fb   : > { %2470 = vrsqrt.f32 %v1504_v41 }
 0x4fc   : > { %v1573_v6 = vadd.f32 %v3726_v13, %v1553_v33  ;;  %v1554_v42 = vmul.f32 %v3722_v32, %v1534_v61  ;;  %v3945_v33 = vmov 0  }
 0x4fe   : > { %v1605_v37 = vmul.f32 0.70710677, %v1573_v6  ;;  %v1574_v16 = vadd.f32 %v3726_v13, %v1554_v42  ;;  %v1589_v5 = vmul.f32 0.5, %v1573_v6 }
 0x500   : > { %v1606_v47 = vmul.f32 0.70710677, %v1574_v16  ;;  %2472 = verf.f32 %v1605_v37  ;;  %v1590_v26 = vmul.f32 0.5, %v1574_v16 }
 0x502   : > { %v1462_v50 = vpop.xlane.xlu0 %1461  ;;  %2474 = verf.f32 %v1606_v47 }
 0x503   : > { %v2469_v25 = vpop.eup %2468  ;;  %v1489_v57 = vmul.f32 0.0078125, %v1462_v50 }
 0x504   : > { %v1535_v1 = vmul.f32 %v2469_v25, %v3651_v0  ;;  %v1464_v48 = vpop.xlane.xlu1 %1463 }
 0x505   : > { %v2471_v54 = vpop.eup %2470  ;;  %v1505_v30 = vadd.f32 1e-05, %v1489_v57  ;;  %v1490_v44 = vmul.f32 0.0078125, %v1464_v48 }
 0x506   : > { %v1536_v49 = vmul.f32 %v2471_v54, %v3654_v28  ;;  %v1555_v3 = vmul.f32 %v3722_v32, %v1535_v1 }
 0x507   : > { %2476 = vrsqrt.f32 %v1505_v30  ;;  %v1506_v40 = vadd.f32 1e-05, %v1490_v44 }
 0x508   : > { %v1556_v23 = vmul.f32 %v3722_v32, %v1536_v49  ;;  %v1575_v7 = vadd.f32 %v3726_v13, %v1555_v3 }
 0x509   : > { %2478 = vrsqrt.f32 %v1506_v40 }
 0x50a   : > { %v1466_v10 = vpop.xlane.xlu0 %1465  ;;  %v1576_v31 = vadd.f32 %v3726_v13, %v1556_v23  ;;  %v1607_v55 = vmul.f32 0.70710677, %v1575_v7  ;;  %v2473_v0 = vpop.eup %2472  ;;  %v1591_v25 = vmul.f32 0.5, %v1575_v7 }
 0x50b   : > { %v1491_v46 = vmul.f32 0.0078125, %v1466_v10  ;;  %v1637_v15 = vadd.f32 1.0, %v2473_v0 }
 0x50c   : > { %v1468_v9 = vpop.xlane.xlu1 %1467  ;;  %v1608_v63 = vmul.f32 0.70710677, %v1576_v31  ;;  %2480 = verf.f32 %v1607_v55  ;;  %v2475_v28 = vpop.eup %2474  ;;  %v1592_v57 = vmul.f32 0.5, %v1576_v31 }
 0x50d   : > { %v1507_v12 = vadd.f32 1e-05, %v1491_v46  ;;  %v1492_v34 = vmul.f32 0.0078125, %v1468_v9  ;;  %v1638_v11 = vadd.f32 1.0, %v2475_v28  ;;  %v1653_v52 = vmul.f32 %v1637_v15, %v1589_v5 }
 0x50e   : > { %2482 = verf.f32 %v1608_v63 }
 0x50f   : > { %2484 = vrsqrt.f32 %v1507_v12  ;;  %v1508_v62 = vadd.f32 1e-05, %v1492_v34  ;;  %v1654_v17 = vmul.f32 %v1638_v11, %v1590_v26 }
 0x511   : > { %v2477_v21 = vpop.eup %2476  ;;  %2486 = vrsqrt.f32 %v1508_v62  ;;  %v1669_v29 = vpack.c.bf16 %v1654_v17, %v1653_v52 }
 0x512   : > { %v1537_v53 = vmul.f32 %v2477_v21, %v3661_v8  ;;  %v1470_v18 = vpop.xlane.xlu0 %1469 }
 0x513   : > { %v2479_v38 = vpop.eup %2478  ;;  %v1493_v2 = vmul.f32 0.0078125, %v1470_v18  ;;  %1818 = vmatmul.mubr.bf16.vlgmr.msra.gmra.mrb[16].mxu0 %v1669_v29 }
 0x514   : > { %v1538_v27 = vmul.f32 %v2479_v38, %v3664_v60  ;;  %v1472_v22 = vpop.xlane.xlu1 %1471  ;;  %v1557_v24 = vmul.f32 %v3722_v32, %v1537_v53  ;;  %1827 = vmatprep.mubr.bf16.mxu0 %v3945_v33 }
 0x515   : > { %v1509_v41 = vadd.f32 1e-05, %v1493_v2  ;;  %v1494_v35 = vmul.f32 0.0078125, %v1472_v22 }
 0x516   : > { %v2481_v61 = vpop.eup %2480  ;;  %v1558_v6 = vmul.f32 %v3722_v32, %v1538_v27  ;;  %v1577_v42 = vadd.f32 %v3726_v13, %v1557_v24 }
 0x517   : > { %2488 = vrsqrt.f32 %v1509_v41  ;;  %v1510_v8 = vadd.f32 1e-05, %v1494_v35  ;;  %v1639_v37 = vadd.f32 1.0, %v2481_v61 }
 0x518   : > { %v2483_v16 = vpop.eup %2482  ;;  %v1578_v47 = vadd.f32 %v3726_v13, %v1558_v6  ;;  %v1609_v60 = vmul.f32 0.70710677, %v1577_v42  ;;  %v1593_v38 = vmul.f32 0.5, %v1577_v42 }
 0x519   : > { %v2485_v50 = vpop.eup %2484  ;;  %2490 = vrsqrt.f32 %v1510_v8  ;;  %v1640_v1 = vadd.f32 1.0, %v2483_v16  ;;  %v1655_v3 = vmul.f32 %v1639_v37, %v1591_v25 }
 0x51a   : > { %v1539_v48 = vmul.f32 %v2485_v50, %v3671_v56  ;;  %v1474_v54 = vpop.xlane.xlu0 %1473  ;;  %v1610_v30 = vmul.f32 0.70710677, %v1578_v47  ;;  %2492 = verf.f32 %v1609_v60  ;;  %v1594_v22 = vmul.f32 0.5, %v1578_v47 }
 0x51b   : > { %v2487_v44 = vpop.eup %2486  ;;  %v1495_v49 = vmul.f32 0.0078125, %v1474_v54  ;;  %v1656_v40 = vmul.f32 %v1640_v1, %v1592_v57 }
 0x51c   : > { %v1540_v23 = vmul.f32 %v2487_v44, %v3674_v39  ;;  %v1476_v10 = vpop.xlane.xlu1 %1475  ;;  %2494 = verf.f32 %v1610_v30  ;;  %v1559_v55 = vmul.f32 %v3722_v32, %v1539_v48 }
 0x51d   : > { %v1511_v0 = vadd.f32 1e-05, %v1495_v49  ;;  %v1496_v46 = vmul.f32 0.0078125, %v1476_v10  ;;  %v1670_v7 = vpack.c.bf16 %v1656_v40, %v1655_v3 }
 0x51e   : > { %v1560_v31 = vmul.f32 %v3722_v32, %v1540_v23  ;;  %v1579_v56 = vadd.f32 %v3726_v13, %v1559_v55 }
 0x51f   : > { %2496 = vrsqrt.f32 %v1511_v0  ;;  %v1512_v9 = vadd.f32 1e-05, %v1496_v46  ;;  %1828 = vmatmul.mubr.bf16.gmra.mrb[20].mxu0 %v1670_v7 }
 0x520   : > { %1837 = vmatprep.mubr.bf16.mxu0 %v3945_v33  ;;  %v1580_v15 = vadd.f32 %v3726_v13, %v1560_v31  ;;  %v1611_v63 = vmul.f32 0.70710677, %v1579_v56 }
 0x521   : > { %v2489_v39 = vpop.eup %2488  ;;  %2498 = vrsqrt.f32 %v1512_v9 }
 0x522   : > { %v1541_v28 = vmul.f32 %v2489_v39, %v3681_v19  ;;  %v1478_v12 = vpop.xlane.xlu0 %1477  ;;  %v1612_v34 = vmul.f32 0.70710677, %v1580_v15  ;;  %2500 = verf.f32 %v1611_v63  ;;  %v1596_v23 = vmul.f32 0.5, %v1580_v15 }
 0x523   : > { %v2491_v5 = vpop.eup %2490  ;;  %v1497_v26 = vmul.f32 0.0078125, %v1478_v12 }
 0x524   : > { %v2493_v11 = vpop.eup %2492  ;;  %v1542_v62 = vmul.f32 %v2491_v5, %v3684_v20  ;;  %v1480_v52 = vpop.xlane.xlu1 %1479  ;;  %2502 = verf.f32 %v1612_v34  ;;  %v1561_v17 = vmul.f32 %v3722_v32, %v1541_v28 }
 0x525   : > { %v1513_v21 = vadd.f32 1e-05, %v1497_v26  ;;  %v1498_v53 = vmul.f32 0.0078125, %v1480_v52  ;;  %v1641_v18 = vadd.f32 1.0, %v2493_v11 }
 0x526   : > { %v2495_v29 = vpop.eup %2494  ;;  %v1562_v2 = vmul.f32 %v3722_v32, %v1542_v62  ;;  %v1581_v19 = vadd.f32 %v3726_v13, %v1561_v17 }
 0x527   : > { %2504 = vrsqrt.f32 %v1513_v21  ;;  %v1514_v27 = vadd.f32 1e-05, %v1498_v53  ;;  %v1642_v24 = vadd.f32 1.0, %v2495_v29  ;;  %v1657_v61 = vmul.f32 %v1641_v18, %v1593_v38 }
 0x528   : > { %v1582_v41 = vadd.f32 %v3726_v13, %v1562_v2  ;;  %v1613_v20 = vmul.f32 0.70710677, %v1581_v19 }
 0x529   : > { %v2497_v35 = vpop.eup %2496  ;;  %2506 = vrsqrt.f32 %v1514_v27  ;;  %v1658_v6 = vmul.f32 %v1642_v24, %v1594_v22 }
 0x52a   : > { %v1543_v8 = vmul.f32 %v2497_v35, %v3691_v14  ;;  %v1482_v37 = vpop.xlane.xlu0 %1481  ;;  %v1614_v16 = vmul.f32 0.70710677, %v1582_v41  ;;  %2508 = verf.f32 %v1613_v20  ;;  %v1595_v14 = vmul.f32 0.5, %v1579_v56 }
 0x52b   : > { %v2499_v42 = vpop.eup %2498  ;;  %v1499_v60 = vmul.f32 0.0078125, %v1482_v37  ;;  %v1671_v50 = vpack.c.bf16 %v1658_v6, %v1657_v61  ;;  %v1598_v11 = vmul.f32 0.5, %v1582_v41 }
 0x52c   : > { %v2501_v25 = vpop.eup %2500  ;;  %v1544_v57 = vmul.f32 %v2499_v42, %v3694_v59  ;;  %v1484_v47 = vpop.xlane.xlu1 %1483  ;;  %2510 = verf.f32 %v1614_v16  ;;  %v1563_v1 = vmul.f32 %v3722_v32, %v1543_v8 }
 0x52d   : > { %v1515_v48 = vadd.f32 1e-05, %v1499_v60  ;;  %v1500_v54 = vmul.f32 0.0078125, %v1484_v47  ;;  %1838 = vmatmul.mubr.bf16.gmra.mrb[24].mxu0 %v1671_v50  ;;  %v1643_v30 = vadd.f32 1.0, %v2501_v25 }
 0x52e   : > { %v2503_v44 = vpop.eup %2502  ;;  %1847 = vmatprep.mubr.bf16.mxu0 %v3945_v33  ;;  %v1564_v49 = vmul.f32 %v3722_v32, %v1544_v57  ;;  %v1583_v3 = vadd.f32 %v3726_v13, %v1563_v1 }
 0x52f   : > { %2512 = vrsqrt.f32 %v1515_v48  ;;  %v1516_v40 = vadd.f32 1e-05, %v1500_v54  ;;  %v1644_v59 = vadd.f32 1.0, %v2503_v44  ;;  %v1659_v46 = vmul.f32 %v1643_v30, %v1595_v14 }
 0x530   : > { %v1584_v10 = vadd.f32 %v3726_v13, %v1564_v49  ;;  %v1615_v55 = vmul.f32 0.70710677, %v1583_v3 }
 0x531   : > { %v2505_v0 = vpop.eup %2504  ;;  %2514 = vrsqrt.f32 %v1516_v40  ;;  %v1660_v7 = vmul.f32 %v1644_v59, %v1596_v23 }
 0x532   : > { %v1545_v31 = vmul.f32 %v2505_v0, %v3701_v51  ;;  %v1616_v9 = vmul.f32 0.70710677, %v1584_v10  ;;  %2516 = verf.f32 %v1615_v55  ;;  %v1597_v51 = vmul.f32 0.5, %v1581_v19  ;;  %v1693_v55 = vld [vmem:[%s3916_s6] sm:$0x3] }
 0x533   : > { %v2507_v56 = vpop.eup %2506  ;;  %v1672_v63 = vpack.c.bf16 %v1660_v7, %v1659_v46  ;;  %v1600_v61 = vmul.f32 0.5, %v1584_v10  ;;  %v3788_v0 = vrot.slane %v1693_v55, %v3069_v43  ;;  %v3791_v46 = vrot.slane %v1693_v55, %v3372_v4 }
 0x534   : > { %v2509_v39 = vpop.eup %2508  ;;  %v1546_v28 = vmul.f32 %v2507_v56, %v3704_v58  ;;  %2518 = verf.f32 %v1616_v9  ;;  %v1565_v15 = vmul.f32 %v3722_v32, %v1545_v31 }
 0x535   : > { %1848 = vmatmul.mubr.bf16.gmra.mrb[28].mxu0 %v1672_v63  ;;  %v1645_v12 = vadd.f32 1.0, %v2509_v39 }
 0x536   : > { %v2511_v34 = vpop.eup %2510  ;;  %1857 = vmatprep.mubr.bf16.mxu0 %v3945_v33  ;;  %v1566_v5 = vmul.f32 %v3722_v32, %v1546_v28  ;;  %v1585_v26 = vadd.f32 %v3726_v13, %v1565_v15 }
 0x537   : > { %v1646_v62 = vadd.f32 1.0, %v2511_v34  ;;  %v1661_v58 = vmul.f32 %v1645_v12, %v1597_v51 }
 0x538   : > { %v1586_v52 = vadd.f32 %v3726_v13, %v1566_v5  ;;  %v1617_v17 = vmul.f32 0.70710677, %v1585_v26 }
 0x539   : > { %v2513_v21 = vpop.eup %2512  ;;  %v1662_v53 = vmul.f32 %v1646_v62, %v1598_v11 }
 0x53a   : > { %v1547_v18 = vmul.f32 %v2513_v21, %v3711_v36  ;;  %v1618_v29 = vmul.f32 0.70710677, %v1586_v52  ;;  %2520 = verf.f32 %v1617_v17  ;;  %v1599_v36 = vmul.f32 0.5, %v1583_v3 }
 0x53b   : > { %v2515_v38 = vpop.eup %2514  ;;  %v1673_v2 = vpack.c.bf16 %v1662_v53, %v1661_v58  ;;  %v1602_v47 = vmul.f32 0.5, %v1586_v52 }
 0x53c   : > { %v2517_v27 = vpop.eup %2516  ;;  %v1548_v22 = vmul.f32 %v2515_v38, %v3714_v45  ;;  %2522 = verf.f32 %v1618_v29  ;;  %v1567_v19 = vmul.f32 %v3722_v32, %v1547_v18 }
 0x53d   : > { %1858 = vmatmul.mubr.bf16.gmra.mrb[32].mxu0 %v1673_v2  ;;  %v1647_v24 = vadd.f32 1.0, %v2517_v27 }
 0x53e   : > { %v2519_v41 = vpop.eup %2518  ;;  %1867 = vmatprep.mubr.bf16.mxu0 %v3945_v33  ;;  %v1568_v20 = vmul.f32 %v3722_v32, %v1548_v22  ;;  %v1587_v35 = vadd.f32 %v3726_v13, %v1567_v19  ;;  %v1601_v32 = vmul.f32 0.5, %v1585_v26 }
 0x53f   : > { %v1648_v6 = vadd.f32 1.0, %v2519_v41  ;;  %v1663_v16 = vmul.f32 %v1647_v24, %v1599_v36 }
 0x540   : > { %v1588_v8 = vadd.f32 %v3726_v13, %v1568_v20  ;;  %v1619_v37 = vmul.f32 0.70710677, %v1587_v35  ;;  %v1603_v49 = vmul.f32 0.5, %v1587_v35 }
 0x541   : > { %v1664_v45 = vmul.f32 %v1648_v6, %v1600_v61 }
 0x542   : > { %v1620_v42 = vmul.f32 0.70710677, %v1588_v8  ;;  %2524 = verf.f32 %v1619_v37  ;;  %v1604_v3 = vmul.f32 0.5, %v1588_v8 }
 0x543   : > { %v1674_v60 = vpack.c.bf16 %v1664_v45, %v1663_v16 }
 0x544   : > { %v2521_v50 = vpop.eup %2520  ;;  %2526 = verf.f32 %v1620_v42 }
 0x545   : > { %1868 = vmatmul.mubr.bf16.gmra.mrb[36].mxu0 %v1674_v60  ;;  %v1649_v25 = vadd.f32 1.0, %v2521_v50 }
 0x546   : > { %v2523_v57 = vpop.eup %2522  ;;  %1877 = vmatprep.mubr.bf16.mxu0 %v3945_v33 }
 0x547   : > { %v1650_v1 = vadd.f32 1.0, %v2523_v57  ;;  %v1665_v48 = vmul.f32 %v1649_v25, %v1601_v32 }
 0x549   : > { %v1666_v54 = vmul.f32 %v1650_v1, %v1602_v47 }
 0x54b   : > { %v1675_v13 = vpack.c.bf16 %v1666_v54, %v1665_v48 }
 0x54c   : > { %v2525_v30 = vpop.eup %2524 }
 0x54d   : > { %1878 = vmatmul.mubr.bf16.gmra.mrb[40].mxu0 %v1675_v13  ;;  %v1651_v44 = vadd.f32 1.0, %v2525_v30 }
 0x54e   : > { %v2527_v14 = vpop.eup %2526  ;;  %1887 = vmatprep.mubr.bf16.mxu0 %v3945_v33 }
 0x54f   : > { %v1652_v40 = vadd.f32 1.0, %v2527_v14  ;;  %v1667_v23 = vmul.f32 %v1651_v44, %v1603_v49 }
 0x551   : > { %v1668_v59 = vmul.f32 %v1652_v40, %v1604_v3 }
 0x553   : > { %v1676_v10 = vpack.c.bf16 %v1668_v59, %v1667_v23 }
 0x555   : > { %1888 = vmatmul.mubr.bf16.gmra.mrb[44].mxu0 %v1676_v10 }
 0x5e6   : > { %v1819_v7 = vpop.f32.mrb[16].mxu0 }
 0x5e7   : > { %v1820_v33 = vadd.f32 %v1819_v7, %v3788_v0  ;;  %v1821_v31 = vpop.f32.mrb[17].mxu0 }
 0x5e8   : > { %v1822_v9 = vadd.f32 %v1821_v31, %v3791_v46  ;;  %v1823_v56 = vpop.f32.mrb[18].mxu0 }
 0x5e9   : > { %1898 = vst [vmem:[%s3795_s13] sm:$0xff] %v1820_v33  ;;  %v1824_v43 = vadd.f32 %v1823_v56, %v3788_v0  ;;  %v1825_v4 = vpop.f32.mrb[19].mxu0 }
 0x5ea   : > { %1899 = vst [vmem:[%s3795_s13 + $0x8] sm:$0xff] %v1822_v9  ;;  %v1826_v63 = vadd.f32 %v1825_v4, %v3791_v46 }
 0x5eb   : > { %1900 = vst [vmem:[%s3795_s13 + $0x10] sm:$0xff] %v1824_v43 }
 0x5ec   : > { %1901 = vst [vmem:[%s3795_s13 + $0x18] sm:$0xff] %v1826_v63 }
 0x5f2   : > { %v1829_v39 = vpop.f32.mrb[20].mxu0 }
 0x5f3   : > { %v1830_v28 = vadd.f32 %v1829_v39, %v3788_v0  ;;  %v1831_v15 = vpop.f32.mrb[21].mxu0 }
 0x5f4   : > { %v1832_v12 = vadd.f32 %v1831_v15, %v3791_v46  ;;  %v1833_v34 = vpop.f32.mrb[22].mxu0 }
 0x5f5   : > { %1902 = vst [vmem:[%s3795_s13 + $0x20] sm:$0xff] %v1830_v28  ;;  %v1834_v5 = vadd.f32 %v1833_v34, %v3788_v0  ;;  %v1835_v26 = vpop.f32.mrb[23].mxu0 }
 0x5f6   : > { %1903 = vst [vmem:[%s3795_s13 + $0x28] sm:$0xff] %v1832_v12  ;;  %v1836_v51 = vadd.f32 %v1835_v26, %v3791_v46 }
 0x5f7   : > { %1904 = vst [vmem:[%s3795_s13 + $0x30] sm:$0xff] %v1834_v5 }
 0x5f8   : > { %1905 = vst [vmem:[%s3795_s13 + $0x38] sm:$0xff] %v1836_v51 }
 0x600   : > { %v1839_v11 = vpop.f32.mrb[24].mxu0 }
 0x601   : > { %v1840_v62 = vadd.f32 %v1839_v11, %v3788_v0  ;;  %v1841_v52 = vpop.f32.mrb[25].mxu0 }
 0x602   : > { %v1842_v17 = vadd.f32 %v1841_v52, %v3791_v46  ;;  %v1843_v21 = vpop.f32.mrb[26].mxu0 }
 0x603   : > { %1906 = vst [vmem:[%s3795_s13 + $0x40] sm:$0xff] %v1840_v62  ;;  %v1844_v58 = vadd.f32 %v1843_v21, %v3788_v0  ;;  %v1845_v53 = vpop.f32.mrb[27].mxu0 }
 0x604   : > { %1907 = vst [vmem:[%s3795_s13 + $0x48] sm:$0xff] %v1842_v17  ;;  %v1846_v18 = vadd.f32 %v1845_v53, %v3791_v46 }
 0x605   : > { %1908 = vst [vmem:[%s3795_s13 + $0x50] sm:$0xff] %v1844_v58 }
 0x606   : > { %1909 = vst [vmem:[%s3795_s13 + $0x58] sm:$0xff] %v1846_v18 }
 0x608   : > { %v1849_v29 = vpop.f32.mrb[28].mxu0 }
 0x609   : > { %v1850_v38 = vadd.f32 %v1849_v29, %v3788_v0  ;;  %v1851_v2 = vpop.f32.mrb[29].mxu0 }
 0x60a   : > { %v1852_v27 = vadd.f32 %v1851_v2, %v3791_v46  ;;  %v1853_v22 = vpop.f32.mrb[30].mxu0 }
 0x60b   : > { %1910 = vst [vmem:[%s3795_s13 + $0x60] sm:$0xff] %v1850_v38  ;;  %v1854_v19 = vadd.f32 %v1853_v22, %v3788_v0  ;;  %v1855_v24 = vpop.f32.mrb[31].mxu0 }
 0x60c   : > { %1911 = vst [vmem:[%s3795_s13 + $0x68] sm:$0xff] %v1852_v27  ;;  %v1856_v41 = vadd.f32 %v1855_v24, %v3791_v46 }
 0x60d   : > { %1912 = vst [vmem:[%s3795_s13 + $0x70] sm:$0xff] %v1854_v19 }
 0x60e   : > { %1913 = vst [vmem:[%s3795_s13 + $0x78] sm:$0xff] %v1856_v41 }
 0x610   : > { %v1859_v20 = vpop.f32.mrb[32].mxu0 }
 0x611   : > { %v1860_v35 = vadd.f32 %v1859_v20, %v3788_v0  ;;  %v1861_v36 = vpop.f32.mrb[33].mxu0 }
 0x612   : > { %v1862_v61 = vadd.f32 %v1861_v36, %v3791_v46  ;;  %v1863_v6 = vpop.f32.mrb[34].mxu0 }
 0x613   : > { %1914 = vst [vmem:[%s3795_s13 + $0x80] sm:$0xff] %v1860_v35  ;;  %v1864_v8 = vadd.f32 %v1863_v6, %v3788_v0  ;;  %v1865_v37 = vpop.f32.mrb[35].mxu0 }
 0x614   : > { %1915 = vst [vmem:[%s3795_s13 + $0x88] sm:$0xff] %v1862_v61  ;;  %v1866_v16 = vadd.f32 %v1865_v37, %v3791_v46 }
 0x615   : > { %1916 = vst [vmem:[%s3795_s13 + $0x90] sm:$0xff] %v1864_v8 }
 0x616   : > { %1917 = vst [vmem:[%s3795_s13 + $0x98] sm:$0xff] %v1866_v16 }
 0x618   : > { %v1869_v45 = vpop.f32.mrb[36].mxu0 }
 0x619   : > { %v1870_v42 = vadd.f32 %v1869_v45, %v3788_v0  ;;  %v1871_v60 = vpop.f32.mrb[37].mxu0 }
 0x61a   : > { %v1872_v50 = vadd.f32 %v1871_v60, %v3791_v46  ;;  %v1873_v25 = vpop.f32.mrb[38].mxu0 }
 0x61b   : > { %1918 = vst [vmem:[%s3795_s13 + $0xa0] sm:$0xff] %v1870_v42  ;;  %v1874_v57 = vadd.f32 %v1873_v25, %v3788_v0  ;;  %v1875_v32 = vpop.f32.mrb[39].mxu0 }
 0x61c   : > { %1919 = vst [vmem:[%s3795_s13 + $0xa8] sm:$0xff] %v1872_v50  ;;  %v1876_v47 = vadd.f32 %v1875_v32, %v3791_v46 }
 0x61d   : > { %1920 = vst [vmem:[%s3795_s13 + $0xb0] sm:$0xff] %v1874_v57 }
 0x61e   : > { %1921 = vst [vmem:[%s3795_s13 + $0xb8] sm:$0xff] %v1876_v47 }
 0x620   : > { %v1879_v1 = vpop.f32.mrb[40].mxu0 }
 0x621   : > { %v1880_v48 = vadd.f32 %v1879_v1, %v3788_v0  ;;  %v1881_v54 = vpop.f32.mrb[41].mxu0 }
 0x622   : > { %v1882_v13 = vadd.f32 %v1881_v54, %v3791_v46  ;;  %v1883_v30 = vpop.f32.mrb[42].mxu0 }
 0x623   : > { %1922 = vst [vmem:[%s3795_s13 + $0xc0] sm:$0xff] %v1880_v48  ;;  %v1884_v44 = vadd.f32 %v1883_v30, %v3788_v0  ;;  %v1885_v14 = vpop.f32.mrb[43].mxu0 }
 0x624   : > { %1923 = vst [vmem:[%s3795_s13 + $0xc8] sm:$0xff] %v1882_v13  ;;  %v1886_v49 = vadd.f32 %v1885_v14, %v3791_v46 }
 0x625   : > { %1924 = vst [vmem:[%s3795_s13 + $0xd0] sm:$0xff] %v1884_v44 }
 0x626   : > { %1925 = vst [vmem:[%s3795_s13 + $0xd8] sm:$0xff] %v1886_v49 }
 0x628   : > { %v1889_v3 = vpop.f32.mrb[44].mxu0 }
 0x629   : > { %v1890_v40 = vadd.f32 %v1889_v3, %v3788_v0  ;;  %v1891_v23 = vpop.f32.mrb[45].mxu0 }
 0x62a   : > { %v1892_v59 = vadd.f32 %v1891_v23, %v3791_v46  ;;  %v1893_v10 = vpop.f32.mrb[46].mxu0 }
 0x62b   : > { %1926 = vst [vmem:[%s3795_s13 + $0xe0] sm:$0xff] %v1890_v40  ;;  %v1894_v55 = vadd.f32 %v1893_v10, %v3788_v0  ;;  %v1895_v7 = vpop.f32.mrb[47].mxu0 }
 0x62c   : > { %1927 = vst [vmem:[%s3795_s13 + $0xe8] sm:$0xff] %v1892_v59  ;;  %v1896_v33 = vadd.f32 %v1895_v7, %v3791_v46 }
 0x62d   : > { %1928 = vst [vmem:[%s3795_s13 + $0xf0] sm:$0xff] %v1894_v55 }
 0x62e   : > { %1929 = vst [vmem:[%s3795_s13 + $0xf8] sm:$0xff] %v1896_v33 }
 0x62f   : > { %2683 = shalt.err (!%p2680_p13)
}
 0x630   : > { %s2684_s9 = scalar_lea.hbm %s3860_s23, 4096  ;;  %s2688_s11 = scalar_lea.hbm %s3917_s7, 8192 }
 0x631   : > { %p2685_p9 = scmp.ne.s32.totalorder %s3860_s23, %s2684_s9  ;;  %p2689_p6 = scmp.lt.u32.totalorder %s3860_s23, %s3917_s7 }
 0x632   : > { %p2690_p10 = scmp.lt.u32.totalorder %s2688_s11, %s2684_s9  ;;  %p2692_p4 = scmp.lt.u32.totalorder %s2684_s9, %s3860_s23 }
 0x633   : > { %p2686_p0 = pnand %p2685_p9, %p2971_p8 }
 0x634   : > { %p2691_p3 = por %p2690_p10, %p2689_p6 }
 0x635   : > { %p2687_p11 = pneg %p2686_p0 }
 0x636   : > { %p2693_p5 = por %p2692_p4, %p2691_p3 }
 0x638   : > { %p2694_p7 = pnand %p2693_p5, %p2687_p11 }
 0x63a   : > { %2697 = shalt.err (!%p2694_p7)
}
 0x63b   : > { %s2757_s18 = smov 256   ;;  %s2758_s22 = smov 16  }
 0x63c   : > { %2228 = dma.vmem_to_hbm [thread:$0]  (%p2971_p8), %s3862_s20, 4096, %s3860_s23, %s1931_s28, %s2757_s18, %s2757_s18, %s2758_s22  }
 0x63d PF: > { %s1960_s21 = sand.u32 1, %s2732_s24   ;;  %p3946_p12 = scmp.ne.s32.totalorder %s3929_s8, 0 }
 0x63e   : > { %p3947_p1 = scmp.ge.s32.totalorder %s2744_s27, 2  ;;  %s1961_s19 = scalar_lea.sflag [#allocation4], %s1960_s21 }
 0x640   : > { %p2248_p2 = pnand %p3947_p1, %p3946_p12 }
 0x642   : > { %2727 = dma.done.wait (!%p2248_p2), %s1961_s19, 4096  }
 0x643   : > { %2729 = vsyncadd (!%p2248_p2), %s1961_s19, 4294963200  ;;  %p22_p13 = scmp.ge.s32.totalorder %s2958_s12, 4   ;;  %s3948_s24 = smov %s2736_s25 }
 0x644   : > { %s3949_s25 = smov %s2740_s26  ;;  %s3950_s26 = smov %s2967_s29 }
 0x645   : > { %s3951_s27 = smov %s2958_s12  ;;  %24 = sbr.rel (!%p22_p13) target bundleno = 9 (0x9), region = 109 }
 0x64c   :  { %1966 = vsyncpa [#allocation3], 1 }
 0x64d   :  { %1968 = vsyncpa [#allocation3 + $0x1], 1 }
 0x64e   :  { %1969 = vsyncpa [#allocation6], 1 }
 0x64f   :  { %1970 = vsyncpa [#allocation9], 1 }
 0x650   :  { %1971 = vsyncpa [#allocation4], 1 }
 0x651   :  { %1973 = vsyncpa [#allocation4 + $0x1], 1 }

// kernel: tpu_custom_call.1
= control target key start
LH: loop header
LB: loop body
LE: loop exit
PB: predicated region body
PF: predicated region fallthrough
CT: control target
= control target key end

     0   :  { %s3910_s0 = inlined_call_operand.hbm [shape: f32[256,128], index: 0, kind: input, shape index: {}]   ;;  %s3911_s1 = inlined_call_operand.hbm [shape: bf16[128,256], index: 1, kind: input, shape index: {}]   ;;  %s3912_s2 = inlined_call_operand.hbm [shape: f32[3,256], index: 2, kind: input, shape index: {}]   ;;  %s3913_s3 = inlined_call_operand.hbm [shape: bf16[256,128], index: 3, kind: input, shape index: {}]   ;;  %s3914_s4 = inlined_call_operand.vmem [shape: f32[3,128], index: 4, kind: input, shape index: {}]   ;;  %s3915_s5 = inlined_call_operand.hbm [shape: bf16[128,256], index: 5, kind: input, shape index: {}]   ;;  %s3916_s6 = inlined_call_operand.vmem [shape: f32[1,256], index: 6, kind: input, shape index: {}]   ;;  %s3917_s7 = inlined_call_operand.hbm [shape: f32[256,256], index: 7, kind: output, shape index: {}]  }
   0x1   :  { %3927 = sst [smem:[#allocation16_spill]] %s3911_s1 }
   0x2   :  { %12 = vsyncpa [#allocation3], 0 }
   0x3   :  { %14 = vsyncpa [#allocation3 + $0x1], 0 }
   0x4   :  { %15 = vsyncpa [#allocation6], 0 }
   0x5   :  { %16 = vsyncpa [#allocation9], 0 }
   0x6   :  { %17 = vsyncpa [#allocation4], 0 }
   0x7   :  { %19 = vsyncpa [#allocation4 + $0x1], 0  ;;  %s2799_s24 = smov 0   ;;  %s2801_s25 = smov 0  }
   0x8   :  { %s2803_s26 = smov 0   ;;  %s2805_s27 = smov 0  }
   0x9 LB: > { %s2820_s28 = sadd.s32 4294967295, %s2744_s27   ;;  %s2056_s29 = sadd.s32 4294967294, %s2744_s27   ;;  %s2744_s27 = sphi %s2805_s27, %s3951_s27   ;;  %s2740_s26 = sphi %s2803_s26, %s3950_s26   ;;  %s2736_s25 = sphi %s2801_s25, %s3949_s25   ;;  %s2732_s24 = sphi %s2799_s24, %s3948_s24  }
   0xa   : > { %p45_p0 = scmp.ne.s32.totalorder %s2736_s25, %s2732_s24  ;;  %p3918_p1 = scmp.eq.s32.totalorder %s2820_s28, 0 }
   0xb   : > { %p201_p3 = scmp.eq.s32.totalorder %s2056_s29, 1  ;;  %p2057_p5 = scmp.ge.s32.totalorder %s2744_s27, 1 }
   0xc   : > { %p2829_p4 = por %p3918_p1, %p45_p0  ;;  %p208_p7 = scmp.lt.s32.totalorder %s2744_s27, 3 }
   0xd   : > { %p2834_p6 = por %p201_p3, %p45_p0  ;;  %s2746_s10 = smov [#allocation5]  }
   0xe   : > { %s3928_s30 = scalar_select %p2829_p4, 1, 0 }
   0xf   : > { %s3929_s8 = scalar_select %p2834_p6, 1, 0 }
  0x10   : > { %p2839_p8 = pnand %p2057_p5, %p208_p7  ;;  %s220_s11 = sshll.u32 %s2746_s10, 4  ;;  %s2843_s11 = int_to_ptr.vmem [resolvable:$true] %s220_s11 }
  0x11   : > { %s2747_s13 = smov [#allocation8]   ;;  %s3932_s1 = sld [smem:[#allocation16_spill]] }
  0x12   : > { %s3930_s9 = scalar_select %p2839_p8, 1, 0 }
  0x13   : > { %p2230_p9 = pneg %p2839_p8  ;;  %s244_s14 = sshll.u32 %s2747_s13, 4  ;;  %s2854_s14 = int_to_ptr.vmem [resolvable:$true] %s244_s14 }
  0x15   : > { %p2850_p11 = pnand %p2230_p9, %p3918_p1 }
  0x17   : > { %s2528_s17 = scalar_lea.hbm %s3932_s1, 2048  ;;  %p2864_p13 = pneg %p2850_p11 }
  0x18   : > { %p2529_p12 = scmp.ne.s32.totalorder %s3932_s1, %s2528_s17  ;;  %p2535_p5 = scmp.lt.u32.totalorder %s2528_s17, %s3932_s1 }
  0x1a   : > { %p2531_p0 = pnand %p2864_p13, %p2529_p12 }
  0x1c   : > { %p2532_p3 = pneg %p2531_p0 }
  0x1e   : > { %p2537_p7 = pnand %p2535_p5, %p2532_p3 }
  0x20   : > { %2540 = shalt.err (!%p2537_p7)
}
  0x21   : > { %s2541_s23 = scalar_lea.vmem %s2843_s11, 2048  ;;  %p2549_p2 = scmp.lt.s32.totalorder %s2843_s11, %s2843_s11 }
  0x22   : > { %p2542_p9 = scmp.ne.s32.totalorder %s2843_s11, %s2541_s23  ;;  %p2550_p6 = scmp.lt.s32.totalorder %s2541_s23, %s2541_s23 }
  0x24   : > { %p2544_p10 = pnand %p2542_p9, %p2864_p13  ;;  %p2551_p12 = por %p2550_p6, %p2549_p2 }
  0x26   : > { %p2545_p1 = pneg %p2544_p10 }
  0x28   : > { %p2552_p0 = pnand %p2551_p12, %p2545_p1 }
  0x2a   : > { %2555 = shalt.err (!%p2552_p0)
}
  0x2b   : > { %s3919_s29 = smov 128   ;;  %s3921_s10 = smov 8  }
  0x2c   : > { %2233 = dma.hbm_to_vmem [thread:$0]  (!%p2850_p11), %s3932_s1, 2048, %s2843_s11, [#allocation6], %s3919_s29, %s3919_s29, %s3921_s10  }
  0x2d   : > { %s2556_s18 = scalar_lea.hbm %s3913_s3, 2048 }
  0x2e   : > { %p2557_p1 = scmp.ne.s32.totalorder %s3913_s3, %s2556_s18  ;;  %p2563_p10 = scmp.lt.u32.totalorder %s2556_s18, %s3913_s3 }
  0x30   : > { %p2559_p2 = pnand %p2557_p1, %p2864_p13 }
  0x32   : > { %p2560_p6 = pneg %p2559_p2 }
  0x34   : > { %p2565_p3 = pnand %p2563_p10, %p2560_p6 }
  0x36   : > { %2568 = shalt.err (!%p2565_p3)
}
  0x37   : > { %s2569_s11 = scalar_lea.vmem %s2854_s14, 2048  ;;  %p2577_p12 = scmp.lt.s32.totalorder %s2854_s14, %s2854_s14 }
  0x38   : > { %p2570_p5 = scmp.ne.s32.totalorder %s2854_s14, %s2569_s11  ;;  %p2578_p0 = scmp.lt.s32.totalorder %s2569_s11, %s2569_s11 }
  0x3a   : > { %p2572_p7 = pnand %p2570_p5, %p2864_p13  ;;  %p2579_p1 = por %p2578_p0, %p2577_p12 }
  0x3c   : > { %p2573_p9 = pneg %p2572_p7 }
  0x3e   : > { %p2580_p2 = pnand %p2579_p1, %p2573_p9 }
  0x40   : > { %2583 = shalt.err (!%p2580_p2)
}
  0x41   : > { %s2750_s13 = smov 64   ;;  %s2751_s15 = smov 4  }
  0x42   : > { %2239 = dma.hbm_to_vmem [thread:$0]  (!%p2850_p11), %s3913_s3, 2048, %s2854_s14, [#allocation9], %s2750_s13, %s2750_s13, %s2751_s15  }
  0x43   : > { %s2752_s18 = smov [#allocation7]   ;;  %s2753_s21 = smov [#allocation10]  }
  0x44   : > { %s234_s19 = sshll.u32 %s2752_s18, 4  ;;  %s260_s22 = sshll.u32 %s2753_s21, 4  ;;  %s235_s19 = int_to_ptr.vmem [resolvable:$true] %s234_s19  ;;  %s2911_s22 = int_to_ptr.vmem [resolvable:$true] %s260_s22 }
  0x45   : > { %s2584_s29 = scalar_lea.hbm %s3912_s2, 128 }
  0x46   : > { %p2585_p6 = scmp.ne.s32.totalorder %s3912_s2, %s2584_s29  ;;  %p2591_p5 = scmp.lt.u32.totalorder %s2584_s29, %s3912_s2 }
  0x48   : > { %p2587_p10 = pnand %p2585_p6, %p2864_p13 }
  0x4a   : > { %p2588_p3 = pneg %p2587_p10 }
  0x4c   : > { %p2593_p7 = pnand %p2591_p5, %p2588_p3 }
  0x4e   : > { %2596 = shalt.err (!%p2593_p7)
}
  0x4f   : > { %s2597_s13 = scalar_lea.vmem %s235_s19, 128  ;;  %p2605_p1 = scmp.lt.s32.totalorder %s235_s19, %s235_s19 }
  0x50   : > { %p2598_p9 = scmp.ne.s32.totalorder %s235_s19, %s2597_s13  ;;  %p2606_p2 = scmp.lt.s32.totalorder %s2597_s13, %s2597_s13 }
  0x52   : > { %p2600_p12 = pnand %p2598_p9, %p2864_p13  ;;  %p2607_p4 = por %p2606_p2, %p2605_p1 }
  0x54   : > { %p2601_p0 = pneg %p2600_p12 }
  0x56   : > { %p2608_p8 = pnand %p2607_p4, %p2601_p0 }
  0x58   : > { %2611 = shalt.err (!%p2608_p8)
}
  0x59   : > { %2236 = dma.hbm_to_vmem [thread:$0]  (!%p2850_p11), %s3912_s2, 128, %s235_s19, [#allocation6]  }
  0x5a   : > { %s2612_s17 = scalar_lea.hbm %s3915_s5, 2048 }
  0x5b   : > { %p2613_p6 = scmp.ne.s32.totalorder %s3915_s5, %s2612_s17  ;;  %p2619_p4 = scmp.lt.u32.totalorder %s2612_s17, %s3915_s5 }
  0x5d   : > { %p2615_p10 = pnand %p2613_p6, %p2864_p13 }
  0x5f   : > { %p2616_p3 = pneg %p2615_p10 }
  0x61   : > { %p2621_p8 = pnand %p2619_p4, %p2616_p3 }
  0x63   : > { %2624 = shalt.err (!%p2621_p8)
}
  0x64   : > { %s2625_s19 = scalar_lea.vmem %s2911_s22, 2048  ;;  %p2633_p12 = scmp.lt.s32.totalorder %s2911_s22, %s2911_s22 }
  0x65   : > { %p2626_p5 = scmp.ne.s32.totalorder %s2911_s22, %s2625_s19  ;;  %p2634_p0 = scmp.lt.s32.totalorder %s2625_s19, %s2625_s19 }
  0x67   : > { %p2628_p7 = pnand %p2626_p5, %p2864_p13  ;;  %p2635_p1 = por %p2634_p0, %p2633_p12 }
  0x69   : > { %p2629_p9 = pneg %p2628_p7 }
  0x6b   : > { %p2636_p2 = pnand %p2635_p1, %p2629_p9 }
  0x6d   : > { %2639 = shalt.err (!%p2636_p2)
}
  0x6e   : > { %s3934_s16 = smov 8   ;;  %s3935_s14 = smov 128  }
  0x6f   : > { %2242 = dma.hbm_to_vmem [thread:$0]  (!%p2850_p11), %s3915_s5, 2048, %s2911_s22, [#allocation9], %s3935_s14, %s3935_s14, %s3934_s16  }
  0x70   : > { %s2958_s12 = sadd.s32 1, %s2744_s27   ;;  %s32_s10 = sadd.s32 1, %s2740_s26 }
  0x71   : > { %s29_s20 = ssub.s32 %s2744_s27, %s2958_s12  ;;  %p39_p6 = scmp.ne.s32.totalorder %s2740_s26, %s2736_s25 }
  0x72   : > { %p30_p13 = scmp.eq.s32.totalorder %s29_s20, 0  ;;  %p40_p10 = scmp.eq.s32.totalorder %s2744_s27, 0 }
  0x73   : > { %p3936_p4 = scmp.eq.s32.totalorder %s2820_s28, 1  ;;  %p2255_p5 = scmp.lt.s32.totalorder %s2744_s27, 2 }
  0x74   : > { %s2967_s29 = scalar_select %p30_p13, %s2740_s26, %s32_s10  }
  0x75   : > { %p41_p3 = por %p40_p10, %p39_p6  ;;  %p2971_p8 = por %p3936_p4, %p39_p6 }
  0x76   : > { %s277_s17 = sand.u32 1, %s2740_s26   ;;  %s2127_s22 = sshll.u32 %s2744_s27, 11 }
  0x77   : > { %s2063_s18 = sshll.u32 %s277_s17, 7  ;;  %s2981_s11 = scalar_lea.hbm %s3910_s0, %s2127_s22 }
  0x78   : > { %s281_s19 = scalar_lea.vmem [#allocation2], %s2063_s18  ;;  %p2985_p11 = pnand %p2255_p5, %p41_p3 }
  0x79   : > { %s288_s13 = sshll.u32 %s281_s19, 4  ;;  %s2989_s20 = scalar_lea.sflag [#allocation3], %s277_s17  ;;  %s2983_s13 = int_to_ptr.vmem [resolvable:$true] %s288_s13 }
  0x7a   : > { %s2640_s10 = scalar_lea.hbm %s2981_s11, 2048  ;;  %p2642_p9 = pneg %p2985_p11 }
  0x7b   : > { %p2641_p7 = scmp.ne.s32.totalorder %s2981_s11, %s2640_s10  ;;  %s2645_s21 = scalar_lea.hbm %s3910_s0, 4096 }
  0x7c   : > { %p2646_p1 = scmp.lt.u32.totalorder %s2981_s11, %s3910_s0  ;;  %p2647_p2 = scmp.lt.u32.totalorder %s2645_s21, %s2640_s10 }
  0x7d   : > { %p2643_p12 = pnand %p2642_p9, %p2641_p7  ;;  %p2649_p6 = scmp.lt.u32.totalorder %s2640_s10, %s2981_s11 }
  0x7e   : > { %p2648_p13 = por %p2647_p2, %p2646_p1 }
  0x7f   : > { %p2644_p0 = pneg %p2643_p12 }
  0x80   : > { %p2650_p10 = por %p2649_p6, %p2648_p13 }
  0x82   : > { %p2651_p3 = pnand %p2650_p10, %p2644_p0 }
  0x84   : > { %2654 = shalt.err (!%p2651_p3)
}
  0x85   : > { %s2655_s17 = scalar_lea.vmem %s2983_s13, 2048  ;;  %s2754_s18 = smov [#allocation2]  }
  0x86   : > { %p2656_p4 = scmp.ne.s32.totalorder %s2983_s13, %s2655_s17  ;;  %s2660_s22 = sshll.u32 %s2754_s18, 4  ;;  %s2661_s22 = int_to_ptr.vmem [resolvable:$false] %s2660_s22 }
  0x87   : > { %s2662_s23 = scalar_lea.vmem %s2661_s22, 4096  ;;  %p2663_p12 = scmp.lt.s32.totalorder %s2983_s13, %s2661_s22 }
  0x88   : > { %p2658_p5 = pnand %p2656_p4, %p2642_p9  ;;  %p2664_p1 = scmp.lt.s32.totalorder %s2662_s23, %s2655_s17 }
  0x8a   : > { %p2659_p7 = pneg %p2658_p5  ;;  %p2665_p2 = por %p2664_p1, %p2663_p12 }
  0x8c   : > { %p2666_p13 = pnand %p2665_p2, %p2659_p7 }
  0x8e   : > { %2669 = shalt.err (!%p2666_p13)
}
  0x8f   : > { %2246 = dma.hbm_to_vmem [thread:$0]  (!%p2985_p11), %s2981_s11, 2048, %s2983_s13, %s2989_s20, %s3935_s14, %s3935_s14, %s3934_s16  }
  0x90   : > { %p3939_p9 = scmp.ne.s32.totalorder %s3930_s9, 0 }
  0x91   : > { %s3023_s10 = sand.u32 (!%p3939_p9), 1, %s2736_s25   ;;  %p3940_p0 = scmp.ne.s32.totalorder (!%p3939_p9), %s3928_s30, 0 }
  0x92   : > { %300 = sbr.rel (%p3939_p9) target bundleno = 1597 (0x63d), region = 48  ;;  %s2067_s21 = sshll.u32 (!%p3939_p9), %s3023_s10, 7 }
  0x93   : > { %s303_s19 = scalar_lea.sflag (!%p3939_p9), [#allocation3], %s3023_s10  ;;  %s3027_s17 = scalar_lea.vmem (!%p3939_p9), [#allocation2], %s2067_s21 }
  0x99   : > { %2715 = dma.done.wait (%p3940_p0), %s303_s19, 2048  }
  0x9a   : > { %2717 = vsyncadd (%p3940_p0), %s303_s19, 4294965248  ;;  %p3941_p11 = scmp.eq.s32.totalorder %s2820_s28, 0 }
  0x9c   : > { %2719 = dma.done.wait (%p3941_p11), [#allocation6], 2176   ;;  %p3942_p6 = pmov %p3941_p11 }
  0x9e   : > { %2721 = vsyncadd (%p3942_p6), [#allocation6], 4294965120  ;;  %p3943_p10 = pmov %p3942_p6 }
  0x9f   : > { %p3944_p3 = pmov %p3942_p6 }
  0xa0   : > { %2723 = dma.done.wait (%p3943_p10), [#allocation9], 4096  }
  0xa1   : > { %2725 = vsyncadd (%p3944_p3), [#allocation9], 4294963200  ;;  %v3925_v0 = vmov 0   ;;  %v2304_v1 = vld [vmem:[#allocation5 + $0x4] ss:$8 sps:$4 sm:$0xff]   ;;  %v358_v23 = vld [vmem:[%s3027_s17 + $0x10] sm:$0xff]  ;;  %v398_v41 = vlaneseq }
  0xa2   : > { %528 = vmatprep.mubr.bf16.mxu0 %v3925_v0  ;;  %568 = vmatprep.mubr.bf16.mxu1 %v3925_v0  ;;  %v2306_v2 = vld [vmem:[#allocation5] ss:$8 sps:$4 sm:$0xff]   ;;  %v2307_v3 = vld [vmem:[#allocation5 + $0x14] ss:$8 sps:$4 sm:$0xff]   ;;  %v2309_v4 = vld [vmem:[#allocation5 + $0x10] ss:$8 sps:$4 sm:$0xff]  }
  0xa3   : > { %496 = vmatprep.subr.bf16.mxu0 %v2304_v1  ;;  %2194 = vmatprep.subr.bf16.mxu1 %v2304_v1  ;;  %v2310_v5 = vld [vmem:[#allocation5 + $0x24] ss:$8 sps:$4 sm:$0xff]   ;;  %v2312_v6 = vld [vmem:[#allocation5 + $0x20] ss:$8 sps:$4 sm:$0xff]   ;;  %v2313_v7 = vld [vmem:[#allocation5 + $0x34] ss:$8 sps:$4 sm:$0xff]  }
  0xa4   : > { %497 = vmatpush1.bf16.msra.mxu0 %v2306_v2  ;;  %2202 = vmatpush1.bf16.msra.mxu1 %v2306_v2  ;;  %v2315_v8 = vld [vmem:[#allocation5 + $0x30] ss:$8 sps:$4 sm:$0xff]   ;;  %v2316_v9 = vld [vmem:[#allocation5 + $0x44] ss:$8 sps:$4 sm:$0xff]   ;;  %v2318_v10 = vld [vmem:[#allocation5 + $0x40] ss:$8 sps:$4 sm:$0xff]  }
  0xa5   : > { %498 = vmatprep.subr.bf16.mxu0 %v2307_v3  ;;  %2195 = vmatprep.subr.bf16.mxu1 %v2307_v3  ;;  %v2319_v11 = vld [vmem:[#allocation5 + $0x54] ss:$8 sps:$4 sm:$0xff]   ;;  %v2321_v12 = vld [vmem:[#allocation5 + $0x50] ss:$8 sps:$4 sm:$0xff]   ;;  %v2322_v13 = vld [vmem:[#allocation5 + $0x64] ss:$8 sps:$4 sm:$0xff]  }
  0xa6   : > { %v2324_v14 = vld [vmem:[#allocation5 + $0x60] ss:$8 sps:$4 sm:$0xff]   ;;  %v2325_v15 = vld [vmem:[#allocation5 + $0x74] ss:$8 sps:$4 sm:$0xff]   ;;  %v2327_v16 = vld [vmem:[#allocation5 + $0x70] ss:$8 sps:$4 sm:$0xff]  }
  0xa7   : > { %v356_v17 = vld [vmem:[%s3027_s17] sm:$0xff]  ;;  %v357_v18 = vld [vmem:[%s3027_s17 + $0x8] sm:$0xff]  ;;  %v359_v24 = vld [vmem:[%s3027_s17 + $0x18] sm:$0xff]  ;;  %v3066_v42 = vshrl.u32 %v398_v41, 7  ;;  %s2072_s11 = sshll.u32 %s3023_s10, 8  ;;  %s2129_s1 = sshll.u32 %s2820_s28, 12 }
  0xa8   : > { %499 = vmatpush1.bf16.msra.mxu0 %v2309_v4  ;;  %2203 = vmatpush1.bf16.msra.mxu1 %v2309_v4  ;;  %v364_v19 = vld [vmem:[%s3027_s17 + $0x40] sm:$0xff]  ;;  %v365_v20 = vld [vmem:[%s3027_s17 + $0x48] sm:$0xff]  ;;  %v372_v21 = vpack.c.bf16 %v357_v18, %v356_v17  ;;  %v366_v25 = vld [vmem:[%s3027_s17 + $0x50] sm:$0xff]  ;;  %v373_v27 = vpack.c.bf16 %v359_v24, %v358_v23  ;;  %s3795_s13 = scalar_lea.vmem [#allocation11], %s2072_s11  ;;  %s3860_s23 = scalar_lea.hbm %s3917_s7, %s2129_s1 }
  0xa9   : > { %500 = vmatprep.subr.bf16.mxu0 %v2310_v5  ;;  %2196 = vmatprep.subr.bf16.mxu1 %v2310_v5  ;;  %v376_v22 = vpack.c.bf16 %v365_v20, %v364_v19  ;;  %v367_v26 = vld [vmem:[%s3027_s17 + $0x58] sm:$0xff]  ;;  %v360_v29 = vld [vmem:[%s3027_s17 + $0x20] sm:$0xff]  ;;  %v361_v30 = vld [vmem:[%s3027_s17 + $0x28] sm:$0xff]  ;;  %v3069_v43 = vsub.s32 0, %v3066_v42  ;;  %v404_v45 = vsub.s32 4, %v3066_v42  ;;  %s1945_s20 = sshll.u32 %s3795_s13, 4  ;;  %s3862_s20 = int_to_ptr.vmem [resolvable:$true] %s1945_s20 }
  0xaa   : > { %v377_v28 = vpack.c.bf16 %v367_v26, %v366_v25  ;;  %v368_v31 = vld [vmem:[%s3027_s17 + $0x60] sm:$0xff]  ;;  %v369_v32 = vld [vmem:[%s3027_s17 + $0x68] sm:$0xff]  ;;  %v374_v33 = vpack.c.bf16 %v361_v30, %v360_v29  ;;  %v362_v35 = vld [vmem:[%s3027_s17 + $0x30] sm:$0xff]  ;;  %s1931_s28 = scalar_lea.sflag [#allocation4], %s3023_s10  ;;  %s2670_s21 = scalar_lea.vmem %s3862_s20, 4096 }
  0xab   : > { %v378_v34 = vpack.c.bf16 %v369_v32, %v368_v31  ;;  %v363_v36 = vld [vmem:[%s3027_s17 + $0x38] sm:$0xff]  ;;  %v370_v37 = vld [vmem:[%s3027_s17 + $0x70] sm:$0xff]  ;;  %v3071_v44 = vld [vmem:[#allocation7] sm:$0x77]  ;;  %p2671_p4 = scmp.ne.s32.totalorder %s3862_s20, %s2670_s21  ;;  %s2756_s19 = smov [#allocation11]  }
  0xac   : > { %501 = vmatpush1.bf16.msra.mxu0 %v2312_v6  ;;  %2204 = vmatpush1.bf16.msra.mxu1 %v2312_v6  ;;  %v371_v38 = vld [vmem:[%s3027_s17 + $0x78] sm:$0xff]  ;;  %v375_v39 = vpack.c.bf16 %v363_v36, %v362_v35  ;;  %v401_v46 = vrot.slane %v3071_v44, %v3069_v43  ;;  %v405_v47 = vrot.slane %v3071_v44, %v404_v45  ;;  %s2674_s17 = sshll.u32 %s2756_s19, 4  ;;  %s2675_s17 = int_to_ptr.vmem [resolvable:$false] %s2674_s17 }
  0xad   : > { %502 = vmatprep.subr.bf16.mxu0 %v2313_v7  ;;  %2197 = vmatprep.subr.bf16.mxu1 %v2313_v7  ;;  %v379_v40 = vpack.c.bf16 %v371_v38, %v370_v37  ;;  %p2672_p5 = pnand %p2671_p4, %p2971_p8  ;;  %s2676_s30 = scalar_lea.vmem %s2675_s17, 8192 }
  0xae   : > { %v3078_v48 = vrot.slane %v401_v46, %v3069_v43  ;;  %v3081_v49 = vrot.slane %v405_v47, %v3069_v43  ;;  %p2677_p12 = scmp.lt.s32.totalorder %s3862_s20, %s2675_s17  ;;  %p2678_p1 = scmp.lt.s32.totalorder %s2676_s30, %s2670_s21 }
  0xaf   : > { %p2673_p7 = pneg %p2672_p5 }
  0xb0   : > { %503 = vmatpush1.bf16.msra.mxu0 %v2315_v8  ;;  %2205 = vmatpush1.bf16.msra.mxu1 %v2315_v8  ;;  %p2679_p2 = por %p2678_p1, %p2677_p12 }
  0xb1   : > { %504 = vmatprep.subr.bf16.mxu0 %v2316_v9  ;;  %2198 = vmatprep.subr.bf16.mxu1 %v2316_v9 }
  0xb2   : > { %p2680_p13 = pnand %p2679_p2, %p2673_p7 }
  0xb4   : > { %505 = vmatpush1.bf16.msra.mxu0 %v2318_v10  ;;  %2206 = vmatpush1.bf16.msra.mxu1 %v2318_v10 }
  0xb5   : > { %506 = vmatprep.subr.bf16.mxu0 %v2319_v11  ;;  %2199 = vmatprep.subr.bf16.mxu1 %v2319_v11 }
  0xb8   : > { %507 = vmatpush1.bf16.msra.mxu0 %v2321_v12  ;;  %2207 = vmatpush1.bf16.msra.mxu1 %v2321_v12 }
  0xb9   : > { %508 = vmatprep.subr.bf16.mxu0 %v2322_v13  ;;  %2200 = vmatprep.subr.bf16.mxu1 %v2322_v13 }
  0xbc   : > { %509 = vmatpush1.bf16.msra.mxu0 %v2324_v14  ;;  %2208 = vmatpush1.bf16.msra.mxu1 %v2324_v14 }
  0xbd   : > { %510 = vmatprep.subr.bf16.mxu0 %v2325_v15  ;;  %2201 = vmatprep.subr.bf16.mxu1 %v2325_v15 }
  0xc0   : > { %511 = vmatpush1.bf16.msra.mxu0 %v2327_v16  ;;  %2209 = vmatpush1.bf16.msra.mxu1 %v2327_v16 }
  0xc3   : > { %529 = vmatmul.mubr.bf16.vlgmr.msra.gmra.mrb[0].mxu0 %v372_v21  ;;  %569 = vmatmul.mubr.bf16.vlgmr.msra.gmra.mrb[0].mxu1 %v376_v22 }
  0xc4   : > { %538 = vmatprep.mubr.bf16.mxu0 %v3925_v0  ;;  %578 = vmatprep.mubr.bf16.mxu1 %v3925_v0 }
  0xcb   : > { %539 = vmatmul.mubr.bf16.gmra.mrb[4].mxu0 %v373_v27  ;;  %579 = vmatmul.mubr.bf16.gmra.mrb[4].mxu1 %v377_v28 }
  0xcc   : > { %548 = vmatprep.mubr.bf16.mxu0 %v3925_v0  ;;  %588 = vmatprep.mubr.bf16.mxu1 %v3925_v0 }
  0xd3   : > { %549 = vmatmul.mubr.bf16.gmra.mrb[8].mxu0 %v374_v33  ;;  %589 = vmatmul.mubr.bf16.gmra.mrb[8].mxu1 %v378_v34 }
  0xd4   : > { %558 = vmatprep.mubr.bf16.mxu0 %v3925_v0  ;;  %598 = vmatprep.mubr.bf16.mxu1 %v3925_v0 }
  0xdb   : > { %559 = vmatmul.mubr.bf16.gmra.mrb[12].mxu0 %v375_v39  ;;  %599 = vmatmul.mubr.bf16.gmra.mrb[12].mxu1 %v379_v40 }
  0xdc   : > { %1817 = vmatprep.mubr.bf16.mxu0 %v3925_v0 }
 0x196   : > { %v530_v50 = vpop.f32.mrb[0].mxu0  ;;  %v570_v51 = vpop.f32.mrb[0].mxu1 }
 0x197   : > { %v3084_v52 = vadd.f32 %v530_v50, %v3078_v48  ;;  %v532_v53 = vpop.f32.mrb[1].mxu0  ;;  %v572_v54 = vpop.f32.mrb[1].mxu1  ;;  %v3138_v36 = vadd.f32 %v570_v51, %v3078_v48 }
 0x198   : > { %v3087_v55 = vadd.f32 %v532_v53, %v3081_v49  ;;  %v534_v56 = vpop.f32.mrb[2].mxu0  ;;  %v574_v57 = vpop.f32.mrb[2].mxu1  ;;  %v3141_v37 = vadd.f32 %v572_v54, %v3081_v49 }
 0x199   : > { %v536_v58 = vpop.f32.mrb[3].mxu0  ;;  %v576_v59 = vpop.f32.mrb[3].mxu1  ;;  %v3090_v60 = vadd.f32 %v534_v56, %v3078_v48  ;;  %v3150_v46 = vadd.f32 %v574_v57, %v3078_v48 }
 0x19a   : > { %v3093_v61 = vadd.f32 %v536_v58, %v3081_v49  ;;  %v609_v62 = vadd.f32 %v3087_v55, %v3084_v52  ;;  %v3155_v50 = vadd.f32 %v576_v59, %v3081_v49  ;;  %v633_v56 = vadd.f32 %v3141_v37, %v3138_v36 }
 0x19c   : > { %610 = vadd.xlane.f32.xlu0 %v609_v62  ;;  %v612_v1 = vadd.f32 %v3093_v61, %v3090_v60  ;;  %v636_v59 = vadd.f32 %v3155_v50, %v3150_v46 }
 0x19e   : > { %v540_v63 = vpop.f32.mrb[4].mxu0  ;;  %v580_v2 = vpop.f32.mrb[4].mxu1 }
 0x19f   : > { %v3100_v3 = vadd.f32 %v540_v63, %v3078_v48  ;;  %v542_v4 = vpop.f32.mrb[5].mxu0  ;;  %v582_v5 = vpop.f32.mrb[5].mxu1  ;;  %v3158_v51 = vadd.f32 %v580_v2, %v3078_v48 }
 0x1a0   : > { %v3103_v6 = vadd.f32 %v542_v4, %v3081_v49  ;;  %v544_v7 = vpop.f32.mrb[6].mxu0  ;;  %613 = vadd.xlane.f32.xlu0 %v612_v1  ;;  %v584_v8 = vpop.f32.mrb[6].mxu1  ;;  %v3163_v54 = vadd.f32 %v582_v5, %v3081_v49 }
 0x1a1   : > { %v546_v9 = vpop.f32.mrb[7].mxu0  ;;  %v586_v10 = vpop.f32.mrb[7].mxu1  ;;  %v3106_v11 = vadd.f32 %v544_v7, %v3078_v48  ;;  %v3168_v57 = vadd.f32 %v584_v8, %v3078_v48 }
 0x1a2   : > { %v3109_v12 = vadd.f32 %v546_v9, %v3081_v49  ;;  %v615_v13 = vadd.f32 %v3103_v6, %v3100_v3  ;;  %v3171_v58 = vadd.f32 %v586_v10, %v3081_v49  ;;  %v639_v1 = vadd.f32 %v3163_v54, %v3158_v51 }
 0x1a4   : > { %616 = vadd.xlane.f32.xlu1 %v615_v13  ;;  %v618_v15 = vadd.f32 %v3109_v12, %v3106_v11  ;;  %v642_v5 = vadd.f32 %v3171_v58, %v3168_v57 }
 0x1a6   : > { %v550_v14 = vpop.f32.mrb[8].mxu0  ;;  %v590_v16 = vpop.f32.mrb[8].mxu1 }
 0x1a7   : > { %v3116_v17 = vadd.f32 %v550_v14, %v3078_v48  ;;  %v552_v18 = vpop.f32.mrb[9].mxu0  ;;  %v592_v19 = vpop.f32.mrb[9].mxu1  ;;  %v3176_v62 = vadd.f32 %v590_v16, %v3078_v48 }
 0x1a8   : > { %v3119_v20 = vadd.f32 %v552_v18, %v3081_v49  ;;  %v554_v21 = vpop.f32.mrb[10].mxu0  ;;  %619 = vadd.xlane.f32.xlu1 %v618_v15  ;;  %v594_v22 = vpop.f32.mrb[10].mxu1  ;;  %v3179_v63 = vadd.f32 %v592_v19, %v3081_v49 }
 0x1a9   : > { %v3122_v23 = vadd.f32 %v554_v21, %v3078_v48  ;;  %v556_v24 = vpop.f32.mrb[11].mxu0  ;;  %v596_v25 = vpop.f32.mrb[11].mxu1  ;;  %v3184_v2 = vadd.f32 %v594_v22, %v3078_v48 }
 0x1aa   : > { %v3125_v26 = vadd.f32 %v556_v24, %v3081_v49  ;;  %v621_v27 = vadd.f32 %v3119_v20, %v3116_v17  ;;  %v3187_v4 = vadd.f32 %v596_v25, %v3081_v49  ;;  %v645_v9 = vadd.f32 %v3179_v63, %v3176_v62 }
 0x1ac   : > { %622 = vadd.xlane.f32.xlu0 %v621_v27  ;;  %v624_v28 = vadd.f32 %v3125_v26, %v3122_v23  ;;  %v648_v14 = vadd.f32 %v3187_v4, %v3184_v2 }
 0x1ae   : > { %v560_v29 = vpop.f32.mrb[12].mxu0  ;;  %625 = vadd.xlane.f32.xlu1 %v624_v28  ;;  %v600_v30 = vpop.f32.mrb[12].mxu1 }
 0x1af   : > { %v3132_v31 = vadd.f32 %v560_v29, %v3078_v48  ;;  %v562_v32 = vpop.f32.mrb[13].mxu0  ;;  %v602_v33 = vpop.f32.mrb[13].mxu1  ;;  %v3192_v7 = vadd.f32 %v600_v30, %v3078_v48 }
 0x1b0   : > { %v3135_v34 = vadd.f32 %v562_v32, %v3081_v49  ;;  %v564_v35 = vpop.f32.mrb[14].mxu0  ;;  %v604_v38 = vpop.f32.mrb[14].mxu1  ;;  %v3195_v8 = vadd.f32 %v602_v33, %v3081_v49 }
 0x1b1   : > { %v3144_v39 = vadd.f32 %v564_v35, %v3078_v48  ;;  %v566_v40 = vpop.f32.mrb[15].mxu0  ;;  %v606_v41 = vpop.f32.mrb[15].mxu1  ;;  %v3200_v10 = vadd.f32 %v604_v38, %v3078_v48 }
 0x1b2   : > { %v3147_v45 = vadd.f32 %v566_v40, %v3081_v49  ;;  %v627_v47 = vadd.f32 %v3135_v34, %v3132_v31  ;;  %v3203_v13 = vadd.f32 %v606_v41, %v3081_v49  ;;  %v651_v15 = vadd.f32 %v3195_v8, %v3192_v7 }
 0x1b4   : > { %628 = vadd.xlane.f32.xlu0 %v627_v47  ;;  %v630_v53 = vadd.f32 %v3147_v45, %v3144_v39  ;;  %v654_v16 = vadd.f32 %v3203_v13, %v3200_v10 }
 0x1b6   : > { %631 = vadd.xlane.f32.xlu1 %v630_v53 }
 0x1b8   : > { %634 = vadd.xlane.f32.xlu0 %v633_v56 }
 0x1ba   : > { %637 = vadd.xlane.f32.xlu1 %v636_v59 }
 0x1bc   : > { %640 = vadd.xlane.f32.xlu0 %v639_v1 }
 0x1be   : > { %643 = vadd.xlane.f32.xlu1 %v642_v5 }
 0x1c0   : > { %646 = vadd.xlane.f32.xlu0 %v645_v9 }
 0x1c2   : > { %649 = vadd.xlane.f32.xlu1 %v648_v14 }
 0x1c4   : > { %652 = vadd.xlane.f32.xlu0 %v651_v15 }
 0x1c6   : > { %655 = vadd.xlane.f32.xlu1 %v654_v16 }
 0x229   : > { %v611_v18 = vpop.xlane.xlu0 %610 }
 0x22a   : > { %v658_v19 = vmul.f32 0.00390625, %v611_v18 }
 0x22c   : > { %v3212_v48 = vsub.f32 %v3084_v52, %v658_v19  ;;  %v3215_v49 = vsub.f32 %v3087_v55, %v658_v19 }
 0x22d   : > { %v614_v21 = vpop.xlane.xlu0 %613 }
 0x22e   : > { %v659_v22 = vmul.f32 0.00390625, %v614_v21  ;;  %v706_v24 = vmul.f32 %v3212_v48, %v3212_v48  ;;  %v707_v25 = vmul.f32 %v3215_v49, %v3215_v49 }
 0x230   : > { %v3222_v27 = vsub.f32 %v3090_v60, %v659_v22  ;;  %v3225_v28 = vsub.f32 %v3093_v61, %v659_v22  ;;  %v738_v29 = vadd.f32 %v707_v25, %v706_v24 }
 0x231   : > { %v617_v52 = vpop.xlane.xlu1 %616 }
 0x232   : > { %v660_v30 = vmul.f32 0.00390625, %v617_v52  ;;  %739 = vadd.xlane.f32.xlu0 %v738_v29  ;;  %v708_v55 = vmul.f32 %v3222_v27, %v3222_v27  ;;  %v709_v32 = vmul.f32 %v3225_v28, %v3225_v28 }
 0x234   : > { %v3232_v33 = vsub.f32 %v3100_v3, %v660_v30  ;;  %v3235_v35 = vsub.f32 %v3103_v6, %v660_v30  ;;  %v741_v60 = vadd.f32 %v709_v32, %v708_v55 }
 0x235   : > { %v620_v38 = vpop.xlane.xlu1 %619 }
 0x236   : > { %v661_v61 = vmul.f32 0.00390625, %v620_v38  ;;  %742 = vadd.xlane.f32.xlu1 %v741_v60  ;;  %v710_v40 = vmul.f32 %v3232_v33, %v3232_v33  ;;  %v711_v41 = vmul.f32 %v3235_v35, %v3235_v35 }
 0x238   : > { %v3242_v47 = vsub.f32 %v3106_v11, %v661_v61  ;;  %v3245_v53 = vsub.f32 %v3109_v12, %v661_v61  ;;  %v744_v3 = vadd.f32 %v711_v41, %v710_v40 }
 0x239   : > { %v623_v56 = vpop.xlane.xlu0 %622 }
 0x23a   : > { %v662_v6 = vmul.f32 0.00390625, %v623_v56  ;;  %745 = vadd.xlane.f32.xlu0 %v744_v3  ;;  %v712_v59 = vmul.f32 %v3242_v47, %v3242_v47  ;;  %v713_v1 = vmul.f32 %v3245_v53, %v3245_v53 }
 0x23b   : > { %v626_v5 = vpop.xlane.xlu1 %625 }
 0x23c   : > { %v3252_v9 = vsub.f32 %v3116_v17, %v662_v6  ;;  %v3255_v11 = vsub.f32 %v3119_v20, %v662_v6  ;;  %v663_v14 = vmul.f32 0.00390625, %v626_v5  ;;  %v747_v12 = vadd.f32 %v713_v1, %v712_v59 }
 0x23e   : > { %v3258_v15 = vsub.f32 %v3122_v23, %v663_v14  ;;  %v3261_v16 = vsub.f32 %v3125_v26, %v663_v14  ;;  %748 = vadd.xlane.f32.xlu1 %v747_v12  ;;  %v714_v18 = vmul.f32 %v3252_v9, %v3252_v9  ;;  %v715_v19 = vmul.f32 %v3255_v11, %v3255_v11 }
 0x240   : > { %v750_v17 = vadd.f32 %v715_v19, %v714_v18  ;;  %v716_v20 = vmul.f32 %v3258_v15, %v3258_v15  ;;  %v717_v21 = vmul.f32 %v3261_v16, %v3261_v16  ;;  %v2328_v19 = vld [vmem:[#allocation8 + $0x40] sm:$0xff]  }
 0x241   : > { %v629_v22 = vpop.xlane.xlu0 %628  ;;  %2130 = vmatprep.subr.bf16.mxu1 %v2328_v19 }
 0x242   : > { %v664_v23 = vmul.f32 0.00390625, %v629_v22  ;;  %751 = vadd.xlane.f32.xlu0 %v750_v17  ;;  %v753_v24 = vadd.f32 %v717_v21, %v716_v20  ;;  %v2329_v22 = vld [vmem:[#allocation8] sm:$0xff]  }
 0x243   : > { %v632_v26 = vpop.xlane.xlu1 %631  ;;  %2131 = vmatpush3.bf16.msra.mxu1 %v2329_v22 }
 0x244   : > { %v3272_v25 = vsub.f32 %v3132_v31, %v664_v23  ;;  %v3275_v29 = vsub.f32 %v3135_v34, %v664_v23  ;;  %v665_v52 = vmul.f32 0.00390625, %v632_v26  ;;  %754 = vadd.xlane.f32.xlu1 %v753_v24 }
 0x245   : > { %v635_v30 = vpop.xlane.xlu0 %634 }
 0x246   : > { %v3278_v55 = vsub.f32 %v3144_v39, %v665_v52  ;;  %v3281_v32 = vsub.f32 %v3147_v45, %v665_v52  ;;  %v666_v60 = vmul.f32 0.00390625, %v635_v30  ;;  %v718_v38 = vmul.f32 %v3272_v25, %v3272_v25 }
 0x247   : > { %v638_v61 = vpop.xlane.xlu1 %637  ;;  %v719_v31 = vmul.f32 %v3275_v29, %v3275_v29 }
 0x248   : > { %v3288_v34 = vsub.f32 %v3138_v36, %v666_v60  ;;  %v3291_v40 = vsub.f32 %v3141_v37, %v666_v60  ;;  %v667_v41 = vmul.f32 0.00390625, %v638_v61  ;;  %v720_v39 = vmul.f32 %v3278_v55, %v3278_v55  ;;  %v2330_v61 = vld [vmem:[#allocation8 + $0x48] sm:$0xff]  }
 0x249   : > { %v641_v45 = vpop.xlane.xlu0 %640  ;;  %v756_v3 = vadd.f32 %v719_v31, %v718_v38  ;;  %v721_v56 = vmul.f32 %v3281_v32, %v3281_v32  ;;  %2132 = vmatprep.subr.bf16.mxu1 %v2330_v61  ;;  %v2339_v61 = vld [vmem:[#allocation8 + $0x28] sm:$0xff]  }
 0x24a   : > { %v3298_v6 = vsub.f32 %v3150_v46, %v667_v41  ;;  %v3301_v59 = vsub.f32 %v3155_v50, %v667_v41  ;;  %v668_v36 = vmul.f32 0.00390625, %v641_v45  ;;  %v722_v37 = vmul.f32 %v3288_v34, %v3288_v34  ;;  %v2331_v45 = vld [vmem:[#allocation8 + $0x8] sm:$0xff]  }
 0x24b   : > { %757 = vadd.xlane.f32.xlu0 %v756_v3  ;;  %v644_v1 = vpop.xlane.xlu1 %643  ;;  %v759_v5 = vadd.f32 %v721_v56, %v720_v39  ;;  %v723_v14 = vmul.f32 %v3291_v40, %v3291_v40  ;;  %2133 = vmatpush3.bf16.msra.mxu1 %v2331_v45  ;;  %v2343_v45 = vld [vmem:[#allocation8 + $0x38] sm:$0xff]  }
 0x24c   : > { %v3308_v12 = vsub.f32 %v3158_v51, %v668_v36  ;;  %v3311_v18 = vsub.f32 %v3163_v54, %v668_v36  ;;  %v669_v46 = vmul.f32 0.00390625, %v644_v1  ;;  %v724_v50 = vmul.f32 %v3298_v6, %v3298_v6 }
 0x24d   : > { %760 = vadd.xlane.f32.xlu1 %v759_v5  ;;  %v647_v17 = vpop.xlane.xlu0 %646  ;;  %v762_v20 = vadd.f32 %v723_v14, %v722_v37  ;;  %v725_v21 = vmul.f32 %v3301_v59, %v3301_v59 }
 0x24e   : > { %v3318_v23 = vsub.f32 %v3168_v57, %v669_v46  ;;  %v3321_v51 = vsub.f32 %v3171_v58, %v669_v46  ;;  %v670_v54 = vmul.f32 0.00390625, %v647_v17  ;;  %v726_v24 = vmul.f32 %v3308_v12, %v3308_v12  ;;  %v2332_v46 = vld [vmem:[#allocation8 + $0x50] sm:$0xff]  }
 0x24f   : > { %763 = vadd.xlane.f32.xlu0 %v762_v20  ;;  %v650_v26 = vpop.xlane.xlu1 %649  ;;  %v765_v52 = vadd.f32 %v725_v21, %v724_v50  ;;  %v727_v30 = vmul.f32 %v3311_v18, %v3311_v18  ;;  %v2333_v17 = vld [vmem:[#allocation8 + $0x10] sm:$0xff]   ;;  %2134 = vmatprep.subr.bf16.mxu1 %v2332_v46 }
 0x250   : > { %v3328_v60 = vsub.f32 %v3176_v62, %v670_v54  ;;  %v3331_v57 = vsub.f32 %v3179_v63, %v670_v54  ;;  %v671_v58 = vmul.f32 0.00390625, %v650_v26  ;;  %v728_v38 = vmul.f32 %v3318_v23, %v3318_v23  ;;  %2135 = vmatpush3.bf16.msra.mxu1 %v2333_v17  ;;  %v2334_v26 = vld [vmem:[#allocation8 + $0x58] sm:$0xff]  }
 0x251   : > { %766 = vadd.xlane.f32.xlu1 %v765_v52  ;;  %v653_v31 = vpop.xlane.xlu0 %652  ;;  %v768_v41 = vadd.f32 %v727_v30, %v726_v24  ;;  %v729_v39 = vmul.f32 %v3321_v51, %v3321_v51  ;;  %2136 = vmatprep.subr.bf16.mxu1 %v2334_v26  ;;  %v2336_v30 = vld [vmem:[#allocation8 + $0x60] sm:$0xff]   ;;  %v922_v17 = vsub.s32 6, %v3066_v42 }
 0x252   : > { %v3338_v3 = vsub.f32 %v3184_v2, %v671_v58  ;;  %v3341_v62 = vsub.f32 %v3187_v4, %v671_v58  ;;  %v672_v63 = vmul.f32 0.00390625, %v653_v31  ;;  %v730_v56 = vmul.f32 %v3328_v60, %v3328_v60  ;;  %v2337_v58 = vld [vmem:[#allocation8 + $0x20] sm:$0xff]   ;;  %v2340_v31 = vld [vmem:[#allocation8 + $0x70] sm:$0xff]  }
 0x253   : > { %769 = vadd.xlane.f32.xlu0 %v768_v41  ;;  %v656_v36 = vpop.xlane.xlu1 %655  ;;  %v771_v37 = vadd.f32 %v729_v39, %v728_v38  ;;  %v731_v1 = vmul.f32 %v3331_v57, %v3331_v57  ;;  %v2338_v38 = vld [vmem:[#allocation8 + $0x68] sm:$0xff]   ;;  %v2341_v41 = vld [vmem:[#allocation8 + $0x30] sm:$0xff]   ;;  %v2342_v39 = vld [vmem:[#allocation8 + $0x78] sm:$0xff]   ;;  %v923_v26 = vrot.slane %v3071_v44, %v922_v17 }
 0x254   : > { %v3348_v5 = vsub.f32 %v3192_v7, %v672_v63  ;;  %v3351_v2 = vsub.f32 %v3195_v8, %v672_v63  ;;  %v673_v4 = vmul.f32 0.00390625, %v656_v36  ;;  %v732_v14 = vmul.f32 %v3338_v3, %v3338_v3 }
 0x255   : > { %772 = vadd.xlane.f32.xlu1 %v771_v37  ;;  %v774_v50 = vadd.f32 %v731_v1, %v730_v56  ;;  %v733_v19 = vmul.f32 %v3341_v62, %v3341_v62 }
 0x256   : > { %v3358_v20 = vsub.f32 %v3200_v10, %v673_v4  ;;  %v3361_v7 = vsub.f32 %v3203_v13, %v673_v4  ;;  %v734_v8 = vmul.f32 %v3348_v5, %v3348_v5  ;;  %v735_v21 = vmul.f32 %v3351_v2, %v3351_v2  ;;  %v2335_v13 = vld [vmem:[#allocation8 + $0x18] sm:$0xff]  }
 0x257   : > { %775 = vadd.xlane.f32.xlu0 %v774_v50  ;;  %v777_v22 = vadd.f32 %v733_v19, %v732_v14  ;;  %2137 = vmatpush3.bf16.msra.mxu1 %v2335_v13  ;;  %v3372_v4 = vsub.s32 1, %v3066_v42  ;;  %v872_v14 = vsub.s32 5, %v3066_v42  ;;  %v3376_v50 = vsub.s32 2, %v3066_v42 }
 0x258   : > { %v780_v54 = vadd.f32 %v735_v21, %v734_v8  ;;  %v736_v24 = vmul.f32 %v3358_v20, %v3358_v20  ;;  %v737_v10 = vmul.f32 %v3361_v7, %v3361_v7  ;;  %2138 = vmatprep.subr.bf16.mxu1 %v2336_v30 }
 0x259   : > { %778 = vadd.xlane.f32.xlu1 %v777_v22  ;;  %v869_v21 = vrot.slane %v3071_v44, %v3372_v4  ;;  %v873_v22 = vrot.slane %v3071_v44, %v872_v14 }
 0x25a   : > { %v783_v52 = vadd.f32 %v737_v10, %v736_v24  ;;  %v919_v24 = vrot.slane %v3071_v44, %v3376_v50  ;;  %v3397_v44 = vrot.slane %v923_v26, %v3376_v50 }
 0x25b   : > { %781 = vadd.xlane.f32.xlu0 %v780_v54  ;;  %2139 = vmatpush3.bf16.msra.mxu1 %v2337_v58  ;;  %v3389_v42 = vrot.slane %v873_v22, %v3372_v4 }
 0x25c   : > { %2140 = vmatprep.subr.bf16.mxu1 %v2338_v38  ;;  %v3392_v38 = vrot.slane %v919_v24, %v3376_v50 }
 0x25d   : > { %784 = vadd.xlane.f32.xlu1 %v783_v52  ;;  %v3386_v52 = vrot.slane %v869_v21, %v3372_v4 }
 0x25f   : > { %2141 = vmatpush3.bf16.msra.mxu1 %v2339_v61 }
 0x260   : > { %2142 = vmatprep.subr.bf16.mxu1 %v2340_v31 }
 0x263   : > { %2143 = vmatpush3.bf16.msra.mxu1 %v2341_v41 }
 0x264   : > { %2144 = vmatprep.subr.bf16.mxu1 %v2342_v39 }
 0x267   : > { %2145 = vmatpush3.bf16.msra.mxu1 %v2343_v45 }
 0x2bf   : > { %v740_v63 = vpop.xlane.xlu0 %739 }
 0x2c0   : > { %v786_v56 = vmul.f32 0.00390625, %v740_v63 }
 0x2c2   : > { %v802_v36 = vadd.f32 1e-05, %v786_v56 }
 0x2c3   : > { %v743_v37 = vpop.xlane.xlu1 %742 }
 0x2c4   : > { %2368 = vrsqrt.f32 %v802_v36  ;;  %v787_v1 = vmul.f32 0.00390625, %v743_v37 }
 0x2c6   : > { %v803_v46 = vadd.f32 1e-05, %v787_v1 }
 0x2c7   : > { %v746_v19 = vpop.xlane.xlu0 %745 }
 0x2c8   : > { %2370 = vrsqrt.f32 %v803_v46  ;;  %v788_v8 = vmul.f32 0.00390625, %v746_v19 }
 0x2ca   : > { %v804_v54 = vadd.f32 1e-05, %v788_v8 }
 0x2cb   : > { %v749_v10 = vpop.xlane.xlu1 %748 }
 0x2cc   : > { %2372 = vrsqrt.f32 %v804_v54  ;;  %v789_v13 = vmul.f32 0.00390625, %v749_v10 }
 0x2ce   : > { %v2369_v30 = vpop.eup %2368  ;;  %v805_v58 = vadd.f32 1e-05, %v789_v13 }
 0x2cf   : > { %v834_v61 = vmul.f32 %v2369_v30, %v3212_v48  ;;  %v835_v31 = vmul.f32 %v2369_v30, %v3215_v49  ;;  %v752_v41 = vpop.xlane.xlu0 %751 }
 0x2d0   : > { %2374 = vrsqrt.f32 %v805_v58  ;;  %v790_v39 = vmul.f32 0.00390625, %v752_v41 }
 0x2d1   : > { %v884_v45 = vmul.f32 %v3386_v52, %v834_v61  ;;  %v755_v63 = vpop.xlane.xlu1 %754  ;;  %v885_v56 = vmul.f32 %v3389_v42, %v835_v31 }
 0x2d2   : > { %v2371_v36 = vpop.eup %2370  ;;  %v806_v37 = vadd.f32 1e-05, %v790_v39  ;;  %v791_v1 = vmul.f32 0.00390625, %v755_v63 }
 0x2d3   : > { %v934_v14 = vadd.f32 %v3392_v38, %v884_v45  ;;  %v836_v48 = vmul.f32 %v2371_v36, %v3222_v27  ;;  %v837_v49 = vmul.f32 %v2371_v36, %v3225_v28  ;;  %v935_v46 = vadd.f32 %v3397_v44, %v885_v56 }
 0x2d4   : > { %2376 = vrsqrt.f32 %v806_v37  ;;  %v807_v19 = vadd.f32 1e-05, %v791_v1 }
 0x2d5   : > { %v886_v17 = vmul.f32 %v3386_v52, %v836_v48  ;;  %v887_v8 = vmul.f32 %v3389_v42, %v837_v49  ;;  %v998_v22 = vmul.f32 0.70710677, %v934_v14  ;;  %v999_v54 = vmul.f32 0.70710677, %v935_v46 }
 0x2d6   : > { %v2373_v21 = vpop.eup %2372  ;;  %2378 = vrsqrt.f32 %v807_v19 }
 0x2d7   : > { %v936_v24 = vadd.f32 %v3392_v38, %v886_v17  ;;  %v839_v10 = vmul.f32 %v2373_v21, %v3235_v35  ;;  %v937_v27 = vadd.f32 %v3397_v44, %v887_v8  ;;  %v838_v28 = vmul.f32 %v2373_v21, %v3232_v33 }
 0x2d8   : > { %v758_v26 = vpop.xlane.xlu0 %757  ;;  %2380 = verf.f32 %v999_v54  ;;  %v967_v8 = vmul.f32 0.5, %v935_v46 }
 0x2d9   : > { %v792_v13 = vmul.f32 0.00390625, %v758_v26  ;;  %v1001_v30 = vmul.f32 0.70710677, %v937_v27  ;;  %v1000_v61 = vmul.f32 0.70710677, %v936_v24  ;;  %2382 = verf.f32 %v998_v22 }
 0x2da   : > { %v2375_v58 = vpop.eup %2374  ;;  %v761_v31 = vpop.xlane.xlu1 %760  ;;  %v889_v41 = vmul.f32 %v3389_v42, %v839_v10  ;;  %v888_v36 = vmul.f32 %v3386_v52, %v838_v28 }
 0x2db   : > { %v840_v39 = vmul.f32 %v2375_v58, %v3242_v47  ;;  %v841_v45 = vmul.f32 %v2375_v58, %v3245_v53  ;;  %v808_v35 = vadd.f32 1e-05, %v792_v13  ;;  %v793_v63 = vmul.f32 0.00390625, %v761_v31 }
 0x2dc   : > { %v764_v56 = vpop.xlane.xlu0 %763  ;;  %2384 = verf.f32 %v1001_v30  ;;  %v939_v33 = vadd.f32 %v3397_v44, %v889_v41  ;;  %v938_v10 = vadd.f32 %v3392_v38, %v888_v36  ;;  %v966_v30 = vmul.f32 0.5, %v934_v14 }
 0x2dd   : > { %v809_v37 = vadd.f32 1e-05, %v793_v63  ;;  %v794_v1 = vmul.f32 0.00390625, %v764_v56  ;;  %v891_v48 = vmul.f32 %v3389_v42, %v841_v45  ;;  %2386 = verf.f32 %v1000_v61 }
 0x2de   : > { %v2377_v49 = vpop.eup %2376  ;;  %v767_v19 = vpop.xlane.xlu1 %766  ;;  %v1003_v17 = vmul.f32 0.70710677, %v939_v33  ;;  %v890_v47 = vmul.f32 %v3386_v52, %v840_v39  ;;  %2388 = vrsqrt.f32 %v808_v35  ;;  %v969_v35 = vmul.f32 0.5, %v937_v27 }
 0x2df   : > { %v810_v53 = vadd.f32 1e-05, %v794_v1  ;;  %2390 = vrsqrt.f32 %v809_v37  ;;  %v795_v21 = vmul.f32 0.00390625, %v767_v19  ;;  %v941_v54 = vadd.f32 %v3397_v44, %v891_v48 }
 0x2e0   : > { %v770_v22 = vpop.xlane.xlu0 %769  ;;  %v2379_v28 = vpop.eup %2378  ;;  %v843_v26 = vmul.f32 %v2377_v49, %v3255_v11  ;;  %2392 = verf.f32 %v1003_v17  ;;  %v940_v46 = vadd.f32 %v3392_v38, %v890_v47  ;;  %v968_v1 = vmul.f32 0.5, %v936_v24 }
 0x2e1   : > { %v796_v13 = vmul.f32 0.00390625, %v770_v22  ;;  %2394 = vrsqrt.f32 %v810_v53  ;;  %v811_v61 = vadd.f32 1e-05, %v795_v21  ;;  %v1005_v41 = vmul.f32 0.70710677, %v941_v54 }
 0x2e2   : > { %v2381_v58 = vpop.eup %2380  ;;  %v773_v31 = vpop.xlane.xlu1 %772  ;;  %v845_v36 = vmul.f32 %v2379_v28, %v3261_v16  ;;  %v3423_v11 = vmul.f32 0.5, %v939_v33  ;;  %v1002_v14 = vmul.f32 0.70710677, %v938_v10  ;;  %v842_v48 = vmul.f32 %v2377_v49, %v3252_v9 }
 0x2e3   : > { %v812_v39 = vadd.f32 1e-05, %v796_v13  ;;  %v797_v45 = vmul.f32 0.00390625, %v773_v31  ;;  %v1063_v63 = vadd.f32 1.0, %v2381_v58  ;;  %v2383_v56 = vpop.eup %2382  ;;  %2396 = vrsqrt.f32 %v811_v61 }
 0x2e4   : > { %v776_v37 = vpop.xlane.xlu0 %775  ;;  %v844_v47 = vmul.f32 %v2379_v28, %v3258_v15  ;;  %2398 = verf.f32 %v1005_v41  ;;  %v1004_v27 = vmul.f32 0.70710677, %v940_v46  ;;  %v893_v22 = vmul.f32 %v3389_v42, %v843_v26 }
 0x2e5   : > { %v813_v19 = vadd.f32 1e-05, %v797_v45  ;;  %v798_v17 = vmul.f32 0.00390625, %v776_v37  ;;  %2400 = vrsqrt.f32 %v812_v39  ;;  %v1095_v24 = vmul.f32 %v1063_v63, %v967_v8 }
 0x2e6   : > { %v2385_v53 = vpop.eup %2384  ;;  %v779_v21 = vpop.xlane.xlu1 %778  ;;  %v1062_v0 = vadd.f32 1.0, %v2383_v56  ;;  %2402 = verf.f32 %v1002_v14  ;;  %v895_v9 = vmul.f32 %v3389_v42, %v845_v36  ;;  %v973_v26 = vmul.f32 0.5, %v941_v54 }
 0x2e7   : > { %v799_v16 = vmul.f32 0.00390625, %v779_v21  ;;  %v1065_v13 = vadd.f32 1.0, %v2385_v53  ;;  %v2387_v33 = vpop.eup %2386  ;;  %v814_v58 = vadd.f32 1e-05, %v798_v17  ;;  %2404 = vrsqrt.f32 %v813_v19 }
 0x2e8   : > { %v782_v31 = vpop.xlane.xlu0 %781  ;;  %v2389_v49 = vpop.eup %2388  ;;  %v1064_v37 = vadd.f32 1.0, %v2387_v33  ;;  %2406 = verf.f32 %v1004_v27  ;;  %v943_v39 = vadd.f32 %v3397_v44, %v893_v22  ;;  %v970_v53 = vmul.f32 0.5, %v938_v10 }
 0x2e9   : > { %v815_v61 = vadd.f32 1e-05, %v799_v16  ;;  %v800_v15 = vmul.f32 0.00390625, %v782_v31  ;;  %v1097_v28 = vmul.f32 %v1065_v13, %v969_v35  ;;  %v2391_v41 = vpop.eup %2390  ;;  %v972_v56 = vmul.f32 0.5, %v940_v46 }
 0x2ea   : > { %v785_v45 = vpop.xlane.xlu1 %784  ;;  %v2393_v8 = vpop.eup %2392  ;;  %2408 = vrsqrt.f32 %v814_v58  ;;  %v1094_v21 = vmul.f32 %v1062_v0, %v966_v30  ;;  %v1096_v19 = vmul.f32 %v1064_v37, %v968_v1  ;;  %v846_v16 = vmul.f32 %v2389_v49, %v3272_v25 }
 0x2eb   : > { %v816_v63 = vadd.f32 1e-05, %v800_v15  ;;  %v1128_v17 = vpack.c.bf16 %v1097_v28, %v1095_v24  ;;  %v2395_v14 = vpop.eup %2394  ;;  %v801_v36 = vmul.f32 0.00390625, %v785_v45  ;;  %v847_v35 = vmul.f32 %v2389_v49, %v3275_v29 }
 0x2ec   : > { %2410 = vrsqrt.f32 %v815_v61  ;;  %v945_v54 = vadd.f32 %v3397_v44, %v895_v9  ;;  %v1127_v27 = vpack.c.bf16 %v1096_v19, %v1094_v21  ;;  %v1067_v22 = vadd.f32 1.0, %v2393_v8 }
 0x2ed   : > { %1307 = vmatprep.mubr.bf16.mxu1 %v1128_v17  ;;  %v1007_v13 = vmul.f32 0.70710677, %v943_v39  ;;  %v892_v24 = vmul.f32 %v3386_v52, %v842_v48  ;;  %v2397_v10 = vpop.eup %2396  ;;  %v848_v46 = vmul.f32 %v2391_v41, %v3278_v55  ;;  %v849_v33 = vmul.f32 %v2391_v41, %v3281_v32 }
 0x2ee   : > { %v3437_v0 = vmul.f32 %v2395_v14, %v3288_v34  ;;  %2412 = vrsqrt.f32 %v816_v63  ;;  %v2399_v25 = vpop.eup %2398  ;;  %v851_v29 = vmul.f32 %v2395_v14, %v3291_v40  ;;  %v817_v30 = vadd.f32 1e-05, %v801_v36  ;;  %1308 = vmatmul.mubr.bf16.vlgmr.msra.gmra.mrb[16].mxu1 %v1127_v27 }
 0x2ef   : > { %v1009_v1 = vmul.f32 0.70710677, %v945_v54  ;;  %2414 = verf.f32 %v1007_v13  ;;  %v2401_v58 = vpop.eup %2400  ;;  %v1069_v31 = vadd.f32 1.0, %v2399_v25  ;;  %v894_v48 = vmul.f32 %v3386_v52, %v844_v47 }
 0x2f0   : > { %v942_v9 = vadd.f32 %v3392_v38, %v892_v24  ;;  %v897_v55 = vmul.f32 %v3389_v42, %v847_v35  ;;  %v2403_v32 = vpop.eup %2402  ;;  %v852_v34 = vmul.f32 %v2397_v10, %v3298_v6  ;;  %v1099_v49 = vmul.f32 %v1067_v22, %v3423_v11 }
 0x2f1   : > { %v975_v61 = vmul.f32 0.5, %v943_v39  ;;  %2416 = verf.f32 %v1009_v1  ;;  %v2405_v40 = vpop.eup %2404  ;;  %v1101_v15 = vmul.f32 %v1069_v31, %v973_v26  ;;  %v1066_v28 = vadd.f32 1.0, %v2403_v32 }
 0x2f2   : > { %v944_v41 = vadd.f32 %v3392_v38, %v894_v48  ;;  %v899_v45 = vmul.f32 %v3389_v42, %v849_v33  ;;  %v2407_v37 = vpop.eup %2406  ;;  %v853_v47 = vmul.f32 %v2397_v10, %v3301_v59  ;;  %2418 = vrsqrt.f32 %v817_v30 }
 0x2f3   : > { %v1006_v8 = vmul.f32 0.70710677, %v942_v9  ;;  %v947_v63 = vadd.f32 %v3397_v44, %v897_v55  ;;  %v3450_v6 = vmul.f32 %v2401_v58, %v3308_v12  ;;  %v1130_v11 = vpack.c.bf16 %v1101_v15, %v1099_v49 }
 0x2f4   : > { %v1068_v39 = vadd.f32 1.0, %v2407_v37  ;;  %v977_v17 = vmul.f32 0.5, %v945_v54  ;;  %v2409_v14 = vpop.eup %2408  ;;  %v855_v26 = vmul.f32 %v2401_v58, %v3311_v18  ;;  %v3454_v36 = vmul.f32 %v2405_v40, %v3318_v23 }
 0x2f5   : > { %v1008_v21 = vmul.f32 0.70710677, %v944_v41  ;;  %2420 = verf.f32 %v1006_v8  ;;  %1315 = vmatprep.mubr.bf16.mxu1 %v1130_v11  ;;  %v1098_v59 = vmul.f32 %v1066_v28, %v970_v53  ;;  %v949_v27 = vadd.f32 %v3397_v44, %v899_v45 }
 0x2f6   : > { %v2411_v19 = vpop.eup %2410  ;;  %v1100_v35 = vmul.f32 %v1068_v39, %v972_v56  ;;  %v1011_v22 = vmul.f32 0.70710677, %v947_v63  ;;  %v857_v12 = vmul.f32 %v2405_v40, %v3321_v51  ;;  %v974_v13 = vmul.f32 0.5, %v942_v9 }
 0x2f7   : > { %2422 = verf.f32 %v1008_v21  ;;  %v896_v54 = vmul.f32 %v3386_v52, %v846_v16  ;;  %v3460_v18 = vmul.f32 %v2409_v14, %v3328_v60  ;;  %v1013_v10 = vmul.f32 0.70710677, %v949_v27 }
 0x2f8   : > { %v2413_v24 = vpop.eup %2412  ;;  %v1129_v23 = vpack.c.bf16 %v1100_v35, %v1098_v59  ;;  %2424 = verf.f32 %v1011_v22  ;;  %v3463_v53 = vmul.f32 %v2409_v14, %v3331_v57  ;;  %v976_v56 = vmul.f32 0.5, %v944_v41 }
 0x2f9   : > { %v2415_v33 = vpop.eup %2414  ;;  %v898_v25 = vmul.f32 %v3386_v52, %v848_v46  ;;  %v946_v51 = vadd.f32 %v3392_v38, %v896_v54  ;;  %2426 = verf.f32 %v1013_v10  ;;  %v901_v16 = vmul.f32 %v3389_v42, %v851_v29 }
 0x2fa   : > { %1316 = vmatmul.mubr.bf16.gmra.mrb[20].mxu1 %v1129_v23  ;;  %v1071_v30 = vadd.f32 1.0, %v2415_v33  ;;  %v903_v60 = vmul.f32 %v3389_v42, %v853_v47  ;;  %v3470_v58 = vmul.f32 %v2411_v19, %v3338_v3  ;;  %v900_v48 = vmul.f32 %v3386_v52, %v3437_v0 }
 0x2fb   : > { %v2417_v1 = vpop.eup %2416  ;;  %v948_v31 = vadd.f32 %v3392_v38, %v898_v25  ;;  %v1010_v57 = vmul.f32 0.70710677, %v946_v51  ;;  %v3476_v46 = vmul.f32 %v2411_v19, %v3341_v62  ;;  %v951_v55 = vadd.f32 %v3397_v44, %v901_v16 }
 0x2fc   : > { %v1073_v9 = vadd.f32 1.0, %v2417_v1  ;;  %v3480_v29 = vadd.f32 %v3397_v44, %v903_v60  ;;  %v3482_v32 = vpop.eup %2418  ;;  %v979_v49 = vmul.f32 0.5, %v947_v63  ;;  %v902_v40 = vmul.f32 %v3386_v52, %v852_v34 }
 0x2fd   : > { %v1012_v3 = vmul.f32 0.70710677, %v948_v31  ;;  %2428 = verf.f32 %v1010_v57  ;;  %v3486_v15 = vmul.f32 %v2413_v24, %v3348_v5  ;;  %v1103_v0 = vmul.f32 %v1071_v30, %v975_v61 }
 0x2fe   : > { %v1105_v28 = vmul.f32 %v1073_v9, %v977_v17  ;;  %v1015_v62 = vmul.f32 0.70710677, %v951_v55  ;;  %v1017_v45 = vmul.f32 0.70710677, %v3480_v29  ;;  %v3490_v37 = vadd.f32 %v3392_v38, %v900_v48 }
 0x2ff   : > { %v2421_v41 = vpop.eup %2420  ;;  %2430 = verf.f32 %v1012_v3  ;;  %v3493_v47 = vadd.f32 %v3392_v38, %v902_v40  ;;  %v905_v34 = vmul.f32 %v3389_v42, %v855_v26  ;;  %v3497_v61 = vmul.f32 %v2413_v24, %v3351_v2 }
 0x300   : > { %v1132_v8 = vpack.c.bf16 %v1105_v28, %v1103_v0  ;;  %v1070_v63 = vadd.f32 1.0, %v2421_v41  ;;  %2432 = verf.f32 %v1015_v62  ;;  %v981_v11 = vmul.f32 0.5, %v949_v27 }
 0x301   : > { %v2423_v5 = vpop.eup %2422  ;;  %2434 = verf.f32 %v1017_v45  ;;  %v1014_v39 = vmul.f32 0.70710677, %v3490_v37  ;;  %v1016_v19 = vmul.f32 0.70710677, %v3493_v47  ;;  %v907_v59 = vmul.f32 %v3389_v42, %v857_v12 }
 0x302   : > { %v2425_v17 = vpop.eup %2424  ;;  %1323 = vmatprep.mubr.bf16.mxu1 %v1132_v8  ;;  %v1072_v14 = vadd.f32 1.0, %v2423_v5  ;;  %v1102_v21 = vmul.f32 %v1070_v63, %v974_v13  ;;  %v3503_v26 = vadd.f32 %v3397_v44, %v905_v34  ;;  %v904_v2 = vmul.f32 %v3386_v52, %v3450_v6 }
 0x303   : > { %v1075_v35 = vadd.f32 1.0, %v2425_v17  ;;  %2436 = verf.f32 %v1014_v39  ;;  %v2427_v27 = vpop.eup %2426  ;;  %v3508_v54 = vadd.f32 %v3397_v44, %v907_v59  ;;  %v906_v13 = vmul.f32 %v3386_v52, %v3454_v36 }
 0x304   : > { %v1104_v22 = vmul.f32 %v1072_v14, %v976_v56  ;;  %2438 = verf.f32 %v1016_v19  ;;  %v865_v12 = vmul.f32 %v3482_v32, %v3361_v7  ;;  %v1077_v24 = vadd.f32 1.0, %v2427_v27 }
 0x305   : > { %v978_v23 = vmul.f32 0.5, %v946_v51  ;;  %v1019_v10 = vmul.f32 0.70710677, %v3503_v26  ;;  %v1107_v25 = vmul.f32 %v1075_v35, %v979_v49  ;;  %v1021_v6 = vmul.f32 0.70710677, %v3508_v54 }
 0x306   : > { %v1131_v33 = vpack.c.bf16 %v1104_v22, %v1102_v21  ;;  %v3517_v56 = vadd.f32 %v3392_v38, %v904_v2  ;;  %v1109_v16 = vmul.f32 %v1077_v24, %v981_v11  ;;  %v3520_v60 = vadd.f32 %v3392_v38, %v906_v13 }
 0x307   : > { %v2429_v30 = vpop.eup %2428  ;;  %2440 = verf.f32 %v1019_v10  ;;  %v909_v7 = vmul.f32 %v3389_v42, %v3463_v53  ;;  %v980_v36 = vmul.f32 0.5, %v948_v31  ;;  %v983_v9 = vmul.f32 0.5, %v951_v55 }
 0x308   : > { %1324 = vmatmul.mubr.bf16.gmra.mrb[24].mxu1 %v1131_v33  ;;  %v1074_v51 = vadd.f32 1.0, %v2429_v30  ;;  %2442 = verf.f32 %v1021_v6  ;;  %v1018_v1 = vmul.f32 0.70710677, %v3517_v56  ;;  %v1134_v48 = vpack.c.bf16 %v1109_v16, %v1107_v25 }
 0x309   : > { %v2431_v57 = vpop.eup %2430  ;;  %v1020_v49 = vmul.f32 0.70710677, %v3520_v60  ;;  %v911_v3 = vmul.f32 %v3389_v42, %v3476_v46  ;;  %v985_v28 = vmul.f32 0.5, %v3480_v29  ;;  %v3530_v53 = vadd.f32 %v3397_v44, %v909_v7 }
 0x30a   : > { %v2433_v40 = vpop.eup %2432  ;;  %v1076_v0 = vadd.f32 1.0, %v2431_v57  ;;  %2444 = verf.f32 %v1018_v1  ;;  %1331 = vmatprep.mubr.bf16.mxu1 %v1134_v48  ;;  %v908_v55 = vmul.f32 %v3386_v52, %v3460_v18  ;;  %v1106_v45 = vmul.f32 %v1074_v51, %v978_v23 }
 0x30b   : > { %v2435_v31 = vpop.eup %2434  ;;  %v1079_v62 = vadd.f32 1.0, %v2433_v40  ;;  %2446 = verf.f32 %v1020_v49  ;;  %v3533_v41 = vadd.f32 %v3397_v44, %v911_v3  ;;  %v1023_v63 = vmul.f32 0.70710677, %v3530_v53 }
 0x30c   : > { %v1108_v46 = vmul.f32 %v1076_v0, %v980_v36  ;;  %v1081_v8 = vadd.f32 1.0, %v2435_v31  ;;  %v864_v34 = vmul.f32 %v3482_v32, %v3358_v20  ;;  %v984_v5 = vmul.f32 0.5, %v3493_v47 }
 0x30d   : > { %v2437_v29 = vpop.eup %2436  ;;  %v1025_v11 = vmul.f32 0.70710677, %v3533_v41  ;;  %v910_v39 = vmul.f32 %v3386_v52, %v3470_v58  ;;  %v1111_v21 = vmul.f32 %v1079_v62, %v983_v9  ;;  %2448 = verf.f32 %v1023_v63 }
 0x30e   : > { %v2439_v17 = vpop.eup %2438  ;;  %v1133_v14 = vpack.c.bf16 %v1108_v46, %v1106_v45  ;;  %v1113_v18 = vmul.f32 %v1081_v8, %v985_v28  ;;  %v3545_v59 = vadd.f32 %v3392_v38, %v908_v55  ;;  %v1078_v32 = vadd.f32 1.0, %v2437_v29 }
 0x30f   : > { %v1080_v19 = vadd.f32 1.0, %v2439_v17  ;;  %2450 = verf.f32 %v1025_v11  ;;  %v960_v35 = vadd.f32 %v3392_v38, %v910_v39  ;;  %v913_v47 = vmul.f32 %v3389_v42, %v3497_v61 }
 0x310   : > { %1332 = vmatmul.mubr.bf16.gmra.mrb[28].mxu1 %v1133_v14  ;;  %v1136_v20 = vpack.c.bf16 %v1113_v18, %v1111_v21  ;;  %v915_v58 = vmul.f32 %v3389_v42, %v865_v12  ;;  %v982_v27 = vmul.f32 0.5, %v3490_v37  ;;  %v987_v13 = vmul.f32 0.5, %v3503_v26 }
 0x311   : > { %v2441_v2 = vpop.eup %2440  ;;  %v1112_v22 = vmul.f32 %v1080_v19, %v984_v5  ;;  %v1022_v24 = vmul.f32 0.70710677, %v3545_v59  ;;  %v1024_v33 = vmul.f32 0.70710677, %v960_v35  ;;  %v963_v25 = vadd.f32 %v3397_v44, %v913_v47 }
 0x312   : > { %v2443_v23 = vpop.eup %2442  ;;  %1339 = vmatprep.mubr.bf16.mxu1 %v1136_v20  ;;  %v1083_v10 = vadd.f32 1.0, %v2441_v2  ;;  %v965_v6 = vadd.f32 %v3397_v44, %v915_v58  ;;  %v989_v61 = vmul.f32 0.5, %v3508_v54  ;;  %v912_v42 = vmul.f32 %v3386_v52, %v3486_v15 }
 0x313   : > { %v1085_v30 = vadd.f32 1.0, %v2443_v23  ;;  %2452 = verf.f32 %v1022_v24  ;;  %v1110_v12 = vmul.f32 %v1078_v32, %v982_v27  ;;  %v1027_v36 = vmul.f32 0.70710677, %v963_v25 }
 0x314   : > { %v2445_v37 = vpop.eup %2444  ;;  %2454 = verf.f32 %v1024_v33  ;;  %v1115_v16 = vmul.f32 %v1083_v10, %v987_v13  ;;  %v1029_v51 = vmul.f32 0.70710677, %v965_v6  ;;  %v914_v48 = vmul.f32 %v3386_v52, %v864_v34 }
 0x315   : > { %v2447_v26 = vpop.eup %2446  ;;  %v1117_v7 = vmul.f32 %v1085_v30, %v989_v61  ;;  %v1135_v1 = vpack.c.bf16 %v1112_v22, %v1110_v12  ;;  %v962_v44 = vadd.f32 %v3392_v38, %v912_v42  ;;  %2456 = verf.f32 %v1027_v36 }
 0x316   : > { %v1084_v57 = vadd.f32 1.0, %v2447_v26  ;;  %v988_v15 = vmul.f32 0.5, %v3520_v60  ;;  %v1082_v49 = vadd.f32 1.0, %v2445_v37  ;;  %2458 = verf.f32 %v1029_v51 }
 0x317   : > { %v1138_v54 = vpack.c.bf16 %v1117_v7, %v1115_v16  ;;  %v2449_v9 = vpop.eup %2448  ;;  %v964_v3 = vadd.f32 %v3392_v38, %v914_v48  ;;  %v986_v0 = vmul.f32 0.5, %v3517_v56  ;;  %v1026_v31 = vmul.f32 0.70710677, %v962_v44 }
 0x318   : > { %1340 = vmatmul.mubr.bf16.gmra.mrb[32].mxu1 %v1135_v1  ;;  %v1087_v28 = vadd.f32 1.0, %v2449_v9  ;;  %v1116_v62 = vmul.f32 %v1084_v57, %v988_v15  ;;  %v993_v52 = vmul.f32 0.5, %v3533_v41  ;;  %v991_v46 = vmul.f32 0.5, %v3530_v53 }
 0x319   : > { %v2451_v40 = vpop.eup %2450  ;;  %1347 = vmatprep.mubr.bf16.mxu1 %v1138_v54  ;;  %v1028_v45 = vmul.f32 0.70710677, %v964_v3  ;;  %2460 = verf.f32 %v1026_v31  ;;  %v1114_v8 = vmul.f32 %v1082_v49, %v986_v0  ;;  %v992_v56 = vmul.f32 0.5, %v960_v35 }
 0x31a   : > { %v1089_v55 = vadd.f32 1.0, %v2451_v40  ;;  %v1119_v29 = vmul.f32 %v1087_v28, %v991_v46  ;;  %v990_v14 = vmul.f32 0.5, %v3545_v59  ;;  %v995_v18 = vmul.f32 0.5, %v963_v25  ;;  %v3570_v25 = vld [vmem:[%s3914_s4] sm:$0x7] }
 0x31b   : > { %2462 = verf.f32 %v1028_v45  ;;  %v1137_v34 = vpack.c.bf16 %v1116_v62, %v1114_v8  ;;  %v997_v19 = vmul.f32 0.5, %v965_v6  ;;  %v996_v35 = vmul.f32 0.5, %v964_v3 }
 0x31c   : > { %v1121_v60 = vmul.f32 %v1089_v55, %v993_v52  ;;  %v994_v10 = vmul.f32 0.5, %v962_v44  ;;  %v3574_v30 = vrot.slane %v3570_v25, %v3069_v43 }
 0x31d   : > { %v2453_v63 = vpop.eup %2452 }
 0x31e   : > { %v2455_v38 = vpop.eup %2454  ;;  %v1140_v5 = vpack.c.bf16 %v1121_v60, %v1119_v29  ;;  %v1086_v39 = vadd.f32 1.0, %v2453_v63 }
 0x31f   : > { %v1088_v11 = vadd.f32 1.0, %v2455_v38  ;;  %v2457_v17 = vpop.eup %2456 }
 0x320   : > { %1348 = vmatmul.mubr.bf16.gmra.mrb[36].mxu1 %v1137_v34  ;;  %v2459_v41 = vpop.eup %2458  ;;  %v1091_v53 = vadd.f32 1.0, %v2457_v17  ;;  %v1118_v32 = vmul.f32 %v1086_v39, %v990_v14 }
 0x321   : > { %1355 = vmatprep.mubr.bf16.mxu1 %v1140_v5  ;;  %v1120_v21 = vmul.f32 %v1088_v11, %v992_v56  ;;  %v1093_v20 = vadd.f32 1.0, %v2459_v41 }
 0x322   : > { %v1123_v58 = vmul.f32 %v1091_v53, %v995_v18 }
 0x323   : > { %v2461_v47 = vpop.eup %2460  ;;  %v1125_v2 = vmul.f32 %v1093_v20, %v997_v19  ;;  %v1139_v22 = vpack.c.bf16 %v1120_v21, %v1118_v32 }
 0x324   : > { %v1090_v23 = vadd.f32 1.0, %v2461_v47 }
 0x325   : > { %v2463_v27 = vpop.eup %2462  ;;  %v1142_v13 = vpack.c.bf16 %v1125_v2, %v1123_v58 }
 0x326   : > { %v1092_v24 = vadd.f32 1.0, %v2463_v27  ;;  %v1122_v59 = vmul.f32 %v1090_v23, %v994_v10 }
 0x328   : > { %1356 = vmatmul.mubr.bf16.gmra.mrb[40].mxu1 %v1139_v22  ;;  %v1124_v33 = vmul.f32 %v1092_v24, %v996_v35 }
 0x329   : > { %1363 = vmatprep.mubr.bf16.mxu1 %v1142_v13 }
 0x32a   : > { %v1141_v61 = vpack.c.bf16 %v1124_v33, %v1122_v59 }
 0x330   : > { %1364 = vmatmul.mubr.bf16.gmra.mrb[44].mxu1 %v1141_v61 }
 0x3c1   : > { %v2146_v6 = vpop.f32.mrb[16].mxu1 }
 0x3c2   : > { %v2147_v42 = vpop.f32.mrb[17].mxu1 }
 0x3c3   : > { %v2148_v37 = vadd.f32 %v2147_v42, %v2146_v6  ;;  %v2149_v12 = vpop.f32.mrb[18].mxu1 }
 0x3c4   : > { %v2150_v26 = vpop.f32.mrb[19].mxu1 }
 0x3c5   : > { %v2151_v16 = vadd.f32 %v2150_v26, %v2149_v12  ;;  %v3577_v7 = vadd.f32 %v2148_v37, %v3574_v30 }
 0x3c7   : > { %1372 = vadd.xlane.f32.xlu0 %v3577_v7  ;;  %v3581_v36 = vadd.f32 %v2151_v16, %v3574_v30 }
 0x3c9   : > { %1374 = vadd.xlane.f32.xlu1 %v3581_v36 }
 0x3cd   : > { %v2152_v51 = vpop.f32.mrb[20].mxu1 }
 0x3ce   : > { %v2153_v1 = vpop.f32.mrb[21].mxu1 }
 0x3cf   : > { %v2154_v57 = vadd.f32 %v2153_v1, %v2152_v51  ;;  %v2155_v48 = vpop.f32.mrb[22].mxu1 }
 0x3d0   : > { %v2156_v44 = vpop.f32.mrb[23].mxu1 }
 0x3d1   : > { %v2157_v54 = vadd.f32 %v2156_v44, %v2155_v48  ;;  %v3585_v9 = vadd.f32 %v2154_v57, %v3574_v30 }
 0x3d3   : > { %1376 = vadd.xlane.f32.xlu0 %v3585_v9  ;;  %v3589_v15 = vadd.f32 %v2157_v54, %v3574_v30 }
 0x3d5   : > { %1378 = vadd.xlane.f32.xlu1 %v3589_v15 }
 0x3db   : > { %v2158_v49 = vpop.f32.mrb[24].mxu1 }
 0x3dc   : > { %v2159_v3 = vpop.f32.mrb[25].mxu1 }
 0x3dd   : > { %v2160_v40 = vadd.f32 %v2159_v3, %v2158_v49  ;;  %v2161_v0 = vpop.f32.mrb[26].mxu1 }
 0x3de   : > { %v2162_v28 = vpop.f32.mrb[27].mxu1 }
 0x3df   : > { %v2163_v31 = vadd.f32 %v2162_v28, %v2161_v0  ;;  %v3593_v62 = vadd.f32 %v2160_v40, %v3574_v30 }
 0x3e1   : > { %1380 = vadd.xlane.f32.xlu0 %v3593_v62  ;;  %v3597_v52 = vadd.f32 %v2163_v31, %v3574_v30 }
 0x3e3   : > { %1382 = vadd.xlane.f32.xlu1 %v3597_v52  ;;  %v2164_v55 = vpop.f32.mrb[28].mxu1 }
 0x3e4   : > { %v2165_v45 = vpop.f32.mrb[29].mxu1 }
 0x3e5   : > { %v2166_v46 = vadd.f32 %v2165_v45, %v2164_v55  ;;  %v2167_v8 = vpop.f32.mrb[30].mxu1 }
 0x3e6   : > { %v2168_v60 = vpop.f32.mrb[31].mxu1 }
 0x3e7   : > { %v2169_v63 = vadd.f32 %v2168_v60, %v2167_v8  ;;  %v3601_v29 = vadd.f32 %v2166_v46, %v3574_v30 }
 0x3e9   : > { %1384 = vadd.xlane.f32.xlu0 %v3601_v29  ;;  %v3605_v38 = vadd.f32 %v2169_v63, %v3574_v30 }
 0x3eb   : > { %1386 = vadd.xlane.f32.xlu1 %v3605_v38  ;;  %v2170_v34 = vpop.f32.mrb[32].mxu1 }
 0x3ec   : > { %v2171_v5 = vpop.f32.mrb[33].mxu1 }
 0x3ed   : > { %v2172_v11 = vadd.f32 %v2171_v5, %v2170_v34  ;;  %v2173_v56 = vpop.f32.mrb[34].mxu1 }
 0x3ee   : > { %v2174_v39 = vpop.f32.mrb[35].mxu1 }
 0x3ef   : > { %v2175_v17 = vadd.f32 %v2174_v39, %v2173_v56  ;;  %v3609_v41 = vadd.f32 %v2172_v11, %v3574_v30 }
 0x3f1   : > { %1388 = vadd.xlane.f32.xlu0 %v3609_v41  ;;  %v3613_v14 = vadd.f32 %v2175_v17, %v3574_v30 }
 0x3f3   : > { %1390 = vadd.xlane.f32.xlu1 %v3613_v14  ;;  %v2176_v21 = vpop.f32.mrb[36].mxu1 }
 0x3f4   : > { %v2177_v53 = vpop.f32.mrb[37].mxu1 }
 0x3f5   : > { %v2178_v18 = vadd.f32 %v2177_v53, %v2176_v21  ;;  %v2179_v19 = vpop.f32.mrb[38].mxu1 }
 0x3f6   : > { %v2180_v20 = vpop.f32.mrb[39].mxu1 }
 0x3f7   : > { %v2181_v32 = vadd.f32 %v2180_v20, %v2179_v19  ;;  %v3617_v47 = vadd.f32 %v2178_v18, %v3574_v30 }
 0x3f9   : > { %1392 = vadd.xlane.f32.xlu0 %v3617_v47  ;;  %v3621_v58 = vadd.f32 %v2181_v32, %v3574_v30  ;;  %v2344_v32 = vld [vmem:[#allocation10] ss:$8 sps:$4 sm:$0xff]  }
 0x3fb   : > { %1394 = vadd.xlane.f32.xlu1 %v3621_v58  ;;  %v2182_v2 = vpop.f32.mrb[40].mxu1 }
 0x3fc   : > { %v2183_v27 = vpop.f32.mrb[41].mxu1 }
 0x3fd   : > { %v2184_v22 = vadd.f32 %v2183_v27, %v2182_v2  ;;  %v2185_v13 = vpop.f32.mrb[42].mxu1  ;;  %v2346_v2 = vld [vmem:[#allocation10 + $0x4] ss:$8 sps:$4 sm:$0xff]  }
 0x3fe   : > { %v2186_v24 = vpop.f32.mrb[43].mxu1  ;;  %1785 = vmatprep.subr.bf16.mxu0 %v2346_v2 }
 0x3ff   : > { %v2187_v35 = vadd.f32 %v2186_v24, %v2185_v13  ;;  %v3625_v23 = vadd.f32 %v2184_v22, %v3574_v30  ;;  %v2349_v13 = vld [vmem:[#allocation10 + $0x14] ss:$8 sps:$4 sm:$0xff]   ;;  %1786 = vmatpush1.bf16.msra.mxu0 %v2344_v32  ;;  %v3722_v32 = vrot.slane %v3570_v25, %v3372_v4 }
 0x400   : > { %1787 = vmatprep.subr.bf16.mxu0 %v2349_v13  ;;  %v3726_v13 = vrot.slane %v3570_v25, %v3376_v50 }
 0x401   : > { %1396 = vadd.xlane.f32.xlu0 %v3625_v23  ;;  %v3629_v10 = vadd.f32 %v2187_v35, %v3574_v30 }
 0x403   : > { %1398 = vadd.xlane.f32.xlu1 %v3629_v10  ;;  %v2188_v33 = vpop.f32.mrb[44].mxu1 }
 0x404   : > { %v2189_v59 = vpop.f32.mrb[45].mxu1 }
 0x405   : > { %v2190_v61 = vadd.f32 %v2189_v59, %v2188_v33  ;;  %v2191_v6 = vpop.f32.mrb[46].mxu1 }
 0x406   : > { %v2192_v42 = vpop.f32.mrb[47].mxu1 }
 0x407   : > { %v2193_v37 = vadd.f32 %v2192_v42, %v2191_v6  ;;  %v3633_v12 = vadd.f32 %v2190_v61, %v3574_v30 }
 0x409   : > { %1400 = vadd.xlane.f32.xlu0 %v3633_v12  ;;  %v3637_v26 = vadd.f32 %v2193_v37, %v3574_v30 }
 0x40b   : > { %1402 = vadd.xlane.f32.xlu1 %v3637_v26 }
 0x454   : > { %v1373_v16 = vpop.xlane.xlu0 %1372 }
 0x455   : > { %v1405_v51 = vmul.f32 0.0078125, %v1373_v16 }
 0x456   : > { %v1375_v1 = vpop.xlane.xlu1 %1374 }
 0x457   : > { %v3641_v57 = vsub.f32 %v3577_v7, %v1405_v51  ;;  %v1406_v48 = vmul.f32 0.0078125, %v1375_v1  ;;  %v2350_v1 = vld [vmem:[#allocation10 + $0x20] ss:$8 sps:$4 sm:$0xff]  }
 0x459   : > { %v3644_v44 = vsub.f32 %v3581_v36, %v1406_v48  ;;  %v1437_v54 = vmul.f32 %v3641_v57, %v3641_v57  ;;  %v2352_v48 = vld [vmem:[#allocation10 + $0x24] ss:$8 sps:$4 sm:$0xff]  }
 0x45b   : > { %1453 = vadd.xlane.f32.xlu0 %v1437_v54  ;;  %v1438_v30 = vmul.f32 %v3644_v44, %v3644_v44 }
 0x45d   : > { %1455 = vadd.xlane.f32.xlu1 %v1438_v30  ;;  %v2355_v30 = vld [vmem:[#allocation10 + $0x34] ss:$8 sps:$4 sm:$0xff]  }
 0x460   : > { %v1377_v49 = vpop.xlane.xlu0 %1376 }
 0x461   : > { %v1407_v3 = vmul.f32 0.0078125, %v1377_v49 }
 0x462   : > { %v1379_v40 = vpop.xlane.xlu1 %1378 }
 0x463   : > { %v3651_v0 = vsub.f32 %v3585_v9, %v1407_v3  ;;  %v1408_v7 = vmul.f32 0.0078125, %v1379_v40  ;;  %v2353_v3 = vld [vmem:[#allocation10 + $0x30] ss:$8 sps:$4 sm:$0xff]  }
 0x465   : > { %v3654_v28 = vsub.f32 %v3589_v15, %v1408_v7  ;;  %v1439_v36 = vmul.f32 %v3651_v0, %v3651_v0 }
 0x467   : > { %1457 = vadd.xlane.f32.xlu0 %v1439_v36  ;;  %v1440_v31 = vmul.f32 %v3654_v28, %v3654_v28 }
 0x469   : > { %1459 = vadd.xlane.f32.xlu1 %v1440_v31  ;;  %v2356_v31 = vld [vmem:[#allocation10 + $0x40] ss:$8 sps:$4 sm:$0xff]  }
 0x46e   : > { %v1381_v55 = vpop.xlane.xlu0 %1380 }
 0x46f   : > { %v1409_v45 = vmul.f32 0.0078125, %v1381_v55  ;;  %v2358_v55 = vld [vmem:[#allocation10 + $0x44] ss:$8 sps:$4 sm:$0xff]  }
 0x470   : > { %v1383_v46 = vpop.xlane.xlu1 %1382 }
 0x471   : > { %v3661_v8 = vsub.f32 %v3593_v62, %v1409_v45  ;;  %v1410_v9 = vmul.f32 0.0078125, %v1383_v46 }
 0x473   : > { %v3664_v60 = vsub.f32 %v3597_v52, %v1410_v9  ;;  %v1441_v15 = vmul.f32 %v3661_v8, %v3661_v8  ;;  %v2361_v9 = vld [vmem:[#allocation10 + $0x54] ss:$8 sps:$4 sm:$0xff]  }
 0x475   : > { %1461 = vadd.xlane.f32.xlu0 %v1441_v15  ;;  %v1442_v63 = vmul.f32 %v3664_v60, %v3664_v60 }
 0x476   : > { %v1385_v34 = vpop.xlane.xlu0 %1384 }
 0x477   : > { %v1411_v5 = vmul.f32 0.0078125, %v1385_v34  ;;  %1463 = vadd.xlane.f32.xlu1 %v1442_v63  ;;  %v2359_v63 = vld [vmem:[#allocation10 + $0x50] ss:$8 sps:$4 sm:$0xff]   ;;  %v2364_v34 = vld [vmem:[#allocation10 + $0x64] ss:$8 sps:$4 sm:$0xff]  }
 0x478   : > { %v1387_v11 = vpop.xlane.xlu1 %1386 }
 0x479   : > { %v3671_v56 = vsub.f32 %v3601_v29, %v1411_v5  ;;  %v1412_v62 = vmul.f32 0.0078125, %v1387_v11  ;;  %v2367_v5 = vld [vmem:[#allocation10 + $0x74] ss:$8 sps:$4 sm:$0xff]  }
 0x47b   : > { %v3674_v39 = vsub.f32 %v3605_v38, %v1412_v62  ;;  %v1443_v52 = vmul.f32 %v3671_v56, %v3671_v56 }
 0x47d   : > { %1465 = vadd.xlane.f32.xlu0 %v1443_v52  ;;  %v1444_v17 = vmul.f32 %v3674_v39, %v3674_v39 }
 0x47e   : > { %v1389_v21 = vpop.xlane.xlu0 %1388 }
 0x47f   : > { %v1413_v53 = vmul.f32 0.0078125, %v1389_v21  ;;  %1467 = vadd.xlane.f32.xlu1 %v1444_v17 }
 0x480   : > { %v1391_v18 = vpop.xlane.xlu1 %1390 }
 0x481   : > { %v3681_v19 = vsub.f32 %v3609_v41, %v1413_v53  ;;  %v1414_v29 = vmul.f32 0.0078125, %v1391_v18  ;;  %v2347_v41 = vld [vmem:[#allocation10 + $0x10] ss:$8 sps:$4 sm:$0xff]  }
 0x482   : > { %1788 = vmatpush1.bf16.msra.mxu0 %v2347_v41 }
 0x483   : > { %v3684_v20 = vsub.f32 %v3613_v14, %v1414_v29  ;;  %v1445_v38 = vmul.f32 %v3681_v19, %v3681_v19  ;;  %1789 = vmatprep.subr.bf16.mxu0 %v2352_v48 }
 0x485   : > { %1469 = vadd.xlane.f32.xlu0 %v1445_v38  ;;  %v1446_v27 = vmul.f32 %v3684_v20, %v3684_v20 }
 0x486   : > { %v1393_v22 = vpop.xlane.xlu0 %1392  ;;  %1790 = vmatpush1.bf16.msra.mxu0 %v2350_v1 }
 0x487   : > { %v1415_v24 = vmul.f32 0.0078125, %v1393_v22  ;;  %1471 = vadd.xlane.f32.xlu1 %v1446_v27  ;;  %1791 = vmatprep.subr.bf16.mxu0 %v2355_v30 }
 0x488   : > { %v1395_v35 = vpop.xlane.xlu1 %1394 }
 0x489   : > { %v3691_v14 = vsub.f32 %v3617_v47, %v1415_v24  ;;  %v1416_v33 = vmul.f32 0.0078125, %v1395_v35 }
 0x48a   : > { %1792 = vmatpush1.bf16.msra.mxu0 %v2353_v3 }
 0x48b   : > { %v3694_v59 = vsub.f32 %v3621_v58, %v1416_v33  ;;  %v1447_v61 = vmul.f32 %v3691_v14, %v3691_v14  ;;  %1793 = vmatprep.subr.bf16.mxu0 %v2358_v55 }
 0x48d   : > { %1473 = vadd.xlane.f32.xlu0 %v1447_v61  ;;  %v1448_v6 = vmul.f32 %v3694_v59, %v3694_v59 }
 0x48e   : > { %v1397_v42 = vpop.xlane.xlu0 %1396  ;;  %1794 = vmatpush1.bf16.msra.mxu0 %v2356_v31 }
 0x48f   : > { %v1417_v37 = vmul.f32 0.0078125, %v1397_v42  ;;  %1475 = vadd.xlane.f32.xlu1 %v1448_v6  ;;  %1795 = vmatprep.subr.bf16.mxu0 %v2361_v9 }
 0x490   : > { %v1399_v16 = vpop.xlane.xlu1 %1398 }
 0x491   : > { %v3701_v51 = vsub.f32 %v3625_v23, %v1417_v37  ;;  %v1418_v47 = vmul.f32 0.0078125, %v1399_v16 }
 0x492   : > { %1796 = vmatpush1.bf16.msra.mxu0 %v2359_v63 }
 0x493   : > { %v3704_v58 = vsub.f32 %v3629_v10, %v1418_v47  ;;  %v1449_v54 = vmul.f32 %v3701_v51, %v3701_v51  ;;  %1797 = vmatprep.subr.bf16.mxu0 %v2364_v34 }
 0x495   : > { %1477 = vadd.xlane.f32.xlu0 %v1449_v54  ;;  %v1450_v49 = vmul.f32 %v3704_v58, %v3704_v58 }
 0x496   : > { %v1401_v40 = vpop.xlane.xlu0 %1400 }
 0x497   : > { %v1419_v23 = vmul.f32 0.0078125, %v1401_v40  ;;  %1479 = vadd.xlane.f32.xlu1 %v1450_v49 }
 0x498   : > { %v1403_v7 = vpop.xlane.xlu1 %1402 }
 0x499   : > { %v3711_v36 = vsub.f32 %v3633_v12, %v1419_v23  ;;  %v1420_v10 = vmul.f32 0.0078125, %v1403_v7  ;;  %v2362_v12 = vld [vmem:[#allocation10 + $0x60] ss:$8 sps:$4 sm:$0xff]  }
 0x49a   : > { %1798 = vmatpush1.bf16.msra.mxu0 %v2362_v12 }
 0x49b   : > { %v3714_v45 = vsub.f32 %v3637_v26, %v1420_v10  ;;  %v1451_v46 = vmul.f32 %v3711_v36, %v3711_v36  ;;  %v2365_v26 = vld [vmem:[#allocation10 + $0x70] ss:$8 sps:$4 sm:$0xff]   ;;  %1799 = vmatprep.subr.bf16.mxu0 %v2367_v5 }
 0x49d   : > { %1481 = vadd.xlane.f32.xlu0 %v1451_v46  ;;  %v1452_v15 = vmul.f32 %v3714_v45, %v3714_v45 }
 0x49e   : > { %1800 = vmatpush1.bf16.msra.mxu0 %v2365_v26 }
 0x49f   : > { %1483 = vadd.xlane.f32.xlu1 %v1452_v15 }
 0x4e8   : > { %v1454_v11 = vpop.xlane.xlu0 %1453 }
 0x4e9   : > { %v1485_v62 = vmul.f32 0.0078125, %v1454_v11 }
 0x4ea   : > { %v1456_v52 = vpop.xlane.xlu1 %1455 }
 0x4eb   : > { %v1501_v17 = vadd.f32 1e-05, %v1485_v62  ;;  %v1486_v21 = vmul.f32 0.0078125, %v1456_v52 }
 0x4ed   : > { %2464 = vrsqrt.f32 %v1501_v17  ;;  %v1502_v53 = vadd.f32 1e-05, %v1486_v21 }
 0x4ef   : > { %2466 = vrsqrt.f32 %v1502_v53 }
 0x4f4   : > { %v1458_v18 = vpop.xlane.xlu0 %1457 }
 0x4f5   : > { %v1487_v29 = vmul.f32 0.0078125, %v1458_v18 }
 0x4f6   : > { %v1460_v38 = vpop.xlane.xlu1 %1459 }
 0x4f7   : > { %v1503_v2 = vadd.f32 1e-05, %v1487_v29  ;;  %v1488_v27 = vmul.f32 0.0078125, %v1460_v38  ;;  %v2465_v22 = vpop.eup %2464 }
 0x4f8   : > { %v1533_v24 = vmul.f32 %v2465_v22, %v3641_v57 }
 0x4f9   : > { %2468 = vrsqrt.f32 %v1503_v2  ;;  %v1504_v41 = vadd.f32 1e-05, %v1488_v27  ;;  %v2467_v35 = vpop.eup %2466 }
 0x4fa   : > { %v1553_v33 = vmul.f32 %v3722_v32, %v1533_v24  ;;  %v1534_v61 = vmul.f32 %v2467_v35, %v3644_v44 }
 0x4fb   : > { %2470 = vrsqrt.f32 %v1504_v41 }
 0x4fc   : > { %v1573_v6 = vadd.f32 %v3726_v13, %v1553_v33  ;;  %v1554_v42 = vmul.f32 %v3722_v32, %v1534_v61  ;;  %v3945_v33 = vmov 0  }
 0x4fe   : > { %v1605_v37 = vmul.f32 0.70710677, %v1573_v6  ;;  %v1574_v16 = vadd.f32 %v3726_v13, %v1554_v42  ;;  %v1589_v5 = vmul.f32 0.5, %v1573_v6 }
 0x500   : > { %v1606_v47 = vmul.f32 0.70710677, %v1574_v16  ;;  %2472 = verf.f32 %v1605_v37  ;;  %v1590_v26 = vmul.f32 0.5, %v1574_v16 }
 0x502   : > { %v1462_v50 = vpop.xlane.xlu0 %1461  ;;  %2474 = verf.f32 %v1606_v47 }
 0x503   : > { %v2469_v25 = vpop.eup %2468  ;;  %v1489_v57 = vmul.f32 0.0078125, %v1462_v50 }
 0x504   : > { %v1535_v1 = vmul.f32 %v2469_v25, %v3651_v0  ;;  %v1464_v48 = vpop.xlane.xlu1 %1463 }
 0x505   : > { %v2471_v54 = vpop.eup %2470  ;;  %v1505_v30 = vadd.f32 1e-05, %v1489_v57  ;;  %v1490_v44 = vmul.f32 0.0078125, %v1464_v48 }
 0x506   : > { %v1536_v49 = vmul.f32 %v2471_v54, %v3654_v28  ;;  %v1555_v3 = vmul.f32 %v3722_v32, %v1535_v1 }
 0x507   : > { %2476 = vrsqrt.f32 %v1505_v30  ;;  %v1506_v40 = vadd.f32 1e-05, %v1490_v44 }
 0x508   : > { %v1556_v23 = vmul.f32 %v3722_v32, %v1536_v49  ;;  %v1575_v7 = vadd.f32 %v3726_v13, %v1555_v3 }
 0x509   : > { %2478 = vrsqrt.f32 %v1506_v40 }
 0x50a   : > { %v1466_v10 = vpop.xlane.xlu0 %1465  ;;  %v1576_v31 = vadd.f32 %v3726_v13, %v1556_v23  ;;  %v1607_v55 = vmul.f32 0.70710677, %v1575_v7  ;;  %v2473_v0 = vpop.eup %2472  ;;  %v1591_v25 = vmul.f32 0.5, %v1575_v7 }
 0x50b   : > { %v1491_v46 = vmul.f32 0.0078125, %v1466_v10  ;;  %v1637_v15 = vadd.f32 1.0, %v2473_v0 }
 0x50c   : > { %v1468_v9 = vpop.xlane.xlu1 %1467  ;;  %v1608_v63 = vmul.f32 0.70710677, %v1576_v31  ;;  %2480 = verf.f32 %v1607_v55  ;;  %v2475_v28 = vpop.eup %2474  ;;  %v1592_v57 = vmul.f32 0.5, %v1576_v31 }
 0x50d   : > { %v1507_v12 = vadd.f32 1e-05, %v1491_v46  ;;  %v1492_v34 = vmul.f32 0.0078125, %v1468_v9  ;;  %v1638_v11 = vadd.f32 1.0, %v2475_v28  ;;  %v1653_v52 = vmul.f32 %v1637_v15, %v1589_v5 }
 0x50e   : > { %2482 = verf.f32 %v1608_v63 }
 0x50f   : > { %2484 = vrsqrt.f32 %v1507_v12  ;;  %v1508_v62 = vadd.f32 1e-05, %v1492_v34  ;;  %v1654_v17 = vmul.f32 %v1638_v11, %v1590_v26 }
 0x511   : > { %v2477_v21 = vpop.eup %2476  ;;  %2486 = vrsqrt.f32 %v1508_v62  ;;  %v1669_v29 = vpack.c.bf16 %v1654_v17, %v1653_v52 }
 0x512   : > { %v1537_v53 = vmul.f32 %v2477_v21, %v3661_v8  ;;  %v1470_v18 = vpop.xlane.xlu0 %1469 }
 0x513   : > { %v2479_v38 = vpop.eup %2478  ;;  %v1493_v2 = vmul.f32 0.0078125, %v1470_v18  ;;  %1818 = vmatmul.mubr.bf16.vlgmr.msra.gmra.mrb[16].mxu0 %v1669_v29 }
 0x514   : > { %v1538_v27 = vmul.f32 %v2479_v38, %v3664_v60  ;;  %v1472_v22 = vpop.xlane.xlu1 %1471  ;;  %v1557_v24 = vmul.f32 %v3722_v32, %v1537_v53  ;;  %1827 = vmatprep.mubr.bf16.mxu0 %v3945_v33 }
 0x515   : > { %v1509_v41 = vadd.f32 1e-05, %v1493_v2  ;;  %v1494_v35 = vmul.f32 0.0078125, %v1472_v22 }
 0x516   : > { %v2481_v61 = vpop.eup %2480  ;;  %v1558_v6 = vmul.f32 %v3722_v32, %v1538_v27  ;;  %v1577_v42 = vadd.f32 %v3726_v13, %v1557_v24 }
 0x517   : > { %2488 = vrsqrt.f32 %v1509_v41  ;;  %v1510_v8 = vadd.f32 1e-05, %v1494_v35  ;;  %v1639_v37 = vadd.f32 1.0, %v2481_v61 }
 0x518   : > { %v2483_v16 = vpop.eup %2482  ;;  %v1578_v47 = vadd.f32 %v3726_v13, %v1558_v6  ;;  %v1609_v60 = vmul.f32 0.70710677, %v1577_v42  ;;  %v1593_v38 = vmul.f32 0.5, %v1577_v42 }
 0x519   : > { %v2485_v50 = vpop.eup %2484  ;;  %2490 = vrsqrt.f32 %v1510_v8  ;;  %v1640_v1 = vadd.f32 1.0, %v2483_v16  ;;  %v1655_v3 = vmul.f32 %v1639_v37, %v1591_v25 }
 0x51a   : > { %v1539_v48 = vmul.f32 %v2485_v50, %v3671_v56  ;;  %v1474_v54 = vpop.xlane.xlu0 %1473  ;;  %v1610_v30 = vmul.f32 0.70710677, %v1578_v47  ;;  %2492 = verf.f32 %v1609_v60  ;;  %v1594_v22 = vmul.f32 0.5, %v1578_v47 }
 0x51b   : > { %v2487_v44 = vpop.eup %2486  ;;  %v1495_v49 = vmul.f32 0.0078125, %v1474_v54  ;;  %v1656_v40 = vmul.f32 %v1640_v1, %v1592_v57 }
 0x51c   : > { %v1540_v23 = vmul.f32 %v2487_v44, %v3674_v39  ;;  %v1476_v10 = vpop.xlane.xlu1 %1475  ;;  %2494 = verf.f32 %v1610_v30  ;;  %v1559_v55 = vmul.f32 %v3722_v32, %v1539_v48 }
 0x51d   : > { %v1511_v0 = vadd.f32 1e-05, %v1495_v49  ;;  %v1496_v46 = vmul.f32 0.0078125, %v1476_v10  ;;  %v1670_v7 = vpack.c.bf16 %v1656_v40, %v1655_v3 }
 0x51e   : > { %v1560_v31 = vmul.f32 %v3722_v32, %v1540_v23  ;;  %v1579_v56 = vadd.f32 %v3726_v13, %v1559_v55 }
 0x51f   : > { %2496 = vrsqrt.f32 %v1511_v0  ;;  %v1512_v9 = vadd.f32 1e-05, %v1496_v46  ;;  %1828 = vmatmul.mubr.bf16.gmra.mrb[20].mxu0 %v1670_v7 }
 0x520   : > { %1837 = vmatprep.mubr.bf16.mxu0 %v3945_v33  ;;  %v1580_v15 = vadd.f32 %v3726_v13, %v1560_v31  ;;  %v1611_v63 = vmul.f32 0.70710677, %v1579_v56 }
 0x521   : > { %v2489_v39 = vpop.eup %2488  ;;  %2498 = vrsqrt.f32 %v1512_v9 }
 0x522   : > { %v1541_v28 = vmul.f32 %v2489_v39, %v3681_v19  ;;  %v1478_v12 = vpop.xlane.xlu0 %1477  ;;  %v1612_v34 = vmul.f32 0.70710677, %v1580_v15  ;;  %2500 = verf.f32 %v1611_v63  ;;  %v1596_v23 = vmul.f32 0.5, %v1580_v15 }
 0x523   : > { %v2491_v5 = vpop.eup %2490  ;;  %v1497_v26 = vmul.f32 0.0078125, %v1478_v12 }
 0x524   : > { %v2493_v11 = vpop.eup %2492  ;;  %v1542_v62 = vmul.f32 %v2491_v5, %v3684_v20  ;;  %v1480_v52 = vpop.xlane.xlu1 %1479  ;;  %2502 = verf.f32 %v1612_v34  ;;  %v1561_v17 = vmul.f32 %v3722_v32, %v1541_v28 }
 0x525   : > { %v1513_v21 = vadd.f32 1e-05, %v1497_v26  ;;  %v1498_v53 = vmul.f32 0.0078125, %v1480_v52  ;;  %v1641_v18 = vadd.f32 1.0, %v2493_v11 }
 0x526   : > { %v2495_v29 = vpop.eup %2494  ;;  %v1562_v2 = vmul.f32 %v3722_v32, %v1542_v62  ;;  %v1581_v19 = vadd.f32 %v3726_v13, %v1561_v17 }
 0x527   : > { %2504 = vrsqrt.f32 %v1513_v21  ;;  %v1514_v27 = vadd.f32 1e-05, %v1498_v53  ;;  %v1642_v24 = vadd.f32 1.0, %v2495_v29  ;;  %v1657_v61 = vmul.f32 %v1641_v18, %v1593_v38 }
 0x528   : > { %v1582_v41 = vadd.f32 %v3726_v13, %v1562_v2  ;;  %v1613_v20 = vmul.f32 0.70710677, %v1581_v19 }
 0x529   : > { %v2497_v35 = vpop.eup %2496  ;;  %2506 = vrsqrt.f32 %v1514_v27  ;;  %v1658_v6 = vmul.f32 %v1642_v24, %v1594_v22 }
 0x52a   : > { %v1543_v8 = vmul.f32 %v2497_v35, %v3691_v14  ;;  %v1482_v37 = vpop.xlane.xlu0 %1481  ;;  %v1614_v16 = vmul.f32 0.70710677, %v1582_v41  ;;  %2508 = verf.f32 %v1613_v20  ;;  %v1595_v14 = vmul.f32 0.5, %v1579_v56 }
 0x52b   : > { %v2499_v42 = vpop.eup %2498  ;;  %v1499_v60 = vmul.f32 0.0078125, %v1482_v37  ;;  %v1671_v50 = vpack.c.bf16 %v1658_v6, %v1657_v61  ;;  %v1598_v11 = vmul.f32 0.5, %v1582_v41 }
 0x52c   : > { %v2501_v25 = vpop.eup %2500  ;;  %v1544_v57 = vmul.f32 %v2499_v42, %v3694_v59  ;;  %v1484_v47 = vpop.xlane.xlu1 %1483  ;;  %2510 = verf.f32 %v1614_v16  ;;  %v1563_v1 = vmul.f32 %v3722_v32, %v1543_v8 }
 0x52d   : > { %v1515_v48 = vadd.f32 1e-05, %v1499_v60  ;;  %v1500_v54 = vmul.f32 0.0078125, %v1484_v47  ;;  %1838 = vmatmul.mubr.bf16.gmra.mrb[24].mxu0 %v1671_v50  ;;  %v1643_v30 = vadd.f32 1.0, %v2501_v25 }
 0x52e   : > { %v2503_v44 = vpop.eup %2502  ;;  %1847 = vmatprep.mubr.bf16.mxu0 %v3945_v33  ;;  %v1564_v49 = vmul.f32 %v3722_v32, %v1544_v57  ;;  %v1583_v3 = vadd.f32 %v3726_v13, %v1563_v1 }
 0x52f   : > { %2512 = vrsqrt.f32 %v1515_v48  ;;  %v1516_v40 = vadd.f32 1e-05, %v1500_v54  ;;  %v1644_v59 = vadd.f32 1.0, %v2503_v44  ;;  %v1659_v46 = vmul.f32 %v1643_v30, %v1595_v14 }
 0x530   : > { %v1584_v10 = vadd.f32 %v3726_v13, %v1564_v49  ;;  %v1615_v55 = vmul.f32 0.70710677, %v1583_v3 }
 0x531   : > { %v2505_v0 = vpop.eup %2504  ;;  %2514 = vrsqrt.f32 %v1516_v40  ;;  %v1660_v7 = vmul.f32 %v1644_v59, %v1596_v23 }
 0x532   : > { %v1545_v31 = vmul.f32 %v2505_v0, %v3701_v51  ;;  %v1616_v9 = vmul.f32 0.70710677, %v1584_v10  ;;  %2516 = verf.f32 %v1615_v55  ;;  %v1597_v51 = vmul.f32 0.5, %v1581_v19  ;;  %v1693_v55 = vld [vmem:[%s3916_s6] sm:$0x3] }
 0x533   : > { %v2507_v56 = vpop.eup %2506  ;;  %v1672_v63 = vpack.c.bf16 %v1660_v7, %v1659_v46  ;;  %v1600_v61 = vmul.f32 0.5, %v1584_v10  ;;  %v3788_v0 = vrot.slane %v1693_v55, %v3069_v43  ;;  %v3791_v46 = vrot.slane %v1693_v55, %v3372_v4 }
 0x534   : > { %v2509_v39 = vpop.eup %2508  ;;  %v1546_v28 = vmul.f32 %v2507_v56, %v3704_v58  ;;  %2518 = verf.f32 %v1616_v9  ;;  %v1565_v15 = vmul.f32 %v3722_v32, %v1545_v31 }
 0x535   : > { %1848 = vmatmul.mubr.bf16.gmra.mrb[28].mxu0 %v1672_v63  ;;  %v1645_v12 = vadd.f32 1.0, %v2509_v39 }
 0x536   : > { %v2511_v34 = vpop.eup %2510  ;;  %1857 = vmatprep.mubr.bf16.mxu0 %v3945_v33  ;;  %v1566_v5 = vmul.f32 %v3722_v32, %v1546_v28  ;;  %v1585_v26 = vadd.f32 %v3726_v13, %v1565_v15 }
 0x537   : > { %v1646_v62 = vadd.f32 1.0, %v2511_v34  ;;  %v1661_v58 = vmul.f32 %v1645_v12, %v1597_v51 }
 0x538   : > { %v1586_v52 = vadd.f32 %v3726_v13, %v1566_v5  ;;  %v1617_v17 = vmul.f32 0.70710677, %v1585_v26 }
 0x539   : > { %v2513_v21 = vpop.eup %2512  ;;  %v1662_v53 = vmul.f32 %v1646_v62, %v1598_v11 }
 0x53a   : > { %v1547_v18 = vmul.f32 %v2513_v21, %v3711_v36  ;;  %v1618_v29 = vmul.f32 0.70710677, %v1586_v52  ;;  %2520 = verf.f32 %v1617_v17  ;;  %v1599_v36 = vmul.f32 0.5, %v1583_v3 }
 0x53b   : > { %v2515_v38 = vpop.eup %2514  ;;  %v1673_v2 = vpack.c.bf16 %v1662_v53, %v1661_v58  ;;  %v1602_v47 = vmul.f32 0.5, %v1586_v52 }
 0x53c   : > { %v2517_v27 = vpop.eup %2516  ;;  %v1548_v22 = vmul.f32 %v2515_v38, %v3714_v45  ;;  %2522 = verf.f32 %v1618_v29  ;;  %v1567_v19 = vmul.f32 %v3722_v32, %v1547_v18 }
 0x53d   : > { %1858 = vmatmul.mubr.bf16.gmra.mrb[32].mxu0 %v1673_v2  ;;  %v1647_v24 = vadd.f32 1.0, %v2517_v27 }
 0x53e   : > { %v2519_v41 = vpop.eup %2518  ;;  %1867 = vmatprep.mubr.bf16.mxu0 %v3945_v33  ;;  %v1568_v20 = vmul.f32 %v3722_v32, %v1548_v22  ;;  %v1587_v35 = vadd.f32 %v3726_v13, %v1567_v19  ;;  %v1601_v32 = vmul.f32 0.5, %v1585_v26 }
 0x53f   : > { %v1648_v6 = vadd.f32 1.0, %v2519_v41  ;;  %v1663_v16 = vmul.f32 %v1647_v24, %v1599_v36 }
 0x540   : > { %v1588_v8 = vadd.f32 %v3726_v13, %v1568_v20  ;;  %v1619_v37 = vmul.f32 0.70710677, %v1587_v35  ;;  %v1603_v49 = vmul.f32 0.5, %v1587_v35 }
 0x541   : > { %v1664_v45 = vmul.f32 %v1648_v6, %v1600_v61 }
 0x542   : > { %v1620_v42 = vmul.f32 0.70710677, %v1588_v8  ;;  %2524 = verf.f32 %v1619_v37  ;;  %v1604_v3 = vmul.f32 0.5, %v1588_v8 }
 0x543   : > { %v1674_v60 = vpack.c.bf16 %v1664_v45, %v1663_v16 }
 0x544   : > { %v2521_v50 = vpop.eup %2520  ;;  %2526 = verf.f32 %v1620_v42 }
 0x545   : > { %1868 = vmatmul.mubr.bf16.gmra.mrb[36].mxu0 %v1674_v60  ;;  %v1649_v25 = vadd.f32 1.0, %v2521_v50 }
 0x546   : > { %v2523_v57 = vpop.eup %2522  ;;  %1877 = vmatprep.mubr.bf16.mxu0 %v3945_v33 }
 0x547   : > { %v1650_v1 = vadd.f32 1.0, %v2523_v57  ;;  %v1665_v48 = vmul.f32 %v1649_v25, %v1601_v32 }
 0x549   : > { %v1666_v54 = vmul.f32 %v1650_v1, %v1602_v47 }
 0x54b   : > { %v1675_v13 = vpack.c.bf16 %v1666_v54, %v1665_v48 }
 0x54c   : > { %v2525_v30 = vpop.eup %2524 }
 0x54d   : > { %1878 = vmatmul.mubr.bf16.gmra.mrb[40].mxu0 %v1675_v13  ;;  %v1651_v44 = vadd.f32 1.0, %v2525_v30 }
 0x54e   : > { %v2527_v14 = vpop.eup %2526  ;;  %1887 = vmatprep.mubr.bf16.mxu0 %v3945_v33 }
 0x54f   : > { %v1652_v40 = vadd.f32 1.0, %v2527_v14  ;;  %v1667_v23 = vmul.f32 %v1651_v44, %v1603_v49 }
 0x551   : > { %v1668_v59 = vmul.f32 %v1652_v40, %v1604_v3 }
 0x553   : > { %v1676_v10 = vpack.c.bf16 %v1668_v59, %v1667_v23 }
 0x555   : > { %1888 = vmatmul.mubr.bf16.gmra.mrb[44].mxu0 %v1676_v10 }
 0x5e6   : > { %v1819_v7 = vpop.f32.mrb[16].mxu0 }
 0x5e7   : > { %v1820_v33 = vadd.f32 %v1819_v7, %v3788_v0  ;;  %v1821_v31 = vpop.f32.mrb[17].mxu0 }
 0x5e8   : > { %v1822_v9 = vadd.f32 %v1821_v31, %v3791_v46  ;;  %v1823_v56 = vpop.f32.mrb[18].mxu0 }
 0x5e9   : > { %1898 = vst [vmem:[%s3795_s13] sm:$0xff] %v1820_v33  ;;  %v1824_v43 = vadd.f32 %v1823_v56, %v3788_v0  ;;  %v1825_v4 = vpop.f32.mrb[19].mxu0 }
 0x5ea   : > { %1899 = vst [vmem:[%s3795_s13 + $0x8] sm:$0xff] %v1822_v9  ;;  %v1826_v63 = vadd.f32 %v1825_v4, %v3791_v46 }
 0x5eb   : > { %1900 = vst [vmem:[%s3795_s13 + $0x10] sm:$0xff] %v1824_v43 }
 0x5ec   : > { %1901 = vst [vmem:[%s3795_s13 + $0x18] sm:$0xff] %v1826_v63 }
 0x5f2   : > { %v1829_v39 = vpop.f32.mrb[20].mxu0 }
 0x5f3   : > { %v1830_v28 = vadd.f32 %v1829_v39, %v3788_v0  ;;  %v1831_v15 = vpop.f32.mrb[21].mxu0 }
 0x5f4   : > { %v1832_v12 = vadd.f32 %v1831_v15, %v3791_v46  ;;  %v1833_v34 = vpop.f32.mrb[22].mxu0 }
 0x5f5   : > { %1902 = vst [vmem:[%s3795_s13 + $0x20] sm:$0xff] %v1830_v28  ;;  %v1834_v5 = vadd.f32 %v1833_v34, %v3788_v0  ;;  %v1835_v26 = vpop.f32.mrb[23].mxu0 }
 0x5f6   : > { %1903 = vst [vmem:[%s3795_s13 + $0x28] sm:$0xff] %v1832_v12  ;;  %v1836_v51 = vadd.f32 %v1835_v26, %v3791_v46 }
 0x5f7   : > { %1904 = vst [vmem:[%s3795_s13 + $0x30] sm:$0xff] %v1834_v5 }
 0x5f8   : > { %1905 = vst [vmem:[%s3795_s13 + $0x38] sm:$0xff] %v1836_v51 }
 0x600   : > { %v1839_v11 = vpop.f32.mrb[24].mxu0 }
 0x601   : > { %v1840_v62 = vadd.f32 %v1839_v11, %v3788_v0  ;;  %v1841_v52 = vpop.f32.mrb[25].mxu0 }
 0x602   : > { %v1842_v17 = vadd.f32 %v1841_v52, %v3791_v46  ;;  %v1843_v21 = vpop.f32.mrb[26].mxu0 }
 0x603   : > { %1906 = vst [vmem:[%s3795_s13 + $0x40] sm:$0xff] %v1840_v62  ;;  %v1844_v58 = vadd.f32 %v1843_v21, %v3788_v0  ;;  %v1845_v53 = vpop.f32.mrb[27].mxu0 }
 0x604   : > { %1907 = vst [vmem:[%s3795_s13 + $0x48] sm:$0xff] %v1842_v17  ;;  %v1846_v18 = vadd.f32 %v1845_v53, %v3791_v46 }
 0x605   : > { %1908 = vst [vmem:[%s3795_s13 + $0x50] sm:$0xff] %v1844_v58 }
 0x606   : > { %1909 = vst [vmem:[%s3795_s13 + $0x58] sm:$0xff] %v1846_v18 }
 0x608   : > { %v1849_v29 = vpop.f32.mrb[28].mxu0 }
 0x609   : > { %v1850_v38 = vadd.f32 %v1849_v29, %v3788_v0  ;;  %v1851_v2 = vpop.f32.mrb[29].mxu0 }
 0x60a   : > { %v1852_v27 = vadd.f32 %v1851_v2, %v3791_v46  ;;  %v1853_v22 = vpop.f32.mrb[30].mxu0 }
 0x60b   : > { %1910 = vst [vmem:[%s3795_s13 + $0x60] sm:$0xff] %v1850_v38  ;;  %v1854_v19 = vadd.f32 %v1853_v22, %v3788_v0  ;;  %v1855_v24 = vpop.f32.mrb[31].mxu0 }
 0x60c   : > { %1911 = vst [vmem:[%s3795_s13 + $0x68] sm:$0xff] %v1852_v27  ;;  %v1856_v41 = vadd.f32 %v1855_v24, %v3791_v46 }
 0x60d   : > { %1912 = vst [vmem:[%s3795_s13 + $0x70] sm:$0xff] %v1854_v19 }
 0x60e   : > { %1913 = vst [vmem:[%s3795_s13 + $0x78] sm:$0xff] %v1856_v41 }
 0x610   : > { %v1859_v20 = vpop.f32.mrb[32].mxu0 }
 0x611   : > { %v1860_v35 = vadd.f32 %v1859_v20, %v3788_v0  ;;  %v1861_v36 = vpop.f32.mrb[33].mxu0 }
 0x612   : > { %v1862_v61 = vadd.f32 %v1861_v36, %v3791_v46  ;;  %v1863_v6 = vpop.f32.mrb[34].mxu0 }
 0x613   : > { %1914 = vst [vmem:[%s3795_s13 + $0x80] sm:$0xff] %v1860_v35  ;;  %v1864_v8 = vadd.f32 %v1863_v6, %v3788_v0  ;;  %v1865_v37 = vpop.f32.mrb[35].mxu0 }
 0x614   : > { %1915 = vst [vmem:[%s3795_s13 + $0x88] sm:$0xff] %v1862_v61  ;;  %v1866_v16 = vadd.f32 %v1865_v37, %v3791_v46 }
 0x615   : > { %1916 = vst [vmem:[%s3795_s13 + $0x90] sm:$0xff] %v1864_v8 }
 0x616   : > { %1917 = vst [vmem:[%s3795_s13 + $0x98] sm:$0xff] %v1866_v16 }
 0x618   : > { %v1869_v45 = vpop.f32.mrb[36].mxu0 }
 0x619   : > { %v1870_v42 = vadd.f32 %v1869_v45, %v3788_v0  ;;  %v1871_v60 = vpop.f32.mrb[37].mxu0 }
 0x61a   : > { %v1872_v50 = vadd.f32 %v1871_v60, %v3791_v46  ;;  %v1873_v25 = vpop.f32.mrb[38].mxu0 }
 0x61b   : > { %1918 = vst [vmem:[%s3795_s13 + $0xa0] sm:$0xff] %v1870_v42  ;;  %v1874_v57 = vadd.f32 %v1873_v25, %v3788_v0  ;;  %v1875_v32 = vpop.f32.mrb[39].mxu0 }
 0x61c   : > { %1919 = vst [vmem:[%s3795_s13 + $0xa8] sm:$0xff] %v1872_v50  ;;  %v1876_v47 = vadd.f32 %v1875_v32, %v3791_v46 }
 0x61d   : > { %1920 = vst [vmem:[%s3795_s13 + $0xb0] sm:$0xff] %v1874_v57 }
 0x61e   : > { %1921 = vst [vmem:[%s3795_s13 + $0xb8] sm:$0xff] %v1876_v47 }
 0x620   : > { %v1879_v1 = vpop.f32.mrb[40].mxu0 }
 0x621   : > { %v1880_v48 = vadd.f32 %v1879_v1, %v3788_v0  ;;  %v1881_v54 = vpop.f32.mrb[41].mxu0 }
 0x622   : > { %v1882_v13 = vadd.f32 %v1881_v54, %v3791_v46  ;;  %v1883_v30 = vpop.f32.mrb[42].mxu0 }
 0x623   : > { %1922 = vst [vmem:[%s3795_s13 + $0xc0] sm:$0xff] %v1880_v48  ;;  %v1884_v44 = vadd.f32 %v1883_v30, %v3788_v0  ;;  %v1885_v14 = vpop.f32.mrb[43].mxu0 }
 0x624   : > { %1923 = vst [vmem:[%s3795_s13 + $0xc8] sm:$0xff] %v1882_v13  ;;  %v1886_v49 = vadd.f32 %v1885_v14, %v3791_v46 }
 0x625   : > { %1924 = vst [vmem:[%s3795_s13 + $0xd0] sm:$0xff] %v1884_v44 }
 0x626   : > { %1925 = vst [vmem:[%s3795_s13 + $0xd8] sm:$0xff] %v1886_v49 }
 0x628   : > { %v1889_v3 = vpop.f32.mrb[44].mxu0 }
 0x629   : > { %v1890_v40 = vadd.f32 %v1889_v3, %v3788_v0  ;;  %v1891_v23 = vpop.f32.mrb[45].mxu0 }
 0x62a   : > { %v1892_v59 = vadd.f32 %v1891_v23, %v3791_v46  ;;  %v1893_v10 = vpop.f32.mrb[46].mxu0 }
 0x62b   : > { %1926 = vst [vmem:[%s3795_s13 + $0xe0] sm:$0xff] %v1890_v40  ;;  %v1894_v55 = vadd.f32 %v1893_v10, %v3788_v0  ;;  %v1895_v7 = vpop.f32.mrb[47].mxu0 }
 0x62c   : > { %1927 = vst [vmem:[%s3795_s13 + $0xe8] sm:$0xff] %v1892_v59  ;;  %v1896_v33 = vadd.f32 %v1895_v7, %v3791_v46 }
 0x62d   : > { %1928 = vst [vmem:[%s3795_s13 + $0xf0] sm:$0xff] %v1894_v55 }
 0x62e   : > { %1929 = vst [vmem:[%s3795_s13 + $0xf8] sm:$0xff] %v1896_v33 }
 0x62f   : > { %2683 = shalt.err (!%p2680_p13)
}
 0x630   : > { %s2684_s9 = scalar_lea.hbm %s3860_s23, 4096  ;;  %s2688_s11 = scalar_lea.hbm %s3917_s7, 8192 }
 0x631   : > { %p2685_p9 = scmp.ne.s32.totalorder %s3860_s23, %s2684_s9  ;;  %p2689_p6 = scmp.lt.u32.totalorder %s3860_s23, %s3917_s7 }
 0x632   : > { %p2690_p10 = scmp.lt.u32.totalorder %s2688_s11, %s2684_s9  ;;  %p2692_p4 = scmp.lt.u32.totalorder %s2684_s9, %s3860_s23 }
 0x633   : > { %p2686_p0 = pnand %p2685_p9, %p2971_p8 }
 0x634   : > { %p2691_p3 = por %p2690_p10, %p2689_p6 }
 0x635   : > { %p2687_p11 = pneg %p2686_p0 }
 0x636   : > { %p2693_p5 = por %p2692_p4, %p2691_p3 }
 0x638   : > { %p2694_p7 = pnand %p2693_p5, %p2687_p11 }
 0x63a   : > { %2697 = shalt.err (!%p2694_p7)
}
 0x63b   : > { %s2757_s18 = smov 256   ;;  %s2758_s22 = smov 16  }
 0x63c   : > { %2228 = dma.vmem_to_hbm [thread:$0]  (%p2971_p8), %s3862_s20, 4096, %s3860_s23, %s1931_s28, %s2757_s18, %s2757_s18, %s2758_s22  }
 0x63d PF: > { %s1960_s21 = sand.u32 1, %s2732_s24   ;;  %p3946_p12 = scmp.ne.s32.totalorder %s3929_s8, 0 }
 0x63e   : > { %p3947_p1 = scmp.ge.s32.totalorder %s2744_s27, 2  ;;  %s1961_s19 = scalar_lea.sflag [#allocation4], %s1960_s21 }
 0x640   : > { %p2248_p2 = pnand %p3947_p1, %p3946_p12 }
 0x642   : > { %2727 = dma.done.wait (!%p2248_p2), %s1961_s19, 4096  }
 0x643   : > { %2729 = vsyncadd (!%p2248_p2), %s1961_s19, 4294963200  ;;  %p22_p13 = scmp.ge.s32.totalorder %s2958_s12, 4   ;;  %s3948_s24 = smov %s2736_s25 }
 0x644   : > { %s3949_s25 = smov %s2740_s26  ;;  %s3950_s26 = smov %s2967_s29 }
 0x645   : > { %s3951_s27 = smov %s2958_s12  ;;  %24 = sbr.rel (!%p22_p13) target bundleno = 9 (0x9), region = 109 }
 0x64c   :  { %1966 = vsyncpa [#allocation3], 1 }
 0x64d   :  { %1968 = vsyncpa [#allocation3 + $0x1], 1 }
 0x64e   :  { %1969 = vsyncpa [#allocation6], 1 }
 0x64f   :  { %1970 = vsyncpa [#allocation9], 1 }
 0x650   :  { %1971 = vsyncpa [#allocation4], 1 }
 0x651   :  { %1973 = vsyncpa [#allocation4 + $0x1], 1 }

</bundles_post_ra>
